<compile_context>
chip_gen: v7x
topology: tpu7x:2x2x1
jax: 0.10.0
libtpu: 0.0.40
codegen_flags: <defaults>
</compile_context>

<pallas_src>
import jax
import jax.numpy as jnp
from jax import lax
from jax.experimental import pallas as pl
from jax.experimental.pallas import tpu as pltpu


# (cin, cout, kernel_size, padding, has_gem) for cnn1..cnn6 of CNN1d_middle.
LAYER_DEFS = (
    (1, 16, 5, 1, False),
    (16, 16, 5, 1, True),
    (16, 32, 3, 1, False),
    (32, 32, 3, 1, True),
    (32, 64, 3, 1, False),
    (64, 64, 3, 0, False),
)
ATTN_DIM = 64
ATTN_HEADS = 4
GEM_EPS = 1e-6
GEM_KS = 2
CMAX = 64                                                    # channel packing width
KCIN_MAX = max(cin * k for cin, _, k, _, _ in LAYER_DEFS)    # 192


def _out_len(L0):
    L = L0
    for (_, _, K, pad, has_gem) in LAYER_DEFS:
        L = L + 2 * pad - K + 1
        if has_gem:
            L = L // GEM_KS
    return L


# ----------------------------------------------------------------------------
# The single fused kernel (runs once per batch element; grid=(B,)).
# ----------------------------------------------------------------------------
def _fused_kernel(gp_ref, x_ref, w1, w2, w3, w4, w5, w6, vec_ref,
                  wqkv_ref, bqkv_ref, wproj_ref, bproj_ref, o_ref, xcol_ref):
    w_refs = (w1, w2, w3, w4, w5, w6)
    vec = vec_ref[...]                                       # (CMAX, 3 * n_layers)

    def conv_im2col(x_cl, w2d, cin, cout, K, pad):
        """x_cl: (cin, Lin) value, w2d: (cout, K*cin) value -> (cout, Lout)."""
        Lin = x_cl.shape[1]
        Lout = Lin + 2 * pad - K + 1
        # Stage the K shifted windows (and the zero padding) into the scratch slab,
        # then do ONE matmul with contraction K*cin.
        xcol_ref[...] = jnp.zeros_like(xcol_ref)
        for k in range(K):                                   # static tap loop
            lo = max(0, pad - k)                             # python ints
            hi = min(Lout, Lin + pad - k)
            xcol_ref[k * cin:(k + 1) * cin, lo:hi] = x_cl[:, lo + k - pad:hi + k - pad]
        xcol = xcol_ref[0:K * cin, 0:Lout]                   # (K*cin, Lout)
        return jnp.dot(w2d, xcol, preferred_element_type=jnp.float32)

    def gem_pool(y, p):
        """avg_pool1d(clamp(y, eps)^p, 2)^(1/p) in (C, L) layout."""
        _, L = y.shape
        Lout = L // GEM_KS
        yc = jnp.maximum(y, GEM_EPS)
        yp = jnp.exp(p * jnp.log(yc))                        # y^p, positive base
        r = lax.broadcasted_iota(jnp.int32, (L, Lout), 0)
        c = lax.broadcasted_iota(jnp.int32, (L, Lout), 1)
        pm = jnp.where((r == 2 * c) | (r == 2 * c + 1), 0.5, 0.0)   # in-kernel pool matrix
        pooled = jnp.dot(yp, pm, preferred_element_type=jnp.float32)
        return jnp.exp(jnp.log(pooled) * (1.0 / p))          # ^(1/p)

    def bn_silu(y, s, b):
        z = y * s + b
        return z * jax.nn.sigmoid(z)

    # ------------------------ conv / GeM / BN / SiLU stack ------------------------
    x = x_ref[0]                                             # (1, L0), feature-major
    gem_p = {1: gp_ref[0], 3: gp_ref[1]}                     # cnn2 / cnn4 GeM p scalars

    for i, (cin, cout, K, pad, has_gem) in enumerate(LAYER_DEFS):
        cbias = vec[:cout, 3 * i:3 * i + 1]                  # conv bias  (cout, 1)
        bns = vec[:cout, 3 * i + 1:3 * i + 2]                # BN scale   (cout, 1)
        bnb = vec[:cout, 3 * i + 2:3 * i + 3]                # BN bias    (cout, 1)
        x = conv_im2col(x, w_refs[i][...], cin, cout, K, pad) + cbias
        if has_gem:
            x = gem_pool(x, gem_p[i])
        x = bn_silu(x, bns, bnb)

    # -------------------- MHSA1D in feature-major (C, L) layout -------------------
    C, L = x.shape
    d = C // ATTN_HEADS
    scale = float(d) ** -0.5
    qkv = jnp.dot(wqkv_ref[...], x, preferred_element_type=jnp.float32) + bqkv_ref[...]  # (3C, L)
    acc = jnp.zeros((C, L), jnp.float32)
    for h in range(ATTN_HEADS):                              # static head loop
        q = qkv[h * d:(h + 1) * d, :]                        # (d, L)
        k = qkv[C + h * d:C + (h + 1) * d, :]                # (d, L)
        v = qkv[2 * C + h * d:2 * C + (h + 1) * d, :]        # (d, L)
        logits = lax.dot_general(q, k, (((0,), (0,)), ((), ())),
                                 preferred_element_type=jnp.float32) * scale   # (Lq, Lk)
        logits = logits - jnp.max(logits, axis=-1, keepdims=True)
        e = jnp.exp(logits)
        attn = e * pl.reciprocal(jnp.sum(e, axis=-1, keepdims=True), approx=True)
        hv = lax.dot_general(v, attn, (((1,), (1,)), ((), ())),
                             preferred_element_type=jnp.float32)               # (d, Lq)
        # accumulate the output projection per head (no lane-axis concatenate)
        acc = acc + jnp.dot(wproj_ref[:, h * d:(h + 1) * d], hv,
                            preferred_element_type=jnp.float32)
    o_ref[0] = acc + bproj_ref[...]                          # (C, L) == module's (C, L) layout


# ----------------------------------------------------------------------------
# Host-side parameter packing (done once) and the fused forward pass.
# ----------------------------------------------------------------------------
def pack_params(p):
    n_layers = len(LAYER_DEFS)
    w_flat = []
    vec = jnp.zeros((CMAX, 3 * n_layers), jnp.float32)
    for i, (cin, cout, K, pad, _) in enumerate(LAYER_DEFS):
        w = p[f'w{i + 1}'].astype(jnp.float32)               # (cout, cin, K)
        # im2col-flattened weight: column index = k*cin + ci
        w_flat.append(jnp.transpose(w, (0, 2, 1)).reshape(cout, K * cin))
        vec = vec.at[:cout, 3 * i].set(p[f'b{i + 1}'])
        vec = vec.at[:cout, 3 * i + 1].set(p[f'bn{i + 1}_scale'])
        vec = vec.at[:cout, 3 * i + 2].set(p[f'bn{i + 1}_bias'])
    gem_ps = jnp.array([p['gem2_p'], p['gem4_p']], jnp.float32)
    wqkv = p['wqkv'].astype(jnp.float32)                     # (3*64, 64)
    bqkv = p['bqkv'].astype(jnp.float32).reshape(3 * ATTN_DIM, 1)
    wproj = p['wproj'].astype(jnp.float32)                   # (64, 64)
    bproj = p['bproj'].astype(jnp.float32).reshape(ATTN_DIM, 1)
    return gem_ps, tuple(w_flat), vec, wqkv, bqkv, wproj, bproj


def cnn1d_middle_forward(x, packed):
    """x: (B, 1, L) float32 -> (B, 64, L_out) float32, one fused Pallas kernel."""
    gem_ps, w_flat, vec, wqkv, bqkv, wproj, bproj = packed
    B, cin0, L0 = x.shape
    assert cin0 == 1
    Lf = _out_len(L0)

    def full_spec(a):
        return pl.BlockSpec(a.shape, lambda i: (0,) * a.ndim)

    in_specs = (
        [pl.BlockSpec(memory_space=pltpu.MemorySpace.SMEM),          # GeM p scalars
         pl.BlockSpec((1, 1, L0), lambda i: (i, 0, 0))]              # input x
        + [full_spec(w) for w in w_flat]
        + [full_spec(vec), full_spec(wqkv), full_spec(bqkv),
           full_spec(wproj), full_spec(bproj)]
    )

    return pl.pallas_call(
        _fused_kernel,
        out_shape=jax.ShapeDtypeStruct((B, ATTN_DIM, Lf), jnp.float32),
        grid=(B,),
        in_specs=in_specs,
        out_specs=pl.BlockSpec((1, ATTN_DIM, Lf), lambda i: (i, 0, 0)),
        scratch_shapes=[pltpu.VMEM((KCIN_MAX, L0), jnp.float32)],    # im2col staging slab
        compiler_params=pltpu.CompilerParams(
            dimension_semantics=("parallel",)),                      # v7x: 2 TCs split batch
    )(gem_ps, x, *w_flat, vec, wqkv, bqkv, wproj, bproj)


# ----------------------------------------------------------------------------
# Deterministic synthetic parameters (same structure as the PyTorch module).
# ----------------------------------------------------------------------------
def fold_bn(gamma, beta, mean, var, eps=1e-5):
    scale = gamma / jnp.sqrt(var + eps)
    bias = beta - mean * scale
    return scale, bias


def init_params(key):
    p = {}
    conv_defs = {
        'w1': (16, 1, 5), 'w2': (16, 16, 5), 'w3': (32, 16, 3),
        'w4': (32, 32, 3), 'w5': (64, 32, 3), 'w6': (64, 64, 3),
    }
    keys = jax.random.split(key, 32)
    ki = 0
    for name, (cout, cin, k) in conv_defs.items():
        fan_in = cin * k
        p[name] = jax.random.normal(keys[ki], (cout, cin, k), jnp.float32) / jnp.sqrt(fan_in)
        ki += 1
        p['b' + name[1:]] = 0.05 * jax.random.normal(keys[ki], (cout,), jnp.float32)
        ki += 1
    for idx, c in zip([1, 2, 3, 4, 5, 6], [16, 16, 32, 32, 64, 64]):
        gamma = 1.0 + 0.1 * jax.random.normal(keys[ki], (c,), jnp.float32); ki += 1
        beta = 0.1 * jax.random.normal(keys[ki], (c,), jnp.float32); ki += 1
        mean = jnp.zeros((c,), jnp.float32)          # eval-mode running stats
        var = jnp.ones((c,), jnp.float32)
        s, b = fold_bn(gamma, beta, mean, var)
        p[f'bn{idx}_scale'], p[f'bn{idx}_bias'] = s, b
    p['gem2_p'] = 3.0
    p['gem4_p'] = 3.0
    dim = ATTN_DIM
    p['wqkv'] = jax.random.normal(keys[ki], (3 * dim, dim), jnp.float32) / jnp.sqrt(dim); ki += 1
    p['bqkv'] = 0.05 * jax.random.normal(keys[ki], (3 * dim,), jnp.float32); ki += 1
    p['wproj'] = jax.random.normal(keys[ki], (dim, dim), jnp.float32) / jnp.sqrt(dim); ki += 1
    p['bproj'] = 0.05 * jax.random.normal(keys[ki], (dim,), jnp.float32); ki += 1
    return p


if __name__ == "__main__":
    key = jax.random.PRNGKey(0)
    kx, kp = jax.random.split(key)
    # Input matches the PyTorch module's expectation: (B, C_in=1, L).  L=64 keeps
    # all intermediate sequence lengths positive (64->62->60->30->30->15->15->13).
    x = jax.random.normal(kx, (2, 1, 64), jnp.float32)
    params = init_params(kp)
    packed = pack_params(params)

    out = cnn1d_middle_forward(x, packed)
    jax.block_until_ready(out)
    assert out.shape == (2, 64, _out_len(64))
    print("KERNEL_OK")
</pallas_src>

<mosaic_0001>
module attributes {stable_mosaic.version = 11 : i64} {
  func.func @_fused_kernel(%arg0: i32, %arg1: memref<2xf32, #tpu.memory_space<smem>>, %arg2: memref<1x1x64xf32, #tpu.memory_space<vmem>>, %arg3: memref<16x5xf32, #tpu.memory_space<vmem>>, %arg4: memref<16x80xf32, #tpu.memory_space<vmem>>, %arg5: memref<32x48xf32, #tpu.memory_space<vmem>>, %arg6: memref<32x96xf32, #tpu.memory_space<vmem>>, %arg7: memref<64x96xf32, #tpu.memory_space<vmem>>, %arg8: memref<64x192xf32, #tpu.memory_space<vmem>>, %arg9: memref<64x18xf32, #tpu.memory_space<vmem>>, %arg10: memref<192x64xf32, #tpu.memory_space<vmem>>, %arg11: memref<192x1xf32, #tpu.memory_space<vmem>>, %arg12: memref<64x64xf32, #tpu.memory_space<vmem>>, %arg13: memref<64x1xf32, #tpu.memory_space<vmem>>, %arg14: memref<1x64x13xf32, #tpu.memory_space<vmem>>, %arg15: memref<192x64xf32, #tpu.memory_space<vmem>>) attributes {dimension_semantics = [#tpu.dimension_semantics<parallel>], iteration_bounds = array<i64: 2>, scalar_prefetch = 0 : i64, scratch_operands = 1 : i64, tpu.core_type = #tpu.core_type<tc>, window_params = [{transform_indices = @transform_0, window_bounds = array<i64: 2>}, {transform_indices = @transform_1, window_bounds = array<i64: 1, 1, 64>}, {pipeline_mode = #tpu.pipeline_mode<synchronous>, transform_indices = @transform_2, window_bounds = array<i64: 16, 5>}, {pipeline_mode = #tpu.pipeline_mode<synchronous>, transform_indices = @transform_3, window_bounds = array<i64: 16, 80>}, {pipeline_mode = #tpu.pipeline_mode<synchronous>, transform_indices = @transform_4, window_bounds = array<i64: 32, 48>}, {pipeline_mode = #tpu.pipeline_mode<synchronous>, transform_indices = @transform_5, window_bounds = array<i64: 32, 96>}, {pipeline_mode = #tpu.pipeline_mode<synchronous>, transform_indices = @transform_6, window_bounds = array<i64: 64, 96>}, {pipeline_mode = #tpu.pipeline_mode<synchronous>, transform_indices = @transform_7, window_bounds = array<i64: 64, 192>}, {pipeline_mode = #tpu.pipeline_mode<synchronous>, transform_indices = @transform_8, window_bounds = array<i64: 64, 18>}, {pipeline_mode = #tpu.pipeline_mode<synchronous>, transform_indices = @transform_9, window_bounds = array<i64: 192, 64>}, {pipeline_mode = #tpu.pipeline_mode<synchronous>, transform_indices = @transform_10, window_bounds = array<i64: 192, 1>}, {pipeline_mode = #tpu.pipeline_mode<synchronous>, transform_indices = @transform_11, window_bounds = array<i64: 64, 64>}, {pipeline_mode = #tpu.pipeline_mode<synchronous>, transform_indices = @transform_12, window_bounds = array<i64: 64, 1>}, {transform_indices = @transform_13, window_bounds = array<i64: 1, 64, 13>}]} {
    %c0 = arith.constant 0 : index
    %c0_0 = arith.constant 0 : index
    %0 = vector.load %arg9[%c0, %c0_0] : memref<64x18xf32, #tpu.memory_space<vmem>>, vector<64x18xf32>
    %c0_1 = arith.constant 0 : index
    %c0_2 = arith.constant 0 : index
    %c0_3 = arith.constant 0 : index
    %1 = vector.load %arg2[%c0_1, %c0_2, %c0_3] : memref<1x1x64xf32, #tpu.memory_space<vmem>>, vector<1x1x64xf32>
    %2 = vector.shape_cast %1 : vector<1x1x64xf32> to vector<1x64xf32>
    %c0_4 = arith.constant 0 : index
    %3 = memref.load %arg1[%c0_4] : memref<2xf32, #tpu.memory_space<smem>>
    %c1 = arith.constant 1 : index
    %4 = memref.load %arg1[%c1] : memref<2xf32, #tpu.memory_space<smem>>
    %5 = vector.extract_strided_slice %0 {offsets = [0, 0], sizes = [16, 1], strides = [1, 1]} : vector<64x18xf32> to vector<16x1xf32>
    %6 = vector.extract_strided_slice %0 {offsets = [0, 1], sizes = [16, 1], strides = [1, 1]} : vector<64x18xf32> to vector<16x1xf32>
    %7 = vector.extract_strided_slice %0 {offsets = [0, 2], sizes = [16, 1], strides = [1, 1]} : vector<64x18xf32> to vector<16x1xf32>
    %c0_5 = arith.constant 0 : index
    %c0_6 = arith.constant 0 : index
    %8 = vector.load %arg3[%c0_5, %c0_6] : memref<16x5xf32, #tpu.memory_space<vmem>>, vector<16x5xf32>
    %cst = arith.constant 0.000000e+00 : f32
    %9 = vector.broadcast %cst : f32 to vector<192x64xf32>
    %c0_7 = arith.constant 0 : index
    %c0_8 = arith.constant 0 : index
    %10 = vector.load %arg15[%c0_7, %c0_8] : memref<192x64xf32, #tpu.memory_space<vmem>>, vector<192x64xf32>
    tpu.vector_store %arg15[%c0_7, %c0_8], %9 {strides = array<i32>} : memref<192x64xf32, #tpu.memory_space<vmem>>, vector<192x64xf32>,
    %11 = vector.extract_strided_slice %2 {offsets = [0, 0], sizes = [1, 61], strides = [1, 1]} : vector<1x64xf32> to vector<1x61xf32>
    %c0_9 = arith.constant 0 : index
    %c1_10 = arith.constant 1 : index
    %12 = vector.load %arg15[%c0_9, %c1_10] : memref<192x64xf32, #tpu.memory_space<vmem>>, vector<1x61xf32>
    tpu.vector_store %arg15[%c0_9, %c1_10], %11 {strides = array<i32>} : memref<192x64xf32, #tpu.memory_space<vmem>>, vector<1x61xf32>,
    %13 = vector.extract_strided_slice %2 {offsets = [0, 0], sizes = [1, 62], strides = [1, 1]} : vector<1x64xf32> to vector<1x62xf32>
    %c1_11 = arith.constant 1 : index
    %c0_12 = arith.constant 0 : index
    %14 = vector.load %arg15[%c1_11, %c0_12] : memref<192x64xf32, #tpu.memory_space<vmem>>, vector<1x62xf32>
    tpu.vector_store %arg15[%c1_11, %c0_12], %13 {strides = array<i32>} : memref<192x64xf32, #tpu.memory_space<vmem>>, vector<1x62xf32>,
    %15 = vector.extract_strided_slice %2 {offsets = [0, 1], sizes = [1, 62], strides = [1, 1]} : vector<1x64xf32> to vector<1x62xf32>
    %c2 = arith.constant 2 : index
    %c0_13 = arith.constant 0 : index
    %16 = vector.load %arg15[%c2, %c0_13] : memref<192x64xf32, #tpu.memory_space<vmem>>, vector<1x62xf32>
    tpu.vector_store %arg15[%c2, %c0_13], %15 {strides = array<i32>} : memref<192x64xf32, #tpu.memory_space<vmem>>, vector<1x62xf32>,
    %17 = vector.extract_strided_slice %2 {offsets = [0, 2], sizes = [1, 62], strides = [1, 1]} : vector<1x64xf32> to vector<1x62xf32>
    %c3 = arith.constant 3 : index
    %c0_14 = arith.constant 0 : index
    %18 = vector.load %arg15[%c3, %c0_14] : memref<192x64xf32, #tpu.memory_space<vmem>>, vector<1x62xf32>
    tpu.vector_store %arg15[%c3, %c0_14], %17 {strides = array<i32>} : memref<192x64xf32, #tpu.memory_space<vmem>>, vector<1x62xf32>,
    %19 = vector.extract_strided_slice %2 {offsets = [0, 3], sizes = [1, 61], strides = [1, 1]} : vector<1x64xf32> to vector<1x61xf32>
    %c4 = arith.constant 4 : index
    %c0_15 = arith.constant 0 : index
    %20 = vector.load %arg15[%c4, %c0_15] : memref<192x64xf32, #tpu.memory_space<vmem>>, vector<1x61xf32>
    tpu.vector_store %arg15[%c4, %c0_15], %19 {strides = array<i32>} : memref<192x64xf32, #tpu.memory_space<vmem>>, vector<1x61xf32>,
    %c0_16 = arith.constant 0 : index
    %c0_17 = arith.constant 0 : index
    %21 = vector.load %arg15[%c0_16, %c0_17] : memref<192x64xf32, #tpu.memory_space<vmem>>, vector<5x62xf32>
    %cst_18 = arith.constant dense<0.000000e+00> : vector<16x62xf32>
    %22 = tpu.matmul %8, %21, %cst_18 {dimension_numbers = #tpu.dot_dimension_numbers<[1], [0], [0], [1], [0, 0, 1, 1], [], []>} : vector<16x5xf32>, vector<5x62xf32>, vector<16x62xf32> -> vector<16x62xf32>
    %23 = vector.broadcast %5 : vector<16x1xf32> to vector<16x62xf32>
    %24 = arith.addf %22, %23 : vector<16x62xf32>
    %25 = vector.broadcast %6 : vector<16x1xf32> to vector<16x62xf32>
    %26 = arith.mulf %24, %25 : vector<16x62xf32>
    %27 = vector.broadcast %7 : vector<16x1xf32> to vector<16x62xf32>
    %28 = arith.addf %26, %27 : vector<16x62xf32>
    %29 = arith.negf %28 : vector<16x62xf32>
    %30 = math.exp %29 : vector<16x62xf32>
    %cst_19 = arith.constant 1.000000e+00 : f32
    %31 = vector.broadcast %cst_19 : f32 to vector<16x62xf32>
    %32 = arith.addf %31, %30 : vector<16x62xf32>
    %33 = arith.divf %31, %32 : vector<16x62xf32>
    %34 = arith.mulf %28, %33 : vector<16x62xf32>
    %35 = vector.extract_strided_slice %0 {offsets = [0, 3], sizes = [16, 1], strides = [1, 1]} : vector<64x18xf32> to vector<16x1xf32>
    %36 = vector.extract_strided_slice %0 {offsets = [0, 4], sizes = [16, 1], strides = [1, 1]} : vector<64x18xf32> to vector<16x1xf32>
    %37 = vector.extract_strided_slice %0 {offsets = [0, 5], sizes = [16, 1], strides = [1, 1]} : vector<64x18xf32> to vector<16x1xf32>
    %c0_20 = arith.constant 0 : index
    %c0_21 = arith.constant 0 : index
    %38 = vector.load %arg4[%c0_20, %c0_21] : memref<16x80xf32, #tpu.memory_space<vmem>>, vector<16x80xf32>
    %cst_22 = arith.constant 0.000000e+00 : f32
    %39 = vector.broadcast %cst_22 : f32 to vector<192x64xf32>
    %c0_23 = arith.constant 0 : index
    %c0_24 = arith.constant 0 : index
    %40 = vector.load %arg15[%c0_23, %c0_24] : memref<192x64xf32, #tpu.memory_space<vmem>>, vector<192x64xf32>
    tpu.vector_store %arg15[%c0_23, %c0_24], %39 {strides = array<i32>} : memref<192x64xf32, #tpu.memory_space<vmem>>, vector<192x64xf32>,
    %41 = vector.extract_strided_slice %34 {offsets = [0, 0], sizes = [16, 59], strides = [1, 1]} : vector<16x62xf32> to vector<16x59xf32>
    %c0_25 = arith.constant 0 : index
    %c1_26 = arith.constant 1 : index
    %42 = vector.load %arg15[%c0_25, %c1_26] : memref<192x64xf32, #tpu.memory_space<vmem>>, vector<16x59xf32>
    tpu.vector_store %arg15[%c0_25, %c1_26], %41 {strides = array<i32>} : memref<192x64xf32, #tpu.memory_space<vmem>>, vector<16x59xf32>,
    %43 = vector.extract_strided_slice %34 {offsets = [0, 0], sizes = [16, 60], strides = [1, 1]} : vector<16x62xf32> to vector<16x60xf32>
    %c16 = arith.constant 16 : index
    %c0_27 = arith.constant 0 : index
    %44 = vector.load %arg15[%c16, %c0_27] : memref<192x64xf32, #tpu.memory_space<vmem>>, vector<16x60xf32>
    tpu.vector_store %arg15[%c16, %c0_27], %43 {strides = array<i32>} : memref<192x64xf32, #tpu.memory_space<vmem>>, vector<16x60xf32>,
    %45 = vector.extract_strided_slice %34 {offsets = [0, 1], sizes = [16, 60], strides = [1, 1]} : vector<16x62xf32> to vector<16x60xf32>
    %c32 = arith.constant 32 : index
    %c0_28 = arith.constant 0 : index
    %46 = vector.load %arg15[%c32, %c0_28] : memref<192x64xf32, #tpu.memory_space<vmem>>, vector<16x60xf32>
    tpu.vector_store %arg15[%c32, %c0_28], %45 {strides = array<i32>} : memref<192x64xf32, #tpu.memory_space<vmem>>, vector<16x60xf32>,
    %47 = vector.extract_strided_slice %34 {offsets = [0, 2], sizes = [16, 60], strides = [1, 1]} : vector<16x62xf32> to vector<16x60xf32>
    %c48 = arith.constant 48 : index
    %c0_29 = arith.constant 0 : index
    %48 = vector.load %arg15[%c48, %c0_29] : memref<192x64xf32, #tpu.memory_space<vmem>>, vector<16x60xf32>
    tpu.vector_store %arg15[%c48, %c0_29], %47 {strides = array<i32>} : memref<192x64xf32, #tpu.memory_space<vmem>>, vector<16x60xf32>,
    %49 = vector.extract_strided_slice %34 {offsets = [0, 3], sizes = [16, 59], strides = [1, 1]} : vector<16x62xf32> to vector<16x59xf32>
    %c64 = arith.constant 64 : index
    %c0_30 = arith.constant 0 : index
    %50 = vector.load %arg15[%c64, %c0_30] : memref<192x64xf32, #tpu.memory_space<vmem>>, vector<16x59xf32>
    tpu.vector_store %arg15[%c64, %c0_30], %49 {strides = array<i32>} : memref<192x64xf32, #tpu.memory_space<vmem>>, vector<16x59xf32>,
    %c0_31 = arith.constant 0 : index
    %c0_32 = arith.constant 0 : index
    %51 = vector.load %arg15[%c0_31, %c0_32] : memref<192x64xf32, #tpu.memory_space<vmem>>, vector<80x60xf32>
    %cst_33 = arith.constant dense<0.000000e+00> : vector<16x60xf32>
    %52 = tpu.matmul %38, %51, %cst_33 {dimension_numbers = #tpu.dot_dimension_numbers<[1], [0], [0], [1], [0, 0, 1, 1], [], []>} : vector<16x80xf32>, vector<80x60xf32>, vector<16x60xf32> -> vector<16x60xf32>
    %53 = vector.broadcast %35 : vector<16x1xf32> to vector<16x60xf32>
    %54 = arith.addf %52, %53 : vector<16x60xf32>
    %cst_34 = arith.constant 9.99999997E-7 : f32
    %55 = vector.broadcast %cst_34 : f32 to vector<16x60xf32>
    %56 = arith.maximumf %54, %55 : vector<16x60xf32>
    %57 = math.log %56 : vector<16x60xf32>
    %58 = vector.broadcast %3 : f32 to vector<16x60xf32>
    %59 = arith.mulf %58, %57 : vector<16x60xf32>
    %60 = math.exp %59 : vector<16x60xf32>
    %61 = tpu.iota {dimensions = array<i32: 0>} : vector<60x30xi32>
    %62 = tpu.iota {dimensions = array<i32: 1>} : vector<60x30xi32>
    %c2_i32 = arith.constant 2 : i32
    %63 = vector.broadcast %c2_i32 : i32 to vector<60x30xi32>
    %64 = arith.muli %63, %62 : vector<60x30xi32>
    %65 = arith.cmpi eq, %61, %64 : vector<60x30xi32>
    %c2_i32_35 = arith.constant 2 : i32
    %66 = vector.broadcast %c2_i32_35 : i32 to vector<60x30xi32>
    %67 = arith.muli %66, %62 : vector<60x30xi32>
    %c1_i32 = arith.constant 1 : i32
    %68 = vector.broadcast %c1_i32 : i32 to vector<60x30xi32>
    %69 = arith.addi %67, %68 : vector<60x30xi32>
    %70 = arith.cmpi eq, %61, %69 : vector<60x30xi32>
    %71 = arith.ori %65, %70 : vector<60x30xi1>
    %cst_36 = arith.constant 5.000000e-01 : f32
    %cst_37 = arith.constant 0.000000e+00 : f32
    %72 = vector.broadcast %cst_36 : f32 to vector<60x30xf32>
    %73 = vector.broadcast %cst_37 : f32 to vector<60x30xf32>
    %74 = arith.select %71, %72, %73 : vector<60x30xi1>, vector<60x30xf32>
    %cst_38 = arith.constant dense<0.000000e+00> : vector<16x30xf32>
    %75 = tpu.matmul %60, %74, %cst_38 {dimension_numbers = #tpu.dot_dimension_numbers<[1], [0], [0], [1], [0, 0, 1, 1], [], []>} : vector<16x60xf32>, vector<60x30xf32>, vector<16x30xf32> -> vector<16x30xf32>
    %76 = math.log %75 : vector<16x30xf32>
    %cst_39 = arith.constant 1.000000e+00 : f32
    %77 = arith.divf %cst_39, %3 : f32
    %78 = vector.broadcast %77 : f32 to vector<16x30xf32>
    %79 = arith.mulf %76, %78 : vector<16x30xf32>
    %80 = math.exp %79 : vector<16x30xf32>
    %81 = vector.broadcast %36 : vector<16x1xf32> to vector<16x30xf32>
    %82 = arith.mulf %80, %81 : vector<16x30xf32>
    %83 = vector.broadcast %37 : vector<16x1xf32> to vector<16x30xf32>
    %84 = arith.addf %82, %83 : vector<16x30xf32>
    %85 = arith.negf %84 : vector<16x30xf32>
    %86 = math.exp %85 : vector<16x30xf32>
    %cst_40 = arith.constant 1.000000e+00 : f32
    %87 = vector.broadcast %cst_40 : f32 to vector<16x30xf32>
    %88 = arith.addf %87, %86 : vector<16x30xf32>
    %89 = arith.divf %87, %88 : vector<16x30xf32>
    %90 = arith.mulf %84, %89 : vector<16x30xf32>
    %91 = vector.extract_strided_slice %0 {offsets = [0, 6], sizes = [32, 1], strides = [1, 1]} : vector<64x18xf32> to vector<32x1xf32>
    %92 = vector.extract_strided_slice %0 {offsets = [0, 7], sizes = [32, 1], strides = [1, 1]} : vector<64x18xf32> to vector<32x1xf32>
    %93 = vector.extract_strided_slice %0 {offsets = [0, 8], sizes = [32, 1], strides = [1, 1]} : vector<64x18xf32> to vector<32x1xf32>
    %c0_41 = arith.constant 0 : index
    %c0_42 = arith.constant 0 : index
    %94 = vector.load %arg5[%c0_41, %c0_42] : memref<32x48xf32, #tpu.memory_space<vmem>>, vector<32x48xf32>
    %cst_43 = arith.constant 0.000000e+00 : f32
    %95 = vector.broadcast %cst_43 : f32 to vector<192x64xf32>
    %c0_44 = arith.constant 0 : index
    %c0_45 = arith.constant 0 : index
    %96 = vector.load %arg15[%c0_44, %c0_45] : memref<192x64xf32, #tpu.memory_space<vmem>>, vector<192x64xf32>
    tpu.vector_store %arg15[%c0_44, %c0_45], %95 {strides = array<i32>} : memref<192x64xf32, #tpu.memory_space<vmem>>, vector<192x64xf32>,
    %97 = vector.extract_strided_slice %90 {offsets = [0, 0], sizes = [16, 29], strides = [1, 1]} : vector<16x30xf32> to vector<16x29xf32>
    %c0_46 = arith.constant 0 : index
    %c1_47 = arith.constant 1 : index
    %98 = vector.load %arg15[%c0_46, %c1_47] : memref<192x64xf32, #tpu.memory_space<vmem>>, vector<16x29xf32>
    tpu.vector_store %arg15[%c0_46, %c1_47], %97 {strides = array<i32>} : memref<192x64xf32, #tpu.memory_space<vmem>>, vector<16x29xf32>,
    %c16_48 = arith.constant 16 : index
    %c0_49 = arith.constant 0 : index
    %99 = vector.load %arg15[%c16_48, %c0_49] : memref<192x64xf32, #tpu.memory_space<vmem>>, vector<16x30xf32>
    tpu.vector_store %arg15[%c16_48, %c0_49], %90 {strides = array<i32>} : memref<192x64xf32, #tpu.memory_space<vmem>>, vector<16x30xf32>,
    %100 = vector.extract_strided_slice %90 {offsets = [0, 1], sizes = [16, 29], strides = [1, 1]} : vector<16x30xf32> to vector<16x29xf32>
    %c32_50 = arith.constant 32 : index
    %c0_51 = arith.constant 0 : index
    %101 = vector.load %arg15[%c32_50, %c0_51] : memref<192x64xf32, #tpu.memory_space<vmem>>, vector<16x29xf32>
    tpu.vector_store %arg15[%c32_50, %c0_51], %100 {strides = array<i32>} : memref<192x64xf32, #tpu.memory_space<vmem>>, vector<16x29xf32>,
    %c0_52 = arith.constant 0 : index
    %c0_53 = arith.constant 0 : index
    %102 = vector.load %arg15[%c0_52, %c0_53] : memref<192x64xf32, #tpu.memory_space<vmem>>, vector<48x30xf32>
    %cst_54 = arith.constant dense<0.000000e+00> : vector<32x30xf32>
    %103 = tpu.matmul %94, %102, %cst_54 {dimension_numbers = #tpu.dot_dimension_numbers<[1], [0], [0], [1], [0, 0, 1, 1], [], []>} : vector<32x48xf32>, vector<48x30xf32>, vector<32x30xf32> -> vector<32x30xf32>
    %104 = vector.broadcast %91 : vector<32x1xf32> to vector<32x30xf32>
    %105 = arith.addf %103, %104 : vector<32x30xf32>
    %106 = vector.broadcast %92 : vector<32x1xf32> to vector<32x30xf32>
    %107 = arith.mulf %105, %106 : vector<32x30xf32>
    %108 = vector.broadcast %93 : vector<32x1xf32> to vector<32x30xf32>
    %109 = arith.addf %107, %108 : vector<32x30xf32>
    %110 = arith.negf %109 : vector<32x30xf32>
    %111 = math.exp %110 : vector<32x30xf32>
    %cst_55 = arith.constant 1.000000e+00 : f32
    %112 = vector.broadcast %cst_55 : f32 to vector<32x30xf32>
    %113 = arith.addf %112, %111 : vector<32x30xf32>
    %114 = arith.divf %112, %113 : vector<32x30xf32>
    %115 = arith.mulf %109, %114 : vector<32x30xf32>
    %116 = vector.extract_strided_slice %0 {offsets = [0, 9], sizes = [32, 1], strides = [1, 1]} : vector<64x18xf32> to vector<32x1xf32>
    %117 = vector.extract_strided_slice %0 {offsets = [0, 10], sizes = [32, 1], strides = [1, 1]} : vector<64x18xf32> to vector<32x1xf32>
    %118 = vector.extract_strided_slice %0 {offsets = [0, 11], sizes = [32, 1], strides = [1, 1]} : vector<64x18xf32> to vector<32x1xf32>
    %c0_56 = arith.constant 0 : index
    %c0_57 = arith.constant 0 : index
    %119 = vector.load %arg6[%c0_56, %c0_57] : memref<32x96xf32, #tpu.memory_space<vmem>>, vector<32x96xf32>
    %cst_58 = arith.constant 0.000000e+00 : f32
    %120 = vector.broadcast %cst_58 : f32 to vector<192x64xf32>
    %c0_59 = arith.constant 0 : index
    %c0_60 = arith.constant 0 : index
    %121 = vector.load %arg15[%c0_59, %c0_60] : memref<192x64xf32, #tpu.memory_space<vmem>>, vector<192x64xf32>
    tpu.vector_store %arg15[%c0_59, %c0_60], %120 {strides = array<i32>} : memref<192x64xf32, #tpu.memory_space<vmem>>, vector<192x64xf32>,
    %122 = vector.extract_strided_slice %115 {offsets = [0, 0], sizes = [32, 29], strides = [1, 1]} : vector<32x30xf32> to vector<32x29xf32>
    %c0_61 = arith.constant 0 : index
    %c1_62 = arith.constant 1 : index
    %123 = vector.load %arg15[%c0_61, %c1_62] : memref<192x64xf32, #tpu.memory_space<vmem>>, vector<32x29xf32>
    tpu.vector_store %arg15[%c0_61, %c1_62], %122 {strides = array<i32>} : memref<192x64xf32, #tpu.memory_space<vmem>>, vector<32x29xf32>,
    %c32_63 = arith.constant 32 : index
    %c0_64 = arith.constant 0 : index
    %124 = vector.load %arg15[%c32_63, %c0_64] : memref<192x64xf32, #tpu.memory_space<vmem>>, vector<32x30xf32>
    tpu.vector_store %arg15[%c32_63, %c0_64], %115 {strides = array<i32>} : memref<192x64xf32, #tpu.memory_space<vmem>>, vector<32x30xf32>,
    %125 = vector.extract_strided_slice %115 {offsets = [0, 1], sizes = [32, 29], strides = [1, 1]} : vector<32x30xf32> to vector<32x29xf32>
    %c64_65 = arith.constant 64 : index
    %c0_66 = arith.constant 0 : index
    %126 = vector.load %arg15[%c64_65, %c0_66] : memref<192x64xf32, #tpu.memory_space<vmem>>, vector<32x29xf32>
    tpu.vector_store %arg15[%c64_65, %c0_66], %125 {strides = array<i32>} : memref<192x64xf32, #tpu.memory_space<vmem>>, vector<32x29xf32>,
    %c0_67 = arith.constant 0 : index
    %c0_68 = arith.constant 0 : index
    %127 = vector.load %arg15[%c0_67, %c0_68] : memref<192x64xf32, #tpu.memory_space<vmem>>, vector<96x30xf32>
    %cst_69 = arith.constant dense<0.000000e+00> : vector<32x30xf32>
    %128 = tpu.matmul %119, %127, %cst_69 {dimension_numbers = #tpu.dot_dimension_numbers<[1], [0], [0], [1], [0, 0, 1, 1], [], []>} : vector<32x96xf32>, vector<96x30xf32>, vector<32x30xf32> -> vector<32x30xf32>
    %129 = vector.broadcast %116 : vector<32x1xf32> to vector<32x30xf32>
    %130 = arith.addf %128, %129 : vector<32x30xf32>
    %cst_70 = arith.constant 9.99999997E-7 : f32
    %131 = vector.broadcast %cst_70 : f32 to vector<32x30xf32>
    %132 = arith.maximumf %130, %131 : vector<32x30xf32>
    %133 = math.log %132 : vector<32x30xf32>
    %134 = vector.broadcast %4 : f32 to vector<32x30xf32>
    %135 = arith.mulf %134, %133 : vector<32x30xf32>
    %136 = math.exp %135 : vector<32x30xf32>
    %137 = tpu.iota {dimensions = array<i32: 0>} : vector<30x15xi32>
    %138 = tpu.iota {dimensions = array<i32: 1>} : vector<30x15xi32>
    %c2_i32_71 = arith.constant 2 : i32
    %139 = vector.broadcast %c2_i32_71 : i32 to vector<30x15xi32>
    %140 = arith.muli %139, %138 : vector<30x15xi32>
    %141 = arith.cmpi eq, %137, %140 : vector<30x15xi32>
    %c2_i32_72 = arith.constant 2 : i32
    %142 = vector.broadcast %c2_i32_72 : i32 to vector<30x15xi32>
    %143 = arith.muli %142, %138 : vector<30x15xi32>
    %c1_i32_73 = arith.constant 1 : i32
    %144 = vector.broadcast %c1_i32_73 : i32 to vector<30x15xi32>
    %145 = arith.addi %143, %144 : vector<30x15xi32>
    %146 = arith.cmpi eq, %137, %145 : vector<30x15xi32>
    %147 = arith.ori %141, %146 : vector<30x15xi1>
    %cst_74 = arith.constant 5.000000e-01 : f32
    %cst_75 = arith.constant 0.000000e+00 : f32
    %148 = vector.broadcast %cst_74 : f32 to vector<30x15xf32>
    %149 = vector.broadcast %cst_75 : f32 to vector<30x15xf32>
    %150 = arith.select %147, %148, %149 : vector<30x15xi1>, vector<30x15xf32>
    %cst_76 = arith.constant dense<0.000000e+00> : vector<32x15xf32>
    %151 = tpu.matmul %136, %150, %cst_76 {dimension_numbers = #tpu.dot_dimension_numbers<[1], [0], [0], [1], [0, 0, 1, 1], [], []>} : vector<32x30xf32>, vector<30x15xf32>, vector<32x15xf32> -> vector<32x15xf32>
    %152 = math.log %151 : vector<32x15xf32>
    %cst_77 = arith.constant 1.000000e+00 : f32
    %153 = arith.divf %cst_77, %4 : f32
    %154 = vector.broadcast %153 : f32 to vector<32x15xf32>
    %155 = arith.mulf %152, %154 : vector<32x15xf32>
    %156 = math.exp %155 : vector<32x15xf32>
    %157 = vector.broadcast %117 : vector<32x1xf32> to vector<32x15xf32>
    %158 = arith.mulf %156, %157 : vector<32x15xf32>
    %159 = vector.broadcast %118 : vector<32x1xf32> to vector<32x15xf32>
    %160 = arith.addf %158, %159 : vector<32x15xf32>
    %161 = arith.negf %160 : vector<32x15xf32>
    %162 = math.exp %161 : vector<32x15xf32>
    %cst_78 = arith.constant 1.000000e+00 : f32
    %163 = vector.broadcast %cst_78 : f32 to vector<32x15xf32>
    %164 = arith.addf %163, %162 : vector<32x15xf32>
    %165 = arith.divf %163, %164 : vector<32x15xf32>
    %166 = arith.mulf %160, %165 : vector<32x15xf32>
    %167 = vector.extract_strided_slice %0 {offsets = [0, 12], sizes = [64, 1], strides = [1, 1]} : vector<64x18xf32> to vector<64x1xf32>
    %168 = vector.extract_strided_slice %0 {offsets = [0, 13], sizes = [64, 1], strides = [1, 1]} : vector<64x18xf32> to vector<64x1xf32>
    %169 = vector.extract_strided_slice %0 {offsets = [0, 14], sizes = [64, 1], strides = [1, 1]} : vector<64x18xf32> to vector<64x1xf32>
    %c0_79 = arith.constant 0 : index
    %c0_80 = arith.constant 0 : index
    %170 = vector.load %arg7[%c0_79, %c0_80] : memref<64x96xf32, #tpu.memory_space<vmem>>, vector<64x96xf32>
    %cst_81 = arith.constant 0.000000e+00 : f32
    %171 = vector.broadcast %cst_81 : f32 to vector<192x64xf32>
    %c0_82 = arith.constant 0 : index
    %c0_83 = arith.constant 0 : index
    %172 = vector.load %arg15[%c0_82, %c0_83] : memref<192x64xf32, #tpu.memory_space<vmem>>, vector<192x64xf32>
    tpu.vector_store %arg15[%c0_82, %c0_83], %171 {strides = array<i32>} : memref<192x64xf32, #tpu.memory_space<vmem>>, vector<192x64xf32>,
    %173 = vector.extract_strided_slice %166 {offsets = [0, 0], sizes = [32, 14], strides = [1, 1]} : vector<32x15xf32> to vector<32x14xf32>
    %c0_84 = arith.constant 0 : index
    %c1_85 = arith.constant 1 : index
    %174 = vector.load %arg15[%c0_84, %c1_85] : memref<192x64xf32, #tpu.memory_space<vmem>>, vector<32x14xf32>
    tpu.vector_store %arg15[%c0_84, %c1_85], %173 {strides = array<i32>} : memref<192x64xf32, #tpu.memory_space<vmem>>, vector<32x14xf32>,
    %c32_86 = arith.constant 32 : index
    %c0_87 = arith.constant 0 : index
    %175 = vector.load %arg15[%c32_86, %c0_87] : memref<192x64xf32, #tpu.memory_space<vmem>>, vector<32x15xf32>
    tpu.vector_store %arg15[%c32_86, %c0_87], %166 {strides = array<i32>} : memref<192x64xf32, #tpu.memory_space<vmem>>, vector<32x15xf32>,
    %176 = vector.extract_strided_slice %166 {offsets = [0, 1], sizes = [32, 14], strides = [1, 1]} : vector<32x15xf32> to vector<32x14xf32>
    %c64_88 = arith.constant 64 : index
    %c0_89 = arith.constant 0 : index
    %177 = vector.load %arg15[%c64_88, %c0_89] : memref<192x64xf32, #tpu.memory_space<vmem>>, vector<32x14xf32>
    tpu.vector_store %arg15[%c64_88, %c0_89], %176 {strides = array<i32>} : memref<192x64xf32, #tpu.memory_space<vmem>>, vector<32x14xf32>,
    %c0_90 = arith.constant 0 : index
    %c0_91 = arith.constant 0 : index
    %178 = vector.load %arg15[%c0_90, %c0_91] : memref<192x64xf32, #tpu.memory_space<vmem>>, vector<96x15xf32>
    %cst_92 = arith.constant dense<0.000000e+00> : vector<64x15xf32>
    %179 = tpu.matmul %170, %178, %cst_92 {dimension_numbers = #tpu.dot_dimension_numbers<[1], [0], [0], [1], [0, 0, 1, 1], [], []>} : vector<64x96xf32>, vector<96x15xf32>, vector<64x15xf32> -> vector<64x15xf32>
    %180 = vector.broadcast %167 : vector<64x1xf32> to vector<64x15xf32>
    %181 = arith.addf %179, %180 : vector<64x15xf32>
    %182 = vector.broadcast %168 : vector<64x1xf32> to vector<64x15xf32>
    %183 = arith.mulf %181, %182 : vector<64x15xf32>
    %184 = vector.broadcast %169 : vector<64x1xf32> to vector<64x15xf32>
    %185 = arith.addf %183, %184 : vector<64x15xf32>
    %186 = arith.negf %185 : vector<64x15xf32>
    %187 = math.exp %186 : vector<64x15xf32>
    %cst_93 = arith.constant 1.000000e+00 : f32
    %188 = vector.broadcast %cst_93 : f32 to vector<64x15xf32>
    %189 = arith.addf %188, %187 : vector<64x15xf32>
    %190 = arith.divf %188, %189 : vector<64x15xf32>
    %191 = arith.mulf %185, %190 : vector<64x15xf32>
    %192 = vector.extract_strided_slice %0 {offsets = [0, 15], sizes = [64, 1], strides = [1, 1]} : vector<64x18xf32> to vector<64x1xf32>
    %193 = vector.extract_strided_slice %0 {offsets = [0, 16], sizes = [64, 1], strides = [1, 1]} : vector<64x18xf32> to vector<64x1xf32>
    %194 = vector.extract_strided_slice %0 {offsets = [0, 17], sizes = [64, 1], strides = [1, 1]} : vector<64x18xf32> to vector<64x1xf32>
    %c0_94 = arith.constant 0 : index
    %c0_95 = arith.constant 0 : index
    %195 = vector.load %arg8[%c0_94, %c0_95] : memref<64x192xf32, #tpu.memory_space<vmem>>, vector<64x192xf32>
    %cst_96 = arith.constant 0.000000e+00 : f32
    %196 = vector.broadcast %cst_96 : f32 to vector<192x64xf32>
    %c0_97 = arith.constant 0 : index
    %c0_98 = arith.constant 0 : index
    %197 = vector.load %arg15[%c0_97, %c0_98] : memref<192x64xf32, #tpu.memory_space<vmem>>, vector<192x64xf32>
    tpu.vector_store %arg15[%c0_97, %c0_98], %196 {strides = array<i32>} : memref<192x64xf32, #tpu.memory_space<vmem>>, vector<192x64xf32>,
    %198 = vector.extract_strided_slice %191 {offsets = [0, 0], sizes = [64, 13], strides = [1, 1]} : vector<64x15xf32> to vector<64x13xf32>
    %c0_99 = arith.constant 0 : index
    %c0_100 = arith.constant 0 : index
    %199 = vector.load %arg15[%c0_99, %c0_100] : memref<192x64xf32, #tpu.memory_space<vmem>>, vector<64x13xf32>
    tpu.vector_store %arg15[%c0_99, %c0_100], %198 {strides = array<i32>} : memref<192x64xf32, #tpu.memory_space<vmem>>, vector<64x13xf32>,
    %200 = vector.extract_strided_slice %191 {offsets = [0, 1], sizes = [64, 13], strides = [1, 1]} : vector<64x15xf32> to vector<64x13xf32>
    %c64_101 = arith.constant 64 : index
    %c0_102 = arith.constant 0 : index
    %201 = vector.load %arg15[%c64_101, %c0_102] : memref<192x64xf32, #tpu.memory_space<vmem>>, vector<64x13xf32>
    tpu.vector_store %arg15[%c64_101, %c0_102], %200 {strides = array<i32>} : memref<192x64xf32, #tpu.memory_space<vmem>>, vector<64x13xf32>,
    %202 = vector.extract_strided_slice %191 {offsets = [0, 2], sizes = [64, 13], strides = [1, 1]} : vector<64x15xf32> to vector<64x13xf32>
    %c128 = arith.constant 128 : index
    %c0_103 = arith.constant 0 : index
    %203 = vector.load %arg15[%c128, %c0_103] : memref<192x64xf32, #tpu.memory_space<vmem>>, vector<64x13xf32>
    tpu.vector_store %arg15[%c128, %c0_103], %202 {strides = array<i32>} : memref<192x64xf32, #tpu.memory_space<vmem>>, vector<64x13xf32>,
    %c0_104 = arith.constant 0 : index
    %c0_105 = arith.constant 0 : index
    %204 = vector.load %arg15[%c0_104, %c0_105] : memref<192x64xf32, #tpu.memory_space<vmem>>, vector<192x13xf32>
    %cst_106 = arith.constant dense<0.000000e+00> : vector<64x13xf32>
    %205 = tpu.matmul %195, %204, %cst_106 {dimension_numbers = #tpu.dot_dimension_numbers<[1], [0], [0], [1], [0, 0, 1, 1], [], []>} : vector<64x192xf32>, vector<192x13xf32>, vector<64x13xf32> -> vector<64x13xf32>
    %206 = vector.broadcast %192 : vector<64x1xf32> to vector<64x13xf32>
    %207 = arith.addf %205, %206 : vector<64x13xf32>
    %208 = vector.broadcast %193 : vector<64x1xf32> to vector<64x13xf32>
    %209 = arith.mulf %207, %208 : vector<64x13xf32>
    %210 = vector.broadcast %194 : vector<64x1xf32> to vector<64x13xf32>
    %211 = arith.addf %209, %210 : vector<64x13xf32>
    %212 = arith.negf %211 : vector<64x13xf32>
    %213 = math.exp %212 : vector<64x13xf32>
    %cst_107 = arith.constant 1.000000e+00 : f32
    %214 = vector.broadcast %cst_107 : f32 to vector<64x13xf32>
    %215 = arith.addf %214, %213 : vector<64x13xf32>
    %216 = arith.divf %214, %215 : vector<64x13xf32>
    %217 = arith.mulf %211, %216 : vector<64x13xf32>
    %c0_108 = arith.constant 0 : index
    %c0_109 = arith.constant 0 : index
    %218 = vector.load %arg10[%c0_108, %c0_109] : memref<192x64xf32, #tpu.memory_space<vmem>>, vector<192x64xf32>
    %cst_110 = arith.constant dense<0.000000e+00> : vector<192x13xf32>
    %219 = tpu.matmul %218, %217, %cst_110 {dimension_numbers = #tpu.dot_dimension_numbers<[1], [0], [0], [1], [0, 0, 1, 1], [], []>} : vector<192x64xf32>, vector<64x13xf32>, vector<192x13xf32> -> vector<192x13xf32>
    %c0_111 = arith.constant 0 : index
    %c0_112 = arith.constant 0 : index
    %220 = vector.load %arg11[%c0_111, %c0_112] : memref<192x1xf32, #tpu.memory_space<vmem>>, vector<192x1xf32>
    %221 = vector.broadcast %220 : vector<192x1xf32> to vector<192x13xf32>
    %222 = arith.addf %219, %221 : vector<192x13xf32>
    %cst_113 = arith.constant 0.000000e+00 : f32
    %223 = vector.broadcast %cst_113 : f32 to vector<64x13xf32>
    %224 = vector.extract_strided_slice %222 {offsets = [0, 0], sizes = [16, 13], strides = [1, 1]} : vector<192x13xf32> to vector<16x13xf32>
    %225 = vector.extract_strided_slice %222 {offsets = [64, 0], sizes = [16, 13], strides = [1, 1]} : vector<192x13xf32> to vector<16x13xf32>
    %226 = vector.extract_strided_slice %222 {offsets = [128, 0], sizes = [16, 13], strides = [1, 1]} : vector<192x13xf32> to vector<16x13xf32>
    %cst_114 = arith.constant dense<0.000000e+00> : vector<13x13xf32>
    %227 = tpu.matmul %224, %225, %cst_114 {dimension_numbers = #tpu.dot_dimension_numbers<[0], [0], [1], [1], [0, 1, 1, 1], [], []>} : vector<16x13xf32>, vector<16x13xf32>, vector<13x13xf32> -> vector<13x13xf32>
    %cst_115 = arith.constant 2.500000e-01 : f32
    %228 = vector.broadcast %cst_115 : f32 to vector<13x13xf32>
    %229 = arith.mulf %227, %228 : vector<13x13xf32>
    %cst_116 = arith.constant dense<0xFF800000> : vector<13xf32>
    %230 = vector.multi_reduction <maximumf>, %229, %cst_116 [1] : vector<13x13xf32> to vector<13xf32>
    %231 = vector.shape_cast %230 : vector<13xf32> to vector<13x1xf32>
    %232 = vector.broadcast %231 : vector<13x1xf32> to vector<13x13xf32>
    %233 = arith.subf %229, %232 : vector<13x13xf32>
    %234 = math.exp %233 : vector<13x13xf32>
    %cst_117 = arith.constant dense<0.000000e+00> : vector<13xf32>
    %235 = vector.multi_reduction <add>, %234, %cst_117 [1] : vector<13x13xf32> to vector<13xf32>
    %236 = vector.shape_cast %235 : vector<13xf32> to vector<13x1xf32>
    %237 = tpu.reciprocal %236 {approx = true} : vector<13x1xf32> -> vector<13x1xf32>
    %238 = vector.broadcast %237 : vector<13x1xf32> to vector<13x13xf32>
    %239 = arith.mulf %234, %238 : vector<13x13xf32>
    %cst_118 = arith.constant dense<0.000000e+00> : vector<16x13xf32>
    %240 = tpu.matmul %226, %239, %cst_118 {dimension_numbers = #tpu.dot_dimension_numbers<[1], [1], [0], [0], [0, 0, 1, 0], [], []>} : vector<16x13xf32>, vector<13x13xf32>, vector<16x13xf32> -> vector<16x13xf32>
    %c0_119 = arith.constant 0 : index
    %c0_120 = arith.constant 0 : index
    %241 = vector.load %arg12[%c0_119, %c0_120] : memref<64x64xf32, #tpu.memory_space<vmem>>, vector<64x16xf32>
    %cst_121 = arith.constant dense<0.000000e+00> : vector<64x13xf32>
    %242 = tpu.matmul %241, %240, %cst_121 {dimension_numbers = #tpu.dot_dimension_numbers<[1], [0], [0], [1], [0, 0, 1, 1], [], []>} : vector<64x16xf32>, vector<16x13xf32>, vector<64x13xf32> -> vector<64x13xf32>
    %243 = arith.addf %223, %242 : vector<64x13xf32>
    %244 = vector.extract_strided_slice %222 {offsets = [16, 0], sizes = [16, 13], strides = [1, 1]} : vector<192x13xf32> to vector<16x13xf32>
    %245 = vector.extract_strided_slice %222 {offsets = [80, 0], sizes = [16, 13], strides = [1, 1]} : vector<192x13xf32> to vector<16x13xf32>
    %246 = vector.extract_strided_slice %222 {offsets = [144, 0], sizes = [16, 13], strides = [1, 1]} : vector<192x13xf32> to vector<16x13xf32>
    %cst_122 = arith.constant dense<0.000000e+00> : vector<13x13xf32>
    %247 = tpu.matmul %244, %245, %cst_122 {dimension_numbers = #tpu.dot_dimension_numbers<[0], [0], [1], [1], [0, 1, 1, 1], [], []>} : vector<16x13xf32>, vector<16x13xf32>, vector<13x13xf32> -> vector<13x13xf32>
    %cst_123 = arith.constant 2.500000e-01 : f32
    %248 = vector.broadcast %cst_123 : f32 to vector<13x13xf32>
    %249 = arith.mulf %247, %248 : vector<13x13xf32>
    %cst_124 = arith.constant dense<0xFF800000> : vector<13xf32>
    %250 = vector.multi_reduction <maximumf>, %249, %cst_124 [1] : vector<13x13xf32> to vector<13xf32>
    %251 = vector.shape_cast %250 : vector<13xf32> to vector<13x1xf32>
    %252 = vector.broadcast %251 : vector<13x1xf32> to vector<13x13xf32>
    %253 = arith.subf %249, %252 : vector<13x13xf32>
    %254 = math.exp %253 : vector<13x13xf32>
    %cst_125 = arith.constant dense<0.000000e+00> : vector<13xf32>
    %255 = vector.multi_reduction <add>, %254, %cst_125 [1] : vector<13x13xf32> to vector<13xf32>
    %256 = vector.shape_cast %255 : vector<13xf32> to vector<13x1xf32>
    %257 = tpu.reciprocal %256 {approx = true} : vector<13x1xf32> -> vector<13x1xf32>
    %258 = vector.broadcast %257 : vector<13x1xf32> to vector<13x13xf32>
    %259 = arith.mulf %254, %258 : vector<13x13xf32>
    %cst_126 = arith.constant dense<0.000000e+00> : vector<16x13xf32>
    %260 = tpu.matmul %246, %259, %cst_126 {dimension_numbers = #tpu.dot_dimension_numbers<[1], [1], [0], [0], [0, 0, 1, 0], [], []>} : vector<16x13xf32>, vector<13x13xf32>, vector<16x13xf32> -> vector<16x13xf32>
    %c0_127 = arith.constant 0 : index
    %c16_128 = arith.constant 16 : index
    %261 = vector.load %arg12[%c0_127, %c16_128] : memref<64x64xf32, #tpu.memory_space<vmem>>, vector<64x16xf32>
    %cst_129 = arith.constant dense<0.000000e+00> : vector<64x13xf32>
    %262 = tpu.matmul %261, %260, %cst_129 {dimension_numbers = #tpu.dot_dimension_numbers<[1], [0], [0], [1], [0, 0, 1, 1], [], []>} : vector<64x16xf32>, vector<16x13xf32>, vector<64x13xf32> -> vector<64x13xf32>
    %263 = arith.addf %243, %262 : vector<64x13xf32>
    %264 = vector.extract_strided_slice %222 {offsets = [32, 0], sizes = [16, 13], strides = [1, 1]} : vector<192x13xf32> to vector<16x13xf32>
    %265 = vector.extract_strided_slice %222 {offsets = [96, 0], sizes = [16, 13], strides = [1, 1]} : vector<192x13xf32> to vector<16x13xf32>
    %266 = vector.extract_strided_slice %222 {offsets = [160, 0], sizes = [16, 13], strides = [1, 1]} : vector<192x13xf32> to vector<16x13xf32>
    %cst_130 = arith.constant dense<0.000000e+00> : vector<13x13xf32>
    %267 = tpu.matmul %264, %265, %cst_130 {dimension_numbers = #tpu.dot_dimension_numbers<[0], [0], [1], [1], [0, 1, 1, 1], [], []>} : vector<16x13xf32>, vector<16x13xf32>, vector<13x13xf32> -> vector<13x13xf32>
    %cst_131 = arith.constant 2.500000e-01 : f32
    %268 = vector.broadcast %cst_131 : f32 to vector<13x13xf32>
    %269 = arith.mulf %267, %268 : vector<13x13xf32>
    %cst_132 = arith.constant dense<0xFF800000> : vector<13xf32>
    %270 = vector.multi_reduction <maximumf>, %269, %cst_132 [1] : vector<13x13xf32> to vector<13xf32>
    %271 = vector.shape_cast %270 : vector<13xf32> to vector<13x1xf32>
    %272 = vector.broadcast %271 : vector<13x1xf32> to vector<13x13xf32>
    %273 = arith.subf %269, %272 : vector<13x13xf32>
    %274 = math.exp %273 : vector<13x13xf32>
    %cst_133 = arith.constant dense<0.000000e+00> : vector<13xf32>
    %275 = vector.multi_reduction <add>, %274, %cst_133 [1] : vector<13x13xf32> to vector<13xf32>
    %276 = vector.shape_cast %275 : vector<13xf32> to vector<13x1xf32>
    %277 = tpu.reciprocal %276 {approx = true} : vector<13x1xf32> -> vector<13x1xf32>
    %278 = vector.broadcast %277 : vector<13x1xf32> to vector<13x13xf32>
    %279 = arith.mulf %274, %278 : vector<13x13xf32>
    %cst_134 = arith.constant dense<0.000000e+00> : vector<16x13xf32>
    %280 = tpu.matmul %266, %279, %cst_134 {dimension_numbers = #tpu.dot_dimension_numbers<[1], [1], [0], [0], [0, 0, 1, 0], [], []>} : vector<16x13xf32>, vector<13x13xf32>, vector<16x13xf32> -> vector<16x13xf32>
    %c0_135 = arith.constant 0 : index
    %c32_136 = arith.constant 32 : index
    %281 = vector.load %arg12[%c0_135, %c32_136] : memref<64x64xf32, #tpu.memory_space<vmem>>, vector<64x16xf32>
    %cst_137 = arith.constant dense<0.000000e+00> : vector<64x13xf32>
    %282 = tpu.matmul %281, %280, %cst_137 {dimension_numbers = #tpu.dot_dimension_numbers<[1], [0], [0], [1], [0, 0, 1, 1], [], []>} : vector<64x16xf32>, vector<16x13xf32>, vector<64x13xf32> -> vector<64x13xf32>
    %283 = arith.addf %263, %282 : vector<64x13xf32>
    %284 = vector.extract_strided_slice %222 {offsets = [48, 0], sizes = [16, 13], strides = [1, 1]} : vector<192x13xf32> to vector<16x13xf32>
    %285 = vector.extract_strided_slice %222 {offsets = [112, 0], sizes = [16, 13], strides = [1, 1]} : vector<192x13xf32> to vector<16x13xf32>
    %286 = vector.extract_strided_slice %222 {offsets = [176, 0], sizes = [16, 13], strides = [1, 1]} : vector<192x13xf32> to vector<16x13xf32>
    %cst_138 = arith.constant dense<0.000000e+00> : vector<13x13xf32>
    %287 = tpu.matmul %284, %285, %cst_138 {dimension_numbers = #tpu.dot_dimension_numbers<[0], [0], [1], [1], [0, 1, 1, 1], [], []>} : vector<16x13xf32>, vector<16x13xf32>, vector<13x13xf32> -> vector<13x13xf32>
    %cst_139 = arith.constant 2.500000e-01 : f32
    %288 = vector.broadcast %cst_139 : f32 to vector<13x13xf32>
    %289 = arith.mulf %287, %288 : vector<13x13xf32>
    %cst_140 = arith.constant dense<0xFF800000> : vector<13xf32>
    %290 = vector.multi_reduction <maximumf>, %289, %cst_140 [1] : vector<13x13xf32> to vector<13xf32>
    %291 = vector.shape_cast %290 : vector<13xf32> to vector<13x1xf32>
    %292 = vector.broadcast %291 : vector<13x1xf32> to vector<13x13xf32>
    %293 = arith.subf %289, %292 : vector<13x13xf32>
    %294 = math.exp %293 : vector<13x13xf32>
    %cst_141 = arith.constant dense<0.000000e+00> : vector<13xf32>
    %295 = vector.multi_reduction <add>, %294, %cst_141 [1] : vector<13x13xf32> to vector<13xf32>
    %296 = vector.shape_cast %295 : vector<13xf32> to vector<13x1xf32>
    %297 = tpu.reciprocal %296 {approx = true} : vector<13x1xf32> -> vector<13x1xf32>
    %298 = vector.broadcast %297 : vector<13x1xf32> to vector<13x13xf32>
    %299 = arith.mulf %294, %298 : vector<13x13xf32>
    %cst_142 = arith.constant dense<0.000000e+00> : vector<16x13xf32>
    %300 = tpu.matmul %286, %299, %cst_142 {dimension_numbers = #tpu.dot_dimension_numbers<[1], [1], [0], [0], [0, 0, 1, 0], [], []>} : vector<16x13xf32>, vector<13x13xf32>, vector<16x13xf32> -> vector<16x13xf32>
    %c0_143 = arith.constant 0 : index
    %c48_144 = arith.constant 48 : index
    %301 = vector.load %arg12[%c0_143, %c48_144] : memref<64x64xf32, #tpu.memory_space<vmem>>, vector<64x16xf32>
    %cst_145 = arith.constant dense<0.000000e+00> : vector<64x13xf32>
    %302 = tpu.matmul %301, %300, %cst_145 {dimension_numbers = #tpu.dot_dimension_numbers<[1], [0], [0], [1], [0, 0, 1, 1], [], []>} : vector<64x16xf32>, vector<16x13xf32>, vector<64x13xf32> -> vector<64x13xf32>
    %303 = arith.addf %283, %302 : vector<64x13xf32>
    %c0_146 = arith.constant 0 : index
    %c0_147 = arith.constant 0 : index
    %304 = vector.load %arg13[%c0_146, %c0_147] : memref<64x1xf32, #tpu.memory_space<vmem>>, vector<64x1xf32>
    %305 = vector.broadcast %304 : vector<64x1xf32> to vector<64x13xf32>
    %306 = arith.addf %303, %305 : vector<64x13xf32>
    %c0_148 = arith.constant 0 : index
    %c0_149 = arith.constant 0 : index
    %c0_150 = arith.constant 0 : index
    %307 = vector.load %arg14[%c0_148, %c0_149, %c0_150] : memref<1x64x13xf32, #tpu.memory_space<vmem>>, vector<1x64x13xf32>
    %308 = vector.shape_cast %307 : vector<1x64x13xf32> to vector<64x13xf32>
    %309 = vector.shape_cast %306 : vector<64x13xf32> to vector<1x64x13xf32>
    tpu.vector_store %arg14[%c0_148, %c0_149, %c0_150], %309 {strides = array<i32>} : memref<1x64x13xf32, #tpu.memory_space<vmem>>, vector<1x64x13xf32>,
    return
  }
  func.func @transform_0(%arg0: i32) -> i32 {
    %c0_i32 = arith.constant 0 : i32
    %c0_i32_0 = arith.constant 0 : i32
    return %c0_i32 : i32
  }
  func.func @transform_1(%arg0: i32) -> (i32, i32, i32) {
    %c0_i32 = arith.constant 0 : i32
    %c0_i32_0 = arith.constant 0 : i32
    %c0_i32_1 = arith.constant 0 : i32
    return %arg0, %c0_i32, %c0_i32_0 : i32, i32, i32
  }
  func.func @transform_2(%arg0: i32) -> (i32, i32) {
    %c0_i32 = arith.constant 0 : i32
    %c0_i32_0 = arith.constant 0 : i32
    %c0_i32_1 = arith.constant 0 : i32
    return %c0_i32, %c0_i32_0 : i32, i32
  }
  func.func @transform_3(%arg0: i32) -> (i32, i32) {
    %c0_i32 = arith.constant 0 : i32
    %c0_i32_0 = arith.constant 0 : i32
    %c0_i32_1 = arith.constant 0 : i32
    return %c0_i32, %c0_i32_0 : i32, i32
  }
  func.func @transform_4(%arg0: i32) -> (i32, i32) {
    %c0_i32 = arith.constant 0 : i32
    %c0_i32_0 = arith.constant 0 : i32
    %c0_i32_1 = arith.constant 0 : i32
    return %c0_i32, %c0_i32_0 : i32, i32
  }
  func.func @transform_5(%arg0: i32) -> (i32, i32) {
    %c0_i32 = arith.constant 0 : i32
    %c0_i32_0 = arith.constant 0 : i32
    %c0_i32_1 = arith.constant 0 : i32
    return %c0_i32, %c0_i32_0 : i32, i32
  }
  func.func @transform_6(%arg0: i32) -> (i32, i32) {
    %c0_i32 = arith.constant 0 : i32
    %c0_i32_0 = arith.constant 0 : i32
    %c0_i32_1 = arith.constant 0 : i32
    return %c0_i32, %c0_i32_0 : i32, i32
  }
  func.func @transform_7(%arg0: i32) -> (i32, i32) {
    %c0_i32 = arith.constant 0 : i32
    %c0_i32_0 = arith.constant 0 : i32
    %c0_i32_1 = arith.constant 0 : i32
    return %c0_i32, %c0_i32_0 : i32, i32
  }
  func.func @transform_8(%arg0: i32) -> (i32, i32) {
    %c0_i32 = arith.constant 0 : i32
    %c0_i32_0 = arith.constant 0 : i32
    %c0_i32_1 = arith.constant 0 : i32
    return %c0_i32, %c0_i32_0 : i32, i32
  }
  func.func @transform_9(%arg0: i32) -> (i32, i32) {
    %c0_i32 = arith.constant 0 : i32
    %c0_i32_0 = arith.constant 0 : i32
    %c0_i32_1 = arith.constant 0 : i32
    return %c0_i32, %c0_i32_0 : i32, i32
  }
  func.func @transform_10(%arg0: i32) -> (i32, i32) {
    %c0_i32 = arith.constant 0 : i32
    %c0_i32_0 = arith.constant 0 : i32
    %c0_i32_1 = arith.constant 0 : i32
    return %c0_i32, %c0_i32_0 : i32, i32
  }
  func.func @transform_11(%arg0: i32) -> (i32, i32) {
    %c0_i32 = arith.constant 0 : i32
    %c0_i32_0 = arith.constant 0 : i32
    %c0_i32_1 = arith.constant 0 : i32
    return %c0_i32, %c0_i32_0 : i32, i32
  }
  func.func @transform_12(%arg0: i32) -> (i32, i32) {
    %c0_i32 = arith.constant 0 : i32
    %c0_i32_0 = arith.constant 0 : i32
    %c0_i32_1 = arith.constant 0 : i32
    return %c0_i32, %c0_i32_0 : i32, i32
  }
  func.func @transform_13(%arg0: i32) -> (i32, i32, i32) {
    %c0_i32 = arith.constant 0 : i32
    %c0_i32_0 = arith.constant 0 : i32
    %c0_i32_1 = arith.constant 0 : i32
    return %arg0, %c0_i32, %c0_i32_0 : i32, i32, i32
  }
}

</mosaic_0001>

<bundles_post_ra>
// kernel: tpu_custom_call.1
= control target key start
LH: loop header
LB: loop body
LE: loop exit
PB: predicated region body
PF: predicated region fallthrough
CT: control target
= control target key end

     0   :  { %18 = vsyncpa [#allocation4], 0  ;;  %s5843_s25 = smov 0   ;;  %s7137_s0 = inlined_call_operand.vmem [shape: f32[2], index: 0, kind: input, shape index: {}]   ;;  %s7138_s1 = inlined_call_operand.vmem [shape: f32[2,1,64], index: 1, kind: input, shape index: {}]   ;;  %s7139_s2 = inlined_call_operand.vmem [shape: f32[16,5], index: 2, kind: input, shape index: {}]   ;;  %s7140_s3 = inlined_call_operand.vmem [shape: f32[16,80], index: 3, kind: input, shape index: {}]   ;;  %s7141_s4 = inlined_call_operand.vmem [shape: f32[32,48], index: 4, kind: input, shape index: {}]   ;;  %s7142_s5 = inlined_call_operand.vmem [shape: f32[32,96], index: 5, kind: input, shape index: {}]   ;;  %s7143_s6 = inlined_call_operand.vmem [shape: f32[64,96], index: 6, kind: input, shape index: {}]   ;;  %s7144_s7 = inlined_call_operand.vmem [shape: f32[64,192], index: 7, kind: input, shape index: {}]   ;;  %s7145_s8 = inlined_call_operand.vmem [shape: f32[64,18], index: 8, kind: input, shape index: {}]   ;;  %s7146_s9 = inlined_call_operand.vmem [shape: f32[192,64], index: 9, kind: input, shape index: {}]   ;;  %s7147_s10 = inlined_call_operand.vmem [shape: f32[192,1], index: 10, kind: input, shape index: {}]   ;;  %s7148_s11 = inlined_call_operand.vmem [shape: f32[64,64], index: 11, kind: input, shape index: {}]   ;;  %s7149_s12 = inlined_call_operand.vmem [shape: f32[64,1], index: 12, kind: input, shape index: {}]   ;;  %s7150_s13 = inlined_call_operand.vmem [shape: f32[2,64,13], index: 13, kind: output, shape index: {}]  }
   0x1 LB: > { %s5849_s26 = sadd.s32 4294967295, %s5741_s25   ;;  %p4499_p0 = scmp.ge.s32.totalorder %s5741_s25, 1  ;;  %s5741_s25 = sphi %s5843_s25, %s24_s25  }
   0x2   : > { %p333_p1 = scmp.lt.s32.totalorder %s5741_s25, 3  ;;  %s346_s29 = sshll.u32 %s7137_s0, 4  ;;  %s347_s29 = int_to_ptr.vmem [resolvable:$true] %s346_s29 }
   0x3   : > { %p5417_p3 = scmp.eq.s32.totalorder %s5849_s26, 0  ;;  %s5716_s14 = scalar_lea.vmem %s347_s29, 16 }
   0x4   : > { %p5856_p2 = pnand %p4499_p0, %p333_p1  ;;  %p5717_p6 = scmp.ne.s32.totalorder %s347_s29, %s5716_s14 }
   0x5   : > { %p5724_p10 = scmp.lt.s32.totalorder %s347_s29, %s347_s29  ;;  %p5725_p11 = scmp.lt.s32.totalorder %s5716_s14, %s5716_s14 }
   0x6   : > { %p5413_p4 = pneg %p5856_p2 }
   0x7   : > { %p5726_p12 = por %p5725_p11, %p5724_p10 }
   0x8   : > { %p5414_p5 = pnand %p5417_p3, %p5413_p4 }
   0xa   : > { %p5718_p7 = pneg %p5414_p5 }
   0xc   : > { %p5719_p8 = pnand %p5718_p7, %p5717_p6 }
   0xe   : > { %p5720_p9 = pneg %p5719_p8 }
  0x10   : > { %p5727_p13 = pnand %p5726_p12, %p5720_p9 }
  0x12   : > { %5730 = shalt.err (!%p5727_p13)
}
  0x13   : > { %s5743_s15 = smov [#allocation3]   ;;  %398 = sbr.rel (%p5856_p2) target bundleno = 5689 (0x1639), region = 72 }
  0x14   : > { %5416 = dma.vmem_to_smem (!%p5414_p5), %s347_s29, 16, %s5743_s15, [#allocation4]  }
  0x1a   : > { %5736 = dma.done.wait (%p5417_p3), [#allocation4], 16  }
  0x1b   : > { %5738 = vsyncadd (%p5417_p3), [#allocation4], 4294967280 }
  0x1c   : > { %404 = sfence }
  0x1d   : > { %p441_p0 = scmp.lt.s32.totalorder %s5849_s26, 1  ;;  %v488_v0 = vlaneseq  ;;  %vm7151_vm0 = vcmask 523264   ;;  %v5744_v1 = vmov 0.0   ;;  %vm497_vm1 = vcmask 499712   ;;  %v460_v6 = vld [vmem:[%s7139_s2] sm:$0xff]  ;;  %s5745_s21 = smov 126  }
  0x1e   : > { %463 = vst.msk [vmem:[#allocation2] sm:$0xff] %vm7151_vm0, %v5744_v1  ;;  %464 = vst.msk [vmem:[#allocation2 + $0x8] sm:$0xff] %vm7151_vm0, %v5744_v1  ;;  %vm523_vm2 = vcmask 39936   ;;  %s5746_s22 = smov 1   ;;  %v5747_v7 = vmov 0   ;;  %s5748_s23 = smov 125  }
  0x1f   : > { %465 = vst.msk [vmem:[#allocation2 + $0x10] sm:$0xff] %vm7151_vm0, %v5744_v1  ;;  %466 = vst.msk [vmem:[#allocation2 + $0x18] sm:$0xff] %vm7151_vm0, %v5744_v1  ;;  %s7226_s26 = smov (!%p441_p0, %s5849_s26), 1  ;;  %v5926_v2 = vshrl.u32 %v488_v0, 7  ;;  %4850 = vmatprep.mubr.msk.f32.mxu0 %vm523_vm2, %v460_v6  ;;  %5458 = vset.pattern.permute.xlu1 %v5747_v7  ;;  %s5749_s24 = smov 127   ;;  %v6097_v8 = vld [vmem:[%s7145_s8 + $0x8] sm:$0xff] }
  0x20   : > { %467 = vst.msk [vmem:[#allocation2 + $0x20] sm:$0xff] %vm7151_vm0, %v5744_v1  ;;  %468 = vst.msk [vmem:[#allocation2 + $0x28] sm:$0xff] %vm7151_vm0, %v5744_v1  ;;  %s443_s18 = scalar_lea.vmem %s7138_s1, %s7226_s26  ;;  %5457 = vset.pattern.permute.xlu0 %v5747_v7  ;;  %v6102_v9 = vld [vmem:[%s7145_s8] sm:$0xff]  ;;  %v5750_v10 = vmov 1   ;;  %v5751_v11 = vmov 2   ;;  %vm495_vm3 = vcmask 499720  }
  0x21   : > { %469 = vst.msk [vmem:[#allocation2 + $0x30] sm:$0xff] %vm7151_vm0, %v5744_v1  ;;  %470 = vst.msk [vmem:[#allocation2 + $0x38] sm:$0xff] %vm7151_vm0, %v5744_v1  ;;  %v490_v3 = vsub.s32 0, %v5926_v2  ;;  %v457_v4 = vld [vmem:[%s443_s18] sm:$0x1]  ;;  %vm510_vm4 = vcmask 491520  }
  0x22   : > { %471 = vst.msk [vmem:[#allocation2 + $0x40] sm:$0xff] %vm7151_vm0, %v5744_v1  ;;  %472 = vst.msk [vmem:[#allocation2 + $0x48] sm:$0xff] %vm7151_vm0, %v5744_v1  ;;  %vm530_vm5 = vcmask 1044480   ;;  %v461_v17 = vld [vmem:[%s7139_s2 + $0x8] sm:$0xff]  ;;  %vm7152_vm6 = vcmask 490496   ;;  %v643_v45 = vld [vmem:[%s7140_s3] sm:$0xff] }
  0x23   : > { %473 = vst.msk [vmem:[#allocation2 + $0x50] sm:$0xff] %vm7151_vm0, %v5744_v1  ;;  %474 = vst.msk [vmem:[#allocation2 + $0x58] sm:$0xff] %vm7151_vm0, %v5744_v1  ;;  %v491_v5 = vrot.slane %v457_v4, %v490_v3  ;;  %vm726_vm7 = vcmask 654336   ;;  %v5752_v46 = vmov 3   ;;  %vm677_vm8 = vcmask 490504   ;;  %v644_v6 = vld [vmem:[%s7140_s3 + $0x8] sm:$0xff] }
  0x24   : > { %475 = vst.msk [vmem:[#allocation2 + $0x60] sm:$0xff] %vm7151_vm0, %v5744_v1  ;;  %476 = vst.msk [vmem:[#allocation2 + $0x68] sm:$0xff] %vm7151_vm0, %v5744_v1  ;;  %4873 = vmatprep.mubr.msk.f32.mxu1 %vm726_vm7, %v643_v45  ;;  %vm705_vm9 = vcmask 482304   ;;  %s458_s20 = sld [smem:[#allocation3]]  ;;  %s4506_s18 = sld [smem:[#allocation3 + $0x1]] }
  0x25   : > { %477 = vst.msk [vmem:[#allocation2 + $0x70] sm:$0xff] %vm7151_vm0, %v5744_v1  ;;  %478 = vst.msk [vmem:[#allocation2 + $0x78] sm:$0xff] %vm7151_vm0, %v5744_v1  ;;  %503 = vrot.lane.b32.xlu1 %v491_v5, %s5745_s21  ;;  %492 = vrot.lane.b32.xlu0 %v491_v5, %s5746_s22  ;;  %s5770_s16 = smov 112  }
  0x26   : > { %479 = vst.msk [vmem:[#allocation2 + $0x80] sm:$0xff] %vm7151_vm0, %v5744_v1  ;;  %480 = vst.msk [vmem:[#allocation2 + $0x88] sm:$0xff] %vm7151_vm0, %v5744_v1 }
  0x27   : > { %481 = vst.msk [vmem:[#allocation2 + $0x90] sm:$0xff] %vm7151_vm0, %v5744_v1  ;;  %482 = vst.msk [vmem:[#allocation2 + $0x98] sm:$0xff] %vm7151_vm0, %v5744_v1 }
  0x28   : > { %483 = vst.msk [vmem:[#allocation2 + $0xa0] sm:$0xff] %vm7151_vm0, %v5744_v1  ;;  %484 = vst.msk [vmem:[#allocation2 + $0xa8] sm:$0xff] %vm7151_vm0, %v5744_v1 }
  0x29   : > { %485 = vst.msk [vmem:[#allocation2 + $0xb0] sm:$0xff] %vm7151_vm0, %v5744_v1  ;;  %486 = vst.msk [vmem:[#allocation2 + $0xb8] sm:$0xff] %vm7151_vm0, %v5744_v1  ;;  %507 = vrot.lane.b32.xlu1 %v491_v5, %s5748_s23  ;;  %499 = vrot.lane.b32.xlu0 %v491_v5, %s5749_s24 }
  0x2a   : > { %646 = vst.msk [vmem:[#allocation2 + $0x8] sm:$0xff] %vm7151_vm0, %v5744_v1  ;;  %647 = vst.msk [vmem:[#allocation2 + $0x10] sm:$0xff] %vm7151_vm0, %v5744_v1 }
  0x2b   : > { %648 = vst.msk [vmem:[#allocation2 + $0x18] sm:$0xff] %vm7151_vm0, %v5744_v1  ;;  %649 = vst.msk [vmem:[#allocation2 + $0x20] sm:$0xff] %vm7151_vm0, %v5744_v1 }
  0x2c   : > { %650 = vst.msk [vmem:[#allocation2 + $0x28] sm:$0xff] %vm7151_vm0, %v5744_v1  ;;  %651 = vst.msk [vmem:[#allocation2 + $0x30] sm:$0xff] %vm7151_vm0, %v5744_v1 }
  0x2d   : > { %652 = vst.msk [vmem:[#allocation2 + $0x38] sm:$0xff] %vm7151_vm0, %v5744_v1  ;;  %653 = vst.msk [vmem:[#allocation2 + $0x40] sm:$0xff] %vm7151_vm0, %v5744_v1  ;;  %520 = vperm.xlu1 %5458, %v6097_v8   ;;  %515 = vperm.xlu0 %5457, %v6102_v9  }
  0x2e   : > { %654 = vst.msk [vmem:[#allocation2 + $0x48] sm:$0xff] %vm7151_vm0, %v5744_v1  ;;  %655 = vst.msk [vmem:[#allocation2 + $0x50] sm:$0xff] %vm7151_vm0, %v5744_v1 }
  0x2f   : > { %656 = vst.msk [vmem:[#allocation2 + $0x58] sm:$0xff] %vm7151_vm0, %v5744_v1  ;;  %657 = vst.msk [vmem:[#allocation2 + $0x60] sm:$0xff] %vm7151_vm0, %v5744_v1 }
  0x30   : > { %658 = vst.msk [vmem:[#allocation2 + $0x68] sm:$0xff] %vm7151_vm0, %v5744_v1  ;;  %659 = vst.msk [vmem:[#allocation2 + $0x70] sm:$0xff] %vm7151_vm0, %v5744_v1 }
  0x31   : > { %660 = vst.msk [vmem:[#allocation2 + $0x78] sm:$0xff] %vm7151_vm0, %v5744_v1  ;;  %661 = vst.msk [vmem:[#allocation2 + $0x80] sm:$0xff] %vm7151_vm0, %v5744_v1  ;;  %5459 = vset.pattern.permute.xlu1 %v5750_v10  ;;  %5460 = vset.pattern.permute.xlu0 %v5750_v10  ;;  %v831_v10 = vand.u32 127, %v488_v0  ;;  %v5753_v0 = vmov 0.5|0.5  }
  0x32   : > { %662 = vst.msk [vmem:[#allocation2 + $0x88] sm:$0xff] %vm7151_vm0, %v5744_v1  ;;  %663 = vst.msk [vmem:[#allocation2 + $0x90] sm:$0xff] %vm7151_vm0, %v5744_v1  ;;  %610 = vperm.xlu1 %5459, %v6102_v9   ;;  %614 = vperm.xlu0 %5460, %v6097_v8  }
  0x33   : > { %664 = vst.msk [vmem:[#allocation2 + $0x98] sm:$0xff] %vm7151_vm0, %v5744_v1  ;;  %665 = vst.msk [vmem:[#allocation2 + $0xa0] sm:$0xff] %vm7151_vm0, %v5744_v1 }
  0x34   : > { %666 = vst.msk [vmem:[#allocation2 + $0xa8] sm:$0xff] %vm7151_vm0, %v5744_v1  ;;  %667 = vst.msk [vmem:[#allocation2 + $0xb0] sm:$0xff] %vm7151_vm0, %v5744_v1 }
  0x35   : > { %668 = vst.msk [vmem:[#allocation2 + $0xb8] sm:$0xff] %vm7151_vm0, %v5744_v1  ;;  %1013 = vst.msk [vmem:[#allocation2 + $0x50] sm:$0xff] %vm7151_vm0, %v5744_v1 }
  0x36   : > { %1014 = vst.msk [vmem:[#allocation2 + $0x58] sm:$0xff] %vm7151_vm0, %v5744_v1  ;;  %1015 = vst.msk [vmem:[#allocation2 + $0x60] sm:$0xff] %vm7151_vm0, %v5744_v1  ;;  %5461 = vset.pattern.permute.xlu1 %v5751_v11  ;;  %5462 = vset.pattern.permute.xlu0 %v5752_v46  ;;  %v832_v11 = vmul.u32 2, %v831_v10 }
  0x37   : > { %1016 = vst.msk [vmem:[#allocation2 + $0x68] sm:$0xff] %vm7151_vm0, %v5744_v1  ;;  %1017 = vst.msk [vmem:[#allocation2 + $0x70] sm:$0xff] %vm7151_vm0, %v5744_v1  ;;  %620 = vperm.xlu1 %5461, %v6102_v9  }
  0x38   : > { %1018 = vst.msk [vmem:[#allocation2 + $0x78] sm:$0xff] %vm7151_vm0, %v5744_v1  ;;  %1019 = vst.msk [vmem:[#allocation2 + $0x80] sm:$0xff] %vm7151_vm0, %v5744_v1  ;;  %vm833_vm10 = vcmp.eq.s32.totalorder %v5926_v2, %v832_v11 }
  0x39   : > { %1020 = vst.msk [vmem:[#allocation2 + $0x88] sm:$0xff] %vm7151_vm0, %v5744_v1  ;;  %1021 = vst.msk [vmem:[#allocation2 + $0x90] sm:$0xff] %vm7151_vm0, %v5744_v1 }
  0x3a   : > { %1022 = vst.msk [vmem:[#allocation2 + $0x98] sm:$0xff] %vm7151_vm0, %v5744_v1  ;;  %1023 = vst.msk [vmem:[#allocation2 + $0xa0] sm:$0xff] %vm7151_vm0, %v5744_v1 }
  0x3b   : > { %1024 = vst.msk [vmem:[#allocation2 + $0xa8] sm:$0xff] %vm7151_vm0, %v5744_v1  ;;  %1025 = vst.msk [vmem:[#allocation2 + $0xb0] sm:$0xff] %vm7151_vm0, %v5744_v1  ;;  %624 = vperm.xlu1 %5461, %v6097_v8  }
  0x3c   : > { %1026 = vst.msk [vmem:[#allocation2 + $0xb8] sm:$0xff] %vm7151_vm0, %v5744_v1  ;;  %1254 = vst.msk [vmem:[#allocation2 + $0x50] sm:$0xff] %vm7151_vm0, %v5744_v1 }
  0x3d   : > { %1255 = vst.msk [vmem:[#allocation2 + $0x58] sm:$0xff] %vm7151_vm0, %v5744_v1  ;;  %1256 = vst.msk [vmem:[#allocation2 + $0x60] sm:$0xff] %vm7151_vm0, %v5744_v1 }
  0x3e   : > { %1257 = vst.msk [vmem:[#allocation2 + $0x68] sm:$0xff] %vm7151_vm0, %v5744_v1  ;;  %1258 = vst.msk [vmem:[#allocation2 + $0x70] sm:$0xff] %vm7151_vm0, %v5744_v1 }
  0x3f   : > { %1259 = vst.msk [vmem:[#allocation2 + $0x78] sm:$0xff] %vm7151_vm0, %v5744_v1  ;;  %1260 = vst.msk [vmem:[#allocation2 + $0x80] sm:$0xff] %vm7151_vm0, %v5744_v1  ;;  %5463 = vset.pattern.permute.xlu1 %v5752_v46 }
  0x40   : > { %1261 = vst.msk [vmem:[#allocation2 + $0x88] sm:$0xff] %vm7151_vm0, %v5744_v1  ;;  %1262 = vst.msk [vmem:[#allocation2 + $0x90] sm:$0xff] %vm7151_vm0, %v5744_v1 }
  0x41   : > { %1263 = vst.msk [vmem:[#allocation2 + $0x98] sm:$0xff] %vm7151_vm0, %v5744_v1  ;;  %1264 = vst.msk [vmem:[#allocation2 + $0xa0] sm:$0xff] %vm7151_vm0, %v5744_v1 }
  0x42   : > { %1265 = vst.msk [vmem:[#allocation2 + $0xa8] sm:$0xff] %vm7151_vm0, %v5744_v1  ;;  %1266 = vst.msk [vmem:[#allocation2 + $0xb0] sm:$0xff] %vm7151_vm0, %v5744_v1 }
  0x43   : > { %1267 = vst.msk [vmem:[#allocation2 + $0xb8] sm:$0xff] %vm7151_vm0, %v5744_v1  ;;  %1672 = vst.msk [vmem:[#allocation2 + $0x60] sm:$0xff] %vm7151_vm0, %v5744_v1 }
  0x44   : > { %1673 = vst.msk [vmem:[#allocation2 + $0x68] sm:$0xff] %vm7151_vm0, %v5744_v1  ;;  %1674 = vst.msk [vmem:[#allocation2 + $0x70] sm:$0xff] %vm7151_vm0, %v5744_v1 }
  0x45   : > { %1675 = vst.msk [vmem:[#allocation2 + $0x78] sm:$0xff] %vm7151_vm0, %v5744_v1  ;;  %1676 = vst.msk [vmem:[#allocation2 + $0x80] sm:$0xff] %vm7151_vm0, %v5744_v1 }
  0x46   : > { %1677 = vst.msk [vmem:[#allocation2 + $0x88] sm:$0xff] %vm7151_vm0, %v5744_v1  ;;  %1678 = vst.msk [vmem:[#allocation2 + $0x90] sm:$0xff] %vm7151_vm0, %v5744_v1 }
  0x47   : > { %1679 = vst.msk [vmem:[#allocation2 + $0x98] sm:$0xff] %vm7151_vm0, %v5744_v1  ;;  %1680 = vst.msk [vmem:[#allocation2 + $0xa0] sm:$0xff] %vm7151_vm0, %v5744_v1 }
  0x48   : > { %1681 = vst.msk [vmem:[#allocation2 + $0xa8] sm:$0xff] %vm7151_vm0, %v5744_v1  ;;  %1682 = vst.msk [vmem:[#allocation2 + $0xb0] sm:$0xff] %vm7151_vm0, %v5744_v1 }
  0x49   : > { %1683 = vst.msk [vmem:[#allocation2 + $0xb8] sm:$0xff] %vm7151_vm0, %v5744_v1  ;;  %2068 = vst.msk [vmem:[#allocation2 + $0x60] sm:$0xff] %vm7151_vm0, %v5744_v1 }
  0x4a   : > { %498 = vst.msk [vmem:[#allocation2 + $0x1] sm:$0x1] %vm497_vm1, %v457_v4 }
  0x4b   : > { %2069 = vst.msk [vmem:[#allocation2 + $0x68] sm:$0xff] %vm7151_vm0, %v5744_v1  ;;  %2070 = vst.msk [vmem:[#allocation2 + $0x70] sm:$0xff] %vm7151_vm0, %v5744_v1 }
  0x4c   : > { %2071 = vst.msk [vmem:[#allocation2 + $0x78] sm:$0xff] %vm7151_vm0, %v5744_v1  ;;  %2072 = vst.msk [vmem:[#allocation2 + $0x80] sm:$0xff] %vm7151_vm0, %v5744_v1 }
  0x4d   : > { %2073 = vst.msk [vmem:[#allocation2 + $0x88] sm:$0xff] %vm7151_vm0, %v5744_v1  ;;  %2074 = vst.msk [vmem:[#allocation2 + $0x90] sm:$0xff] %vm7151_vm0, %v5744_v1 }
  0x4e   : > { %2075 = vst.msk [vmem:[#allocation2 + $0x98] sm:$0xff] %vm7151_vm0, %v5744_v1  ;;  %2076 = vst.msk [vmem:[#allocation2 + $0xa0] sm:$0xff] %vm7151_vm0, %v5744_v1 }
  0x4f   : > { %2077 = vst.msk [vmem:[#allocation2 + $0xa8] sm:$0xff] %vm7151_vm0, %v5744_v1  ;;  %2078 = vst.msk [vmem:[#allocation2 + $0xb0] sm:$0xff] %vm7151_vm0, %v5744_v1 }
  0x50   : > { %2079 = vst.msk [vmem:[#allocation2 + $0xb8] sm:$0xff] %vm7151_vm0, %v5744_v1 }
  0x97   : > { %v504_v12 = vpop.permute.xlu1 %503  ;;  %v493_v13 = vpop.permute.xlu0 %492 }
  0x98   : > { %506 = vst.msk [vmem:[#allocation2 + $0x3] sm:$0x1] %vm497_vm1, %v504_v12  ;;  %v823_v12 = vadd.s32 8, %v5926_v2 }
  0x99   : > { %496 = vst.msk [vmem:[#allocation2] sm:$0x1] %vm495_vm3, %v493_v13  ;;  %v841_v13 = vadd.s32 1, %v832_v11 }
  0x9a   : > { %vm834_vm11 = vcmp.eq.s32.totalorder %v823_v12, %v832_v11 }
  0x9b   : > { %v508_v14 = vpop.permute.xlu1 %507  ;;  %v500_v15 = vpop.permute.xlu0 %499  ;;  %vm842_vm12 = vcmp.eq.s32.totalorder %v5926_v2, %v841_v13  ;;  %vm843_vm13 = vcmp.eq.s32.totalorder %v823_v12, %v841_v13 }
  0x9c   : > { %511 = vst.msk [vmem:[#allocation2 + $0x4] sm:$0x1] %vm510_vm4, %v508_v14  ;;  %vm850_vm14 = vmor %vm833_vm10, %vm842_vm12  ;;  %v824_v14 = vadd.s32 16, %v5926_v2 }
  0x9d   : > { %502 = vst.msk [vmem:[#allocation2 + $0x2] sm:$0x1] %vm497_vm1, %v500_v15  ;;  %vm851_vm15 = vmor %vm834_vm11, %vm843_vm13  ;;  %v825_v15 = vadd.s32 24, %v5926_v2 }
  0x9e   : > { %vm6176_vm1 = vmpackc.low %vm851_vm15, %vm850_vm14  ;;  %vm844_vm4 = vcmp.eq.s32.totalorder %v824_v14, %v841_v13 }
  0x9f   : > { %vm836_vm3 = vcmp.eq.s32.totalorder %v825_v15, %v832_v11 }
  0xa4   : > { %v512_v16 = vld [vmem:[#allocation2] sm:$0x1f] }
  0xa5   : > { %4848 = vmatprep.subr.msk.mxu0 %vm530_vm5, %v512_v16  ;;  %645 = vst.msk [vmem:[#allocation2] sm:$0xff] %vm7151_vm0, %v5744_v1 }
  0xa6   : > { %4849 = vmatpush3.msk.msra.mxu0 %vm530_vm5, %v512_v16  ;;  %v7157_v16 = vmov 0  ;;  %vm845_vm5 = vcmp.eq.s32.totalorder %v825_v15, %v841_v13 }
  0xa7   : > { %4851 = vmatmul.mubr.msk.f32.vlgmr.msra.gmra.mrb[0].mxu0 %vm523_vm2, %v461_v17  ;;  %v7158_v16 = vsel %vm6176_vm1, 4294967295, %v7157_v16  ;;  %5186 = vmatprep.subr.msk.bf16.mxu0 %vm6176_vm1, %v5753_v0  ;;  %vm835_vm2 = vcmp.eq.s32.totalorder %v824_v14, %v832_v11  ;;  %v7159_v17 = vmov 0 }
  0xa8   : > { %5188 = vmatpush3.bf16.msk.msra.mxu0 %vm6176_vm1, %v5753_v0 }
  0xac   : > { %v521_v18 = vpop.permute.xlu1 %520  ;;  %v516_v20 = vpop.permute.xlu0 %515 }
  0xb1   : > { %v611_v19 = vpop.permute.xlu1 %610  ;;  %v615_v23 = vpop.permute.xlu0 %614 }
  0xb6   : > { %v621_v21 = vpop.permute.xlu1 %620 }
  0xba   : > { %v625_v28 = vpop.permute.xlu1 %624 }
 0x17a   : > { %v4852_v22 = vpop.f32.mrb[0].mxu0 }
 0x17b   : > { %v606_v24 = vadd.f32 %v4852_v22, %v521_v18  ;;  %v600_v25 = vpop.f32.mrb[1].mxu0  ;;  %v826_v18 = vadd.s32 32, %v5926_v2  ;;  %v829_v22 = vadd.s32 56, %v5926_v2 }
 0x17c   : > { %v601_v26 = vadd.f32 %v600_v25, %v516_v20 }
 0x17d   : > { %v618_v27 = vmul.f32 %v615_v23, %v606_v24  ;;  %v5754_v23 = vmov 0.5   ;;  %vm837_vm10 = vcmp.eq.s32.totalorder %v826_v18, %v832_v11  ;;  %vm846_vm12 = vcmp.eq.s32.totalorder %v826_v18, %v841_v13 }
 0x17e   : > { %v617_v29 = vmul.f32 %v611_v19, %v601_v26  ;;  %v827_v19 = vadd.s32 40, %v5926_v2  ;;  %vm854_vm14 = vmor %vm837_vm10, %vm846_vm12  ;;  %v814_v26 = vstv %s458_s20  ;;  %vm1047_vm12 = vcmask 236544  }
 0x17f   : > { %v628_v30 = vadd.f32 %v625_v28, %v618_v27  ;;  %v5755_v27 = vmov 4   ;;  %v5756_v28 = vmov 5  }
 0x180   : > { %v627_v31 = vadd.f32 %v621_v21, %v617_v29  ;;  %v828_v21 = vadd.s32 48, %v5926_v2  ;;  %vm838_vm11 = vcmp.eq.s32.totalorder %v827_v19, %v832_v11  ;;  %vm847_vm13 = vcmp.eq.s32.totalorder %v827_v19, %v841_v13 }
 0x181   : > { %v4511_v32 = vmul.f32 -1.442695, %v628_v30 }
 0x182   : > { %v4510_v33 = vmul.f32 -1.442695, %v627_v31  ;;  %vm839_vm15 = vcmp.eq.s32.totalorder %v828_v21, %v832_v11 }
 0x183   : > { %5516 = vpow2.f32 %v4511_v32 }
 0x184   : > { %5518 = vpow2.f32 %v4510_v33 }
 0x18d   : > { %v5517_v34 = vpop.eup %5516 }
 0x18e   : > { %v5519_v35 = vpop.eup %5518  ;;  %v636_v36 = vadd.f32 1.0, %v5517_v34 }
 0x18f   : > { %v635_v37 = vadd.f32 1.0, %v5519_v35 }
 0x190   : > { %5520 = vrcp.f32 %v636_v36 }
 0x191   : > { %5522 = vrcp.f32 %v635_v37 }
 0x192   : > { %5524 = vrcp.f32 %v814_v26 }
 0x19a   : > { %v5521_v38 = vpop.eup %5520 }
 0x19b   : > { %v5523_v39 = vpop.eup %5522  ;;  %v642_v40 = vmul.f32 %v5521_v38, %v628_v30 }
 0x19c   : > { %v641_v41 = vmul.f32 %v5523_v39, %v627_v31  ;;  %v5525_v29 = vpop.eup %5524 }
 0x19d   : > { %673 = vrot.lane.b32.xlu1 %v642_v40, %s5746_s22  ;;  %682 = vst.msk [vmem:[#allocation2 + $0x18] sm:$0xff] %vm7152_vm6, %v642_v40 }
 0x19e   : > { %671 = vrot.lane.b32.xlu0 %v641_v41, %s5746_s22  ;;  %681 = vst.msk [vmem:[#allocation2 + $0x10] sm:$0xff] %vm7152_vm6, %v641_v41 }
 0x19f   : > { %5405 = vpush %v5525_v29  ;;  %v5759_v29 = vmov 8  }
 0x1a1   : > { %685 = vrot.lane.b32.xlu1 %v642_v40, %s5749_s24 }
 0x1a2   : > { %683 = vrot.lane.b32.xlu0 %v641_v41, %s5749_s24 }
 0x1a4   : > { %v711_v42 = vld [vmem:[#allocation2 + $0x18] sm:$0xff] }
 0x1a5   : > { %693 = vrot.lane.b32.xlu1 %v642_v40, %s5745_s21  ;;  %v710_v43 = vld [vmem:[#allocation2 + $0x10] sm:$0xff]  ;;  %1006 = vst.msk [vmem:[#allocation2 + $0x18] sm:$0xff] %vm7151_vm0, %v5744_v1 }
 0x1a6   : > { %691 = vrot.lane.b32.xlu0 %v641_v41, %s5745_s21  ;;  %v5169_v44 = vpack.c.bf16 %v711_v42, %v710_v43  ;;  %1005 = vst.msk [vmem:[#allocation2 + $0x10] sm:$0xff] %vm7151_vm0, %v5744_v1 }
 0x1a9   : > { %701 = vrot.lane.b32.xlu1 %v642_v40, %s5748_s23 }
 0x1aa   : > { %699 = vrot.lane.b32.xlu0 %v641_v41, %s5748_s23 }
 0x1ad   : > { %723 = vperm.xlu1 %5463, %v6097_v8  }
 0x1ae   : > { %719 = vperm.xlu0 %5462, %v6102_v9  }
 0x1b1   : > { %5464 = vset.pattern.permute.xlu1 %v5755_v27 }
 0x1b2   : > { %5465 = vset.pattern.permute.xlu0 %v5755_v27  ;;  %966 = vperm.xlu1 %5464, %v6102_v9   ;;  %v5757_v27 = vmov 6  }
 0x1b3   : > { %970 = vperm.xlu0 %5465, %v6097_v8  }
 0x1b6   : > { %5466 = vset.pattern.permute.xlu1 %v5756_v28  ;;  %v5758_v28 = vmov 7  }
 0x1b7   : > { %976 = vperm.xlu1 %5466, %v6102_v9   ;;  %5467 = vset.pattern.permute.xlu0 %v5757_v27 }
 0x1bb   : > { %980 = vperm.xlu1 %5466, %v6097_v8  }
 0x1bf   : > { %5468 = vset.pattern.permute.xlu1 %v5757_v27 }
 0x1d0   : > { %s5406_s23 = spop %5405 }
 0x20f   : > { %v674_v47 = vpop.permute.xlu1 %673 }
 0x210   : > { %679 = vst.msk [vmem:[#allocation2 + $0x8] sm:$0xff] %vm677_vm8, %v674_v47  ;;  %v672_v48 = vpop.permute.xlu0 %671 }
 0x211   : > { %678 = vst.msk [vmem:[#allocation2] sm:$0xff] %vm677_vm8, %v672_v48  ;;  %vm853_vm8 = vmor %vm836_vm3, %vm845_vm5  ;;  %vm849_vm5 = vcmp.eq.s32.totalorder %v829_v22, %v841_v13 }
 0x212   : > { %v861_v20 = vsel %vm853_vm8, 0.5, %v5744_v1  ;;  %vm855_vm3 = vmor %vm838_vm11, %vm847_vm13  ;;  %vm1035_vm11 = vcmask 244744  }
 0x213   : > { %v686_v49 = vpop.permute.xlu1 %685  ;;  %v6198_v24 = vpack.c.bf16 %v861_v20, %v5754_v23 }
 0x214   : > { %690 = vst.msk [vmem:[#allocation2 + $0x28] sm:$0xff] %vm7152_vm6, %v686_v49  ;;  %v684_v50 = vpop.permute.xlu0 %683 }
 0x215   : > { %689 = vst.msk [vmem:[#allocation2 + $0x20] sm:$0xff] %vm7152_vm6, %v684_v50 }
 0x217   : > { %v694_v51 = vpop.permute.xlu1 %693  ;;  %v709_v52 = vld [vmem:[#allocation2 + $0x8] sm:$0xff] }
 0x218   : > { %698 = vst.msk [vmem:[#allocation2 + $0x38] sm:$0xff] %vm7152_vm6, %v694_v51  ;;  %v692_v53 = vpop.permute.xlu0 %691  ;;  %v708_v54 = vld [vmem:[#allocation2] sm:$0xff]  ;;  %v958_v51 = vstv %s5406_s23 }
 0x219   : > { %1004 = vst.msk [vmem:[#allocation2 + $0x8] sm:$0xff] %vm7151_vm0, %v5744_v1  ;;  %v5165_v55 = vpack.c.bf16 %v709_v52, %v708_v54  ;;  %1003 = vst.msk [vmem:[#allocation2] sm:$0xff] %vm7151_vm0, %v5744_v1 }
 0x21a   : > { %697 = vst.msk [vmem:[#allocation2 + $0x30] sm:$0xff] %vm7152_vm6, %v692_v53 }
 0x21b   : > { %v702_v56 = vpop.permute.xlu1 %701  ;;  %5166 = vmatprep.subr.bf16.mxu1 %v5165_v55  ;;  %v713_v57 = vld [vmem:[#allocation2 + $0x28] sm:$0xff] }
 0x21c   : > { %707 = vst.msk [vmem:[#allocation2 + $0x48] sm:$0xff] %vm705_vm9, %v702_v56  ;;  %5168 = vmatpush3.bf16.msra.mxu1 %v5165_v55  ;;  %v700_v58 = vpop.permute.xlu0 %699  ;;  %v712_v59 = vld [vmem:[#allocation2 + $0x20] sm:$0xff] }
 0x21d   : > { %1008 = vst.msk [vmem:[#allocation2 + $0x28] sm:$0xff] %vm7151_vm0, %v5744_v1  ;;  %5170 = vmatprep.subr.bf16.mxu1 %v5169_v44  ;;  %1007 = vst.msk [vmem:[#allocation2 + $0x20] sm:$0xff] %vm7151_vm0, %v5744_v1  ;;  %v5173_v60 = vpack.c.bf16 %v713_v57, %v712_v59 }
 0x21e   : > { %706 = vst.msk [vmem:[#allocation2 + $0x40] sm:$0xff] %vm705_vm9, %v700_v58 }
 0x21f   : > { %v715_v61 = vld [vmem:[#allocation2 + $0x38] sm:$0xff] }
 0x220   : > { %5172 = vmatpush3.bf16.msra.mxu1 %v5169_v44  ;;  %1010 = vst.msk [vmem:[#allocation2 + $0x38] sm:$0xff] %vm7151_vm0, %v5744_v1 }
 0x221   : > { %v714_v62 = vld [vmem:[#allocation2 + $0x30] sm:$0xff]  ;;  %5174 = vmatprep.subr.bf16.mxu1 %v5173_v60  ;;  %1251 = vst.msk [vmem:[#allocation2 + $0x38] sm:$0xff] %vm7151_vm0, %v5744_v1 }
 0x222   : > { %1009 = vst.msk [vmem:[#allocation2 + $0x30] sm:$0xff] %vm7151_vm0, %v5744_v1  ;;  %v5177_v63 = vpack.c.bf16 %v715_v61, %v714_v62 }
 0x223   : > { %1250 = vst.msk [vmem:[#allocation2 + $0x30] sm:$0xff] %vm7151_vm0, %v5744_v1  ;;  %v717_v3 = vld [vmem:[#allocation2 + $0x48] sm:$0xff] }
 0x224   : > { %5176 = vmatpush3.bf16.msra.mxu1 %v5173_v60  ;;  %1012 = vst.msk [vmem:[#allocation2 + $0x48] sm:$0xff] %vm7151_vm0, %v5744_v1 }
 0x225   : > { %v716_v4 = vld [vmem:[#allocation2 + $0x40] sm:$0xff]  ;;  %5178 = vmatprep.subr.bf16.mxu1 %v5177_v63  ;;  %1253 = vst.msk [vmem:[#allocation2 + $0x48] sm:$0xff] %vm7151_vm0, %v5744_v1 }
 0x226   : > { %1011 = vst.msk [vmem:[#allocation2 + $0x40] sm:$0xff] %vm7151_vm0, %v5744_v1  ;;  %v5181_v5 = vpack.c.bf16 %v717_v3, %v716_v4 }
 0x227   : > { %1252 = vst.msk [vmem:[#allocation2 + $0x40] sm:$0xff] %vm7151_vm0, %v5744_v1  ;;  %vm872_vm0 = vcmask 1043456  }
 0x228   : > { %5180 = vmatpush3.bf16.msra.mxu1 %v5177_v63 }
 0x229   : > { %5182 = vmatprep.subr.bf16.mxu1 %v5181_v5 }
 0x22c   : > { %5184 = vmatpush3.bf16.msra.mxu1 %v5181_v5  ;;  %v724_v30 = vpop.permute.xlu1 %723 }
 0x22d   : > { %v720_v31 = vpop.permute.xlu0 %719 }
 0x22f   : > { %4874 = vmatmul.mubr.msk.f32.vlgmr.msra.gmra.mrb[0].mxu1 %vm726_vm7, %v644_v6  ;;  %vm6186_vm7 = vmor %vm835_vm2, %vm844_vm4  ;;  %vm848_vm2 = vcmp.eq.s32.totalorder %v828_v21, %v841_v13  ;;  %vm840_vm4 = vcmp.eq.s32.totalorder %v829_v22, %v832_v11 }
 0x230   : > { %v7160_v17 = vsel %vm6186_vm7, 4294967295, %v7159_v17  ;;  %vm5189_vm9 = vmpackc.low %vm853_vm8, %vm6186_vm7 }
 0x231   : > { %5190 = vmatprep.subr.msk.bf16.mxu0 %vm5189_vm9, %v5753_v0  ;;  %vm5193_vm8 = vmpackc.low %vm855_vm3, %vm854_vm14  ;;  %v967_v59 = vpop.permute.xlu1 %966  ;;  %vm7169_vm3 = vnez %v7158_v16 }
 0x232   : > { %5192 = vmatpush3.bf16.msk.msra.mxu0 %vm5189_vm9, %v5753_v0  ;;  %vm856_vm6 = vmor %vm839_vm15, %vm848_vm2  ;;  %v971_v61 = vpop.permute.xlu0 %970  ;;  %vm7163_vm9 = vcmask 523264  }
 0x233   : > { %5194 = vmatprep.subr.msk.bf16.mxu0 %vm5193_vm8, %v5753_v0  ;;  %vm857_vm7 = vmor %vm840_vm4, %vm849_vm5 }
 0x234   : > { %v865_v2 = vsel %vm857_vm7, 0.5, %v5744_v1  ;;  %vm5198_vm1 = vmpackc.low %vm872_vm0, %vm856_vm6  ;;  %vm7161_vm0 = vcmask 490496   ;;  %vm1074_vm7 = vcmask 392192  }
 0x235   : > { %v5197_v25 = vpack.c.bf16 %v865_v2, %v5754_v23  ;;  %vm7162_vm6 = vmmov %vm7161_vm0  ;;  %v999_v2 = vld [vmem:[%s7141_s4] sm:$0xff] }
 0x236   : > { %5196 = vmatpush3.bf16.msk.msra.mxu0 %vm5193_vm8, %v5753_v0  ;;  %v977_v60 = vpop.permute.xlu1 %976  ;;  %vm7164_vm10 = vmmov %vm7163_vm9 }
 0x237   : > { %5199 = vmatprep.subr.msk.bf16.mxu0 %vm5198_vm1, %v5197_v25  ;;  %vm7165_vm13 = vmmov %vm7163_vm9 }
 0x238   : > { %vm7166_vm14 = vmmov %vm7163_vm9 }
 0x239   : > { %vm7167_vm15 = vmmov %vm7163_vm9 }
 0x23a   : > { %5202 = vmatpush3.bf16.msk.msra.mxu0 %vm5198_vm1, %v5197_v25  ;;  %v981_v5 = vpop.permute.xlu1 %980  ;;  %vm1038_vm1 = vcmask 244736   ;;  %vm7168_vm2 = vmmov %vm7163_vm9 }
 0x23b   : > { %vm7170_vm4 = vmmov %vm7168_vm2 }
 0x23c   : > { %vm7171_vm5 = vmmov %vm7168_vm2 }
 0x23d   : > { %vm7172_vm8 = vmmov %vm7168_vm2 }
 0x302   : > { %v4875_v32 = vpop.f32.mrb[0].mxu1 }
 0x303   : > { %v805_v33 = vadd.f32 %v4875_v32, %v724_v30  ;;  %v799_v34 = vpop.f32.mrb[1].mxu1  ;;  %v6231_v30 = vld [vmem:[%s7145_s8 + $0x10] sm:$0xff] }
 0x304   : > { %v800_v35 = vadd.f32 %v799_v34, %v720_v31  ;;  %v6238_v31 = vld [vmem:[%s7145_s8 + $0x18] sm:$0xff] }
 0x305   : > { %v809_v36 = vmax.f32 %v805_v33, 1e-06 }
 0x306   : > { %v808_v37 = vmax.f32 %v800_v35, 1e-06 }
 0x307   : > { %5526 = vlog2.f32 %v809_v36 }
 0x308   : > { %5528 = vlog2.f32 %v808_v37 }
 0x311   : > { %v5527_v38 = vpop.eup %5526 }
 0x312   : > { %v5529_v39 = vpop.eup %5528  ;;  %v813_v40 = vmul.f32 0.6931472, %v5527_v38 }
 0x313   : > { %v811_v41 = vmul.f32 0.6931472, %v5529_v39 }
 0x314   : > { %v816_v42 = vmul.f32 %v814_v26, %v813_v40 }
 0x315   : > { %v815_v43 = vmul.f32 %v814_v26, %v811_v41 }
 0x316   : > { %v819_v44 = vmul.f32 1.442695, %v816_v42  ;;  %v1000_v42 = vld [vmem:[%s7141_s4 + $0x8] sm:$0xff] }
 0x317   : > { %v817_v45 = vmul.f32 1.442695, %v815_v43  ;;  %v1001_v43 = vld [vmem:[%s7141_s4 + $0x10] sm:$0xff] }
 0x319   : > { %5530 = vpow2.f32 %v817_v45 }
 0x31a   : > { %5532 = vpow2.f32 %v819_v44  ;;  %v1002_v44 = vld [vmem:[%s7141_s4 + $0x18] sm:$0xff] }
 0x323   : > { %v5531_v46 = vpop.eup %5530 }
 0x324   : > { %v5533_v47 = vpop.eup %5532  ;;  %4892 = vmatprep.mubr.msk.f32.mxu0 %vm7161_vm0, %v5531_v46  ;;  %vm7173_vm0 = vmmov %vm7168_vm2 }
 0x325   : > { %4893 = vmatmul.mubr.msk.f32.vlgmr.msra.gmra.mrb[2].mxu0 %vm7162_vm6, %v5533_v47  ;;  %vm1336_vm6 = vcmask 785408  }
 0x326   : > { %4907 = vmatprep.mubr.msk.f32.mxu0 %vm1074_vm7, %v999_v2 }
 0x3f8   : > { %v4894_v48 = vpop.f32.mrb[2].mxu0 }
 0x3f9   : > { %5534 = vlog2.f32 %v4894_v48  ;;  %v942_v49 = vpop.f32.mrb[3].mxu0 }
 0x3fa   : > { %5536 = vlog2.f32 %v942_v49 }
 0x403   : > { %v5535_v50 = vpop.eup %5534 }
 0x404   : > { %v5537_v52 = vpop.eup %5536  ;;  %v954_v53 = vmul.f32 0.6931472, %v5535_v50 }
 0x405   : > { %v952_v54 = vmul.f32 0.6931472, %v5537_v52 }
 0x406   : > { %v960_v55 = vmul.f32 %v958_v51, %v954_v53 }
 0x407   : > { %v959_v56 = vmul.f32 %v958_v51, %v952_v54 }
 0x408   : > { %v963_v57 = vmul.f32 1.442695, %v960_v55 }
 0x409   : > { %v961_v58 = vmul.f32 1.442695, %v959_v56 }
 0x40a   : > { %5538 = vpow2.f32 %v963_v57 }
 0x40b   : > { %5540 = vpow2.f32 %v961_v58 }
 0x414   : > { %v5539_v62 = vpop.eup %5538 }
 0x415   : > { %v5541_v63 = vpop.eup %5540  ;;  %v974_v3 = vmul.f32 %v5539_v62, %v971_v61 }
 0x416   : > { %v973_v4 = vmul.f32 %v5541_v63, %v967_v59 }
 0x417   : > { %v984_v6 = vadd.f32 %v981_v5, %v974_v3 }
 0x418   : > { %v983_v10 = vadd.f32 %v977_v60, %v973_v4 }
 0x419   : > { %v4525_v11 = vmul.f32 -1.442695, %v984_v6 }
 0x41a   : > { %v4524_v12 = vmul.f32 -1.442695, %v983_v10 }
 0x41b   : > { %5542 = vpow2.f32 %v4525_v11 }
 0x41c   : > { %5544 = vpow2.f32 %v4524_v12 }
 0x425   : > { %v5543_v13 = vpop.eup %5542 }
 0x426   : > { %v5545_v14 = vpop.eup %5544  ;;  %v992_v15 = vadd.f32 1.0, %v5543_v13 }
 0x427   : > { %v991_v18 = vadd.f32 1.0, %v5545_v14 }
 0x428   : > { %5546 = vrcp.f32 %v992_v15 }
 0x429   : > { %5548 = vrcp.f32 %v991_v18 }
 0x432   : > { %v5547_v19 = vpop.eup %5546 }
 0x433   : > { %v5549_v20 = vpop.eup %5548  ;;  %v998_v21 = vmul.f32 %v5547_v19, %v984_v6 }
 0x434   : > { %v997_v22 = vmul.f32 %v5549_v20, %v983_v10 }
 0x435   : > { %1031 = vrot.lane.b32.xlu1 %v998_v21, %s5746_s22  ;;  %1040 = vst.msk [vmem:[#allocation2 + $0x18] sm:$0xff] %vm1038_vm1, %v998_v21 }
 0x436   : > { %1039 = vst.msk [vmem:[#allocation2 + $0x10] sm:$0xff] %vm1038_vm1, %v997_v22  ;;  %1029 = vrot.lane.b32.xlu0 %v997_v22, %s5746_s22 }
 0x439   : > { %1043 = vrot.lane.b32.xlu1 %v998_v21, %s5749_s24 }
 0x43a   : > { %1041 = vrot.lane.b32.xlu0 %v997_v22, %s5749_s24 }
 0x43c   : > { %v1053_v23 = vld [vmem:[#allocation2 + $0x18] sm:$0xff] }
 0x43d   : > { %v1052_v25 = vld [vmem:[#allocation2 + $0x10] sm:$0xff]  ;;  %1247 = vst.msk [vmem:[#allocation2 + $0x18] sm:$0xff] %vm7163_vm9, %v5744_v1  ;;  %1061 = vperm.xlu1 %5468, %v6097_v8   ;;  %vm7175_vm9 = vmmov %vm7173_vm0 }
 0x43e   : > { %v5207_v26 = vpack.c.bf16 %v1053_v23, %v1052_v25  ;;  %1246 = vst.msk [vmem:[#allocation2 + $0x10] sm:$0xff] %vm7164_vm10, %v5744_v1  ;;  %1057 = vperm.xlu0 %5467, %v6102_v9   ;;  %vm7176_vm10 = vmmov %vm7173_vm0 }
 0x441   : > { %5469 = vset.pattern.permute.xlu1 %v5758_v28 }
 0x442   : > { %5471 = vset.pattern.permute.xlu0 %v5759_v29  ;;  %1173 = vperm.xlu1 %5469, %v6102_v9  }
 0x443   : > { %1193 = vperm.xlu0 %5471, %v6102_v9  }
 0x446   : > { %5470 = vset.pattern.permute.xlu1 %v5757_v27 }
 0x447   : > { %5472 = vset.pattern.permute.xlu0 %v5758_v28  ;;  %1066 = vperm.xlu1 %5470, %v6231_v30  }
 0x448   : > { %1177 = vperm.xlu0 %5472, %v6097_v8  }
 0x44b   : > { %1071 = vperm.xlu1 %5470, %v6238_v31  }
 0x44c   : > { %1185 = vperm.xlu0 %5472, %v6238_v31  }
 0x44f   : > { %5473 = vset.pattern.permute.xlu1 %v5759_v29 }
 0x450   : > { %1197 = vperm.xlu1 %5473, %v6097_v8  }
 0x454   : > { %5474 = vset.pattern.permute.xlu1 %v5758_v28 }
 0x455   : > { %1181 = vperm.xlu1 %5474, %v6231_v30  }
 0x459   : > { %5475 = vset.pattern.permute.xlu1 %v5759_v29 }
 0x45a   : > { %1201 = vperm.xlu1 %5475, %v6231_v30  }
 0x45e   : > { %1205 = vperm.xlu1 %5475, %v6238_v31  }
 0x4a7   : > { %v1032_v32 = vpop.permute.xlu1 %1031 }
 0x4a8   : > { %1037 = vst.msk [vmem:[#allocation2 + $0x8] sm:$0xff] %vm1035_vm11, %v1032_v32  ;;  %v1030_v33 = vpop.permute.xlu0 %1029 }
 0x4a9   : > { %1036 = vst.msk [vmem:[#allocation2] sm:$0xff] %vm1035_vm11, %v1030_v33 }
 0x4ab   : > { %v1044_v34 = vpop.permute.xlu1 %1043 }
 0x4ac   : > { %1049 = vst.msk [vmem:[#allocation2 + $0x28] sm:$0xff] %vm1047_vm12, %v1044_v34  ;;  %v1042_v35 = vpop.permute.xlu0 %1041 }
 0x4ad   : > { %1048 = vst.msk [vmem:[#allocation2 + $0x20] sm:$0xff] %vm1047_vm12, %v1042_v35 }
 0x4af   : > { %v1051_v36 = vld [vmem:[#allocation2 + $0x8] sm:$0xff] }
 0x4b0   : > { %v1050_v37 = vld [vmem:[#allocation2] sm:$0xff]  ;;  %1245 = vst.msk [vmem:[#allocation2 + $0x8] sm:$0xff] %vm7165_vm13, %v5744_v1  ;;  %vm7178_vm13 = vmmov %vm7173_vm0 }
 0x4b1   : > { %v5203_v38 = vpack.c.bf16 %v1051_v36, %v1050_v37  ;;  %1244 = vst.msk [vmem:[#allocation2] sm:$0xff] %vm7166_vm14, %v5744_v1  ;;  %vm7179_vm14 = vmmov %vm7173_vm0 }
 0x4b3   : > { %5204 = vmatprep.subr.bf16.mxu0 %v5203_v38  ;;  %v1055_v39 = vld [vmem:[#allocation2 + $0x28] sm:$0xff] }
 0x4b4   : > { %5206 = vmatpush3.bf16.msra.mxu0 %v5203_v38  ;;  %v1054_v40 = vld [vmem:[#allocation2 + $0x20] sm:$0xff]  ;;  %1249 = vst.msk [vmem:[#allocation2 + $0x28] sm:$0xff] %vm7167_vm15, %v5744_v1  ;;  %vm7181_vm15 = vmmov %vm7173_vm0 }
 0x4b5   : > { %5208 = vmatprep.subr.bf16.mxu0 %v5207_v26  ;;  %1248 = vst.msk [vmem:[#allocation2 + $0x20] sm:$0xff] %vm7168_vm2, %v5744_v1  ;;  %v5211_v41 = vpack.c.bf16 %v1055_v39, %v1054_v40  ;;  %vm1471_vm2 = vcmask 1045504  }
 0x4b8   : > { %5210 = vmatpush3.bf16.msra.mxu0 %v5207_v26 }
 0x4b9   : > { %5212 = vmatprep.subr.bf16.mxu0 %v5211_v41 }
 0x4bc   : > { %5214 = vmatpush3.bf16.msra.mxu0 %v5211_v41  ;;  %v1062_v45 = vpop.permute.xlu1 %1061 }
 0x4bd   : > { %5240 = vmatprep.subr.msk.bf16.mxu0 %vm7169_vm3, %v5753_v0  ;;  %v1058_v49 = vpop.permute.xlu0 %1057 }
 0x4bf   : > { %4908 = vmatmul.mubr.msk.f32.vlgmr.msra.gmra.mrb[4].mxu0 %vm1074_vm7, %v1000_v42 }
 0x4c0   : > { %4910 = vmatprep.mubr.msk.f32.mxu0 %vm1074_vm7, %v1001_v43  ;;  %5242 = vmatpush3.bf16.msk.msra.mxu0 %vm7169_vm3, %v5753_v0  ;;  %v1240_v43 = vld [vmem:[%s7142_s5] sm:$0xff]  ;;  %vm7182_vm3 = vnez %v7160_v17 }
 0x4c1   : > { %v1174_v46 = vpop.permute.xlu1 %1173  ;;  %4937 = vmatprep.mubr.msk.f32.mxu1 %vm1336_vm6, %v1240_v43 }
 0x4c2   : > { %v1194_v51 = vpop.permute.xlu0 %1193 }
 0x4c3   : > { %4911 = vmatmul.mubr.msk.f32.gmra.mrb[6].mxu0 %vm1074_vm7, %v1002_v44  ;;  %v5760_v44 = vmov 9   ;;  %vm7174_vm7 = vmmov %vm7173_vm0 }
 0x4c4   : > { %5476 = vset.pattern.permute.xlu0 %v5760_v44  ;;  %5477 = vset.pattern.permute.xlu1 %v5760_v44 }
 0x4c6   : > { %v1067_v47 = vpop.permute.xlu1 %1066 }
 0x4c7   : > { %v1178_v53 = vpop.permute.xlu0 %1177 }
 0x4ca   : > { %v1072_v48 = vpop.permute.xlu1 %1071 }
 0x4cb   : > { %v1186_v3 = vpop.permute.xlu0 %1185 }
 0x4cf   : > { %v1198_v50 = vpop.permute.xlu1 %1197 }
 0x4d4   : > { %v1182_v52 = vpop.permute.xlu1 %1181 }
 0x4d9   : > { %v1202_v57 = vpop.permute.xlu1 %1201 }
 0x4dd   : > { %v1206_v11 = vpop.permute.xlu1 %1205 }
 0x592   : > { %v4909_v54 = vpop.f32.mrb[4].mxu0 }
 0x593   : > { %v1159_v55 = vadd.f32 %v4909_v54, %v1062_v45  ;;  %v1153_v56 = vpop.f32.mrb[5].mxu0 }
 0x594   : > { %v1154_v58 = vadd.f32 %v1153_v56, %v1058_v49 }
 0x595   : > { %v1189_v59 = vmul.f32 %v1178_v53, %v1159_v55 }
 0x596   : > { %v1188_v60 = vmul.f32 %v1174_v46, %v1154_v58  ;;  %v4912_v16 = vpop.f32.mrb[6].mxu0 }
 0x597   : > { %v1209_v0 = vadd.f32 %v1198_v50, %v1189_v59  ;;  %v1169_v61 = vadd.f32 %v4912_v16, %v1072_v48  ;;  %v1163_v62 = vpop.f32.mrb[7].mxu0 }
 0x598   : > { %v1208_v63 = vadd.f32 %v1194_v51, %v1188_v60  ;;  %v1164_v4 = vadd.f32 %v1163_v62, %v1067_v47 }
 0x599   : > { %v4531_v5 = vmul.f32 -1.442695, %v1209_v0  ;;  %v1191_v6 = vmul.f32 %v1186_v3, %v1169_v61  ;;  %v1242_v3 = vld [vmem:[%s7142_s5 + $0x10] sm:$0xff] }
 0x59a   : > { %v4530_v10 = vmul.f32 -1.442695, %v1208_v63  ;;  %v1190_v12 = vmul.f32 %v1182_v52, %v1164_v4  ;;  %v1243_v4 = vld [vmem:[%s7142_s5 + $0x18] sm:$0xff] }
 0x59b   : > { %5550 = vpow2.f32 %v4531_v5  ;;  %v1211_v13 = vadd.f32 %v1206_v11, %v1191_v6  ;;  %v1446_v5 = vstv %s4506_s18  ;;  %v5761_v6 = vmov 10  }
 0x59c   : > { %5552 = vpow2.f32 %v4530_v10  ;;  %v1210_v14 = vadd.f32 %v1202_v57, %v1190_v12  ;;  %v5762_v10 = vmov 11  }
 0x59d   : > { %v4533_v15 = vmul.f32 -1.442695, %v1211_v13 }
 0x59e   : > { %v4532_v18 = vmul.f32 -1.442695, %v1210_v14 }
 0x59f   : > { %5554 = vpow2.f32 %v4533_v15 }
 0x5a0   : > { %5556 = vpow2.f32 %v4532_v18 }
 0x5a5   : > { %v5551_v19 = vpop.eup %5550 }
 0x5a6   : > { %v5553_v20 = vpop.eup %5552  ;;  %v1225_v21 = vadd.f32 1.0, %v5551_v19 }
 0x5a7   : > { %v1224_v22 = vadd.f32 1.0, %v5553_v20 }
 0x5a8   : > { %5558 = vrcp.f32 %v1225_v21 }
 0x5a9   : > { %v5555_v23 = vpop.eup %5554  ;;  %5560 = vrcp.f32 %v1224_v22 }
 0x5aa   : > { %v5557_v2 = vpop.eup %5556  ;;  %v1227_v25 = vadd.f32 1.0, %v5555_v23 }
 0x5ab   : > { %v1226_v26 = vadd.f32 1.0, %v5557_v2 }
 0x5ac   : > { %5562 = vrcp.f32 %v1227_v25 }
 0x5ad   : > { %5564 = vrcp.f32 %v1226_v26 }
 0x5ae   : > { %5566 = vrcp.f32 %v1446_v5 }
 0x5b2   : > { %v5559_v27 = vpop.eup %5558 }
 0x5b3   : > { %v5561_v28 = vpop.eup %5560  ;;  %v1237_v29 = vmul.f32 %v5559_v27, %v1209_v0 }
 0x5b4   : > { %v1236_v32 = vmul.f32 %v5561_v28, %v1208_v63  ;;  %v1241_v63 = vld [vmem:[%s7142_s5 + $0x8] sm:$0xff] }
 0x5b5   : > { %1274 = vrot.lane.b32.xlu1 %v1237_v29, %s5746_s22  ;;  %1289 = vst.msk [vmem:[#allocation2 + $0x28] sm:$0xff] %vm1038_vm1, %v1237_v29 }
 0x5b6   : > { %v5563_v33 = vpop.eup %5562  ;;  %1272 = vrot.lane.b32.xlu0 %v1236_v32, %s5746_s22  ;;  %1288 = vst.msk [vmem:[#allocation2 + $0x20] sm:$0xff] %vm1038_vm1, %v1236_v32 }
 0x5b7   : > { %v5565_v34 = vpop.eup %5564  ;;  %v1239_v35 = vmul.f32 %v5563_v33, %v1211_v13 }
 0x5b8   : > { %v1238_v36 = vmul.f32 %v5565_v34, %v1210_v14  ;;  %v5567_v17 = vpop.eup %5566 }
 0x5b9   : > { %1291 = vst.msk [vmem:[#allocation2 + $0x38] sm:$0xff] %vm1038_vm1, %v1239_v35  ;;  %1278 = vrot.lane.b32.xlu1 %v1239_v35, %s5746_s22 }
 0x5ba   : > { %1290 = vst.msk [vmem:[#allocation2 + $0x30] sm:$0xff] %vm1038_vm1, %v1238_v36  ;;  %1276 = vrot.lane.b32.xlu0 %v1238_v36, %s5746_s22 }
 0x5bb   : > { %5407 = vpush %v5567_v17 }
 0x5bc   : > { %v1313_v37 = vld [vmem:[#allocation2 + $0x28] sm:$0xff] }
 0x5bd   : > { %1294 = vrot.lane.b32.xlu1 %v1237_v29, %s5749_s24  ;;  %v1312_v38 = vld [vmem:[#allocation2 + $0x20] sm:$0xff]  ;;  %1665 = vst.msk [vmem:[#allocation2 + $0x28] sm:$0xff] %vm7170_vm4, %v5744_v1  ;;  %vm5244_vm4 = vmpackc.low %vm1471_vm2, %vm7182_vm3 }
 0x5be   : > { %1292 = vrot.lane.b32.xlu0 %v1236_v32, %s5749_s24  ;;  %v5223_v39 = vpack.c.bf16 %v1313_v37, %v1312_v38  ;;  %1664 = vst.msk [vmem:[#allocation2 + $0x20] sm:$0xff] %vm7171_vm5, %v5744_v1  ;;  %5245 = vmatprep.subr.msk.bf16.mxu0 %vm5244_vm4, %v6198_v24  ;;  %vm7183_vm5 = vmmov %vm7173_vm0 }
 0x5bf   : > { %5248 = vmatpush3.bf16.msk.msra.mxu0 %vm5244_vm4, %v6198_v24  ;;  %vm7191_vm2 = vmmov %vm7173_vm0 }
 0x5c0   : > { %v1315_v40 = vld [vmem:[#allocation2 + $0x38] sm:$0xff]  ;;  %vm7192_vm3 = vmmov %vm7173_vm0 }
 0x5c1   : > { %1298 = vrot.lane.b32.xlu1 %v1239_v35, %s5749_s24  ;;  %v1314_v41 = vld [vmem:[#allocation2 + $0x30] sm:$0xff]  ;;  %1667 = vst.msk [vmem:[#allocation2 + $0x38] sm:$0xff] %vm7172_vm8, %v5744_v1  ;;  %vm7184_vm8 = vmmov %vm7173_vm0 }
 0x5c2   : > { %1296 = vrot.lane.b32.xlu0 %v1238_v36, %s5749_s24  ;;  %v5227_v42 = vpack.c.bf16 %v1315_v40, %v1314_v41  ;;  %1666 = vst.msk [vmem:[#allocation2 + $0x30] sm:$0xff] %vm7173_vm0, %v5744_v1  ;;  %vm7193_vm4 = vmmov %vm7173_vm0 }
 0x5c5   : > { %1325 = vperm.xlu1 %5477, %v6097_v8  }
 0x5c6   : > { %1321 = vperm.xlu0 %5476, %v6102_v9  }
 0x5c9   : > { %1329 = vperm.xlu1 %5477, %v6231_v30  }
 0x5ca   : > { %1333 = vperm.xlu0 %5476, %v6238_v31  }
 0x5cd   : > { %5478 = vset.pattern.permute.xlu1 %v5761_v6 }
 0x5ce   : > { %5479 = vset.pattern.permute.xlu0 %v5761_v6  ;;  %1585 = vperm.xlu1 %5478, %v6102_v9  }
 0x5cf   : > { %1589 = vperm.xlu0 %5479, %v6097_v8  }
 0x5d2   : > { %5480 = vset.pattern.permute.xlu1 %v5762_v10 }
 0x5d3   : > { %1593 = vperm.xlu0 %5479, %v6231_v30   ;;  %1605 = vperm.xlu1 %5480, %v6102_v9  }
 0x5d7   : > { %5482 = vset.pattern.permute.xlu0 %v5762_v10  ;;  %1609 = vperm.xlu1 %5480, %v6097_v8  }
 0x5d8   : > { %1613 = vperm.xlu0 %5482, %v6231_v30  }
 0x5db   : > { %5481 = vset.pattern.permute.xlu1 %v5761_v6 }
 0x5dc   : > { %1597 = vperm.xlu1 %5481, %v6238_v31  }
 0x5e0   : > { %5483 = vset.pattern.permute.xlu1 %v5762_v10 }
 0x5e1   : > { %1617 = vperm.xlu1 %5483, %v6238_v31  }
 0x5ec   : > { %s5408_s19 = spop %5407 }
 0x627   : > { %v1275_v45 = vpop.permute.xlu1 %1274 }
 0x628   : > { %1285 = vst.msk [vmem:[#allocation2 + $0x8] sm:$0xff] %vm1035_vm11, %v1275_v45  ;;  %v1273_v46 = vpop.permute.xlu0 %1272 }
 0x629   : > { %1284 = vst.msk [vmem:[#allocation2] sm:$0xff] %vm1035_vm11, %v1273_v46 }
 0x62b   : > { %v1279_v47 = vpop.permute.xlu1 %1278 }
 0x62c   : > { %1287 = vst.msk [vmem:[#allocation2 + $0x18] sm:$0xff] %vm1035_vm11, %v1279_v47  ;;  %v1277_v48 = vpop.permute.xlu0 %1276 }
 0x62d   : > { %1286 = vst.msk [vmem:[#allocation2 + $0x10] sm:$0xff] %vm1035_vm11, %v1277_v48  ;;  %vm7177_vm11 = vmmov %vm7173_vm0 }
 0x62f   : > { %v1295_v49 = vpop.permute.xlu1 %1294  ;;  %v1309_v50 = vld [vmem:[#allocation2 + $0x8] sm:$0xff] }
 0x630   : > { %1305 = vst.msk [vmem:[#allocation2 + $0x48] sm:$0xff] %vm1047_vm12, %v1295_v49  ;;  %v1293_v51 = vpop.permute.xlu0 %1292  ;;  %v1308_v52 = vld [vmem:[#allocation2] sm:$0xff] }
 0x631   : > { %1661 = vst.msk [vmem:[#allocation2 + $0x8] sm:$0xff] %vm7174_vm7, %v5744_v1  ;;  %v5215_v53 = vpack.c.bf16 %v1309_v50, %v1308_v52  ;;  %vm7185_vm7 = vmmov %vm7173_vm0 }
 0x632   : > { %1304 = vst.msk [vmem:[#allocation2 + $0x40] sm:$0xff] %vm1047_vm12, %v1293_v51 }
 0x633   : > { %1660 = vst.msk [vmem:[#allocation2] sm:$0xff] %vm7175_vm9, %v5744_v1  ;;  %v1299_v54 = vpop.permute.xlu1 %1298  ;;  %5216 = vmatprep.subr.bf16.mxu1 %v5215_v53  ;;  %v1311_v55 = vld [vmem:[#allocation2 + $0x18] sm:$0xff]  ;;  %vm1700_vm9 = vcmask 121864  }
 0x634   : > { %1307 = vst.msk [vmem:[#allocation2 + $0x58] sm:$0xff] %vm1047_vm12, %v1299_v54  ;;  %5218 = vmatpush3.bf16.msra.mxu1 %v5215_v53  ;;  %v1297_v56 = vpop.permute.xlu0 %1296  ;;  %v1310_v57 = vld [vmem:[#allocation2 + $0x10] sm:$0xff]  ;;  %v1571_v54 = vstv %s5408_s19 }
 0x635   : > { %1663 = vst.msk [vmem:[#allocation2 + $0x18] sm:$0xff] %vm7176_vm10, %v5744_v1  ;;  %v5219_v58 = vpack.c.bf16 %v1311_v55, %v1310_v57  ;;  %vm1722_vm10 = vcmask 113664  }
 0x636   : > { %1306 = vst.msk [vmem:[#allocation2 + $0x50] sm:$0xff] %vm1047_vm12, %v1297_v56  ;;  %vm7180_vm12 = vmmov %vm7173_vm0 }
 0x637   : > { %1662 = vst.msk [vmem:[#allocation2 + $0x10] sm:$0xff] %vm7177_vm11, %v5744_v1  ;;  %5220 = vmatprep.subr.bf16.mxu1 %v5219_v58  ;;  %v1317_v59 = vld [vmem:[#allocation2 + $0x48] sm:$0xff]  ;;  %vm7186_vm11 = vmmov %vm7173_vm0 }
 0x638   : > { %5222 = vmatpush3.bf16.msra.mxu1 %v5219_v58  ;;  %1669 = vst.msk [vmem:[#allocation2 + $0x48] sm:$0xff] %vm7178_vm13, %v5744_v1  ;;  %vm7187_vm13 = vmmov %vm7173_vm0 }
 0x639   : > { %v1316_v60 = vld [vmem:[#allocation2 + $0x40] sm:$0xff]  ;;  %5224 = vmatprep.subr.bf16.mxu1 %v5223_v39 }
 0x63a   : > { %1668 = vst.msk [vmem:[#allocation2 + $0x40] sm:$0xff] %vm7179_vm14, %v5744_v1  ;;  %v5231_v61 = vpack.c.bf16 %v1317_v59, %v1316_v60  ;;  %vm7188_vm14 = vmmov %vm7173_vm0 }
 0x63b   : > { %v1319_v16 = vld [vmem:[#allocation2 + $0x58] sm:$0xff] }
 0x63c   : > { %5226 = vmatpush3.bf16.msra.mxu1 %v5223_v39  ;;  %1671 = vst.msk [vmem:[#allocation2 + $0x58] sm:$0xff] %vm7180_vm12, %v5744_v1  ;;  %vm7189_vm12 = vmmov %vm7173_vm0 }
 0x63d   : > { %v1318_v0 = vld [vmem:[#allocation2 + $0x50] sm:$0xff]  ;;  %5228 = vmatprep.subr.bf16.mxu1 %v5227_v42 }
 0x63e   : > { %1670 = vst.msk [vmem:[#allocation2 + $0x50] sm:$0xff] %vm7181_vm15, %v5744_v1  ;;  %v5235_v62 = vpack.c.bf16 %v1319_v16, %v1318_v0  ;;  %vm7190_vm15 = vmmov %vm7173_vm0 }
 0x640   : > { %5230 = vmatpush3.bf16.msra.mxu1 %v5227_v42 }
 0x641   : > { %5232 = vmatprep.subr.bf16.mxu1 %v5231_v61 }
 0x644   : > { %5234 = vmatpush3.bf16.msra.mxu1 %v5231_v61  ;;  %v1326_v11 = vpop.permute.xlu1 %1325 }
 0x645   : > { %5236 = vmatprep.subr.bf16.mxu1 %v5235_v62  ;;  %v1322_v24 = vpop.permute.xlu0 %1321 }
 0x648   : > { %5238 = vmatpush3.bf16.msra.mxu1 %v5235_v62  ;;  %v1330_v8 = vpop.permute.xlu1 %1329 }
 0x649   : > { %v1334_v19 = vpop.permute.xlu0 %1333 }
 0x64b   : > { %4938 = vmatmul.mubr.msk.f32.vlgmr.msra.gmra.mrb[2].mxu1 %vm1336_vm6, %v1241_v63 }
 0x64c   : > { %4940 = vmatprep.mubr.msk.f32.mxu1 %vm1336_vm6, %v1242_v3 }
 0x64d   : > { %v1586_v52 = vpop.permute.xlu1 %1585 }
 0x64f   : > { %4941 = vmatmul.mubr.msk.f32.gmra.mrb[4].mxu1 %vm1336_vm6, %v1243_v4 }
 0x652   : > { %v1606_v62 = vpop.permute.xlu1 %1605 }
 0x656   : > { %v1610_v17 = vpop.permute.xlu1 %1609 }
 0x71e   : > { %v4939_v12 = vpop.f32.mrb[2].mxu1 }
 0x71f   : > { %v1421_v13 = vadd.f32 %v4939_v12, %v1326_v11  ;;  %v1415_v14 = vpop.f32.mrb[3].mxu1  ;;  %v1598_v11 = vpop.permute.xlu1 %1597 }
 0x720   : > { %v1416_v15 = vadd.f32 %v1415_v14, %v1322_v24  ;;  %v1590_v24 = vpop.permute.xlu0 %1589 }
 0x721   : > { %v1435_v9 = vmax.f32 %v1421_v13, 1e-06 }
 0x722   : > { %v1434_v18 = vmax.f32 %v1416_v15, 1e-06  ;;  %v4942_v20 = vpop.f32.mrb[4].mxu1 }
 0x723   : > { %5568 = vlog2.f32 %v1435_v9  ;;  %v1431_v21 = vadd.f32 %v4942_v20, %v1334_v19  ;;  %v1425_v22 = vpop.f32.mrb[5].mxu1 }
 0x724   : > { %5570 = vlog2.f32 %v1434_v18  ;;  %v1426_v23 = vadd.f32 %v1425_v22, %v1330_v8  ;;  %v1594_v15 = vpop.permute.xlu0 %1593  ;;  %v1618_v8 = vpop.permute.xlu1 %1617 }
 0x725   : > { %v1437_v2 = vmax.f32 %v1431_v21, 1e-06 }
 0x726   : > { %v1436_v25 = vmax.f32 %v1426_v23, 1e-06 }
 0x727   : > { %5572 = vlog2.f32 %v1437_v2 }
 0x728   : > { %5574 = vlog2.f32 %v1436_v25  ;;  %v1614_v2 = vpop.permute.xlu0 %1613 }
 0x72d   : > { %v5569_v26 = vpop.eup %5568 }
 0x72e   : > { %v5571_v27 = vpop.eup %5570  ;;  %v1441_v28 = vmul.f32 0.6931472, %v5569_v26 }
 0x72f   : > { %v1439_v29 = vmul.f32 0.6931472, %v5571_v27 }
 0x730   : > { %v1448_v32 = vmul.f32 %v1446_v5, %v1441_v28 }
 0x731   : > { %v5573_v33 = vpop.eup %5572  ;;  %v1447_v34 = vmul.f32 %v1446_v5, %v1439_v29 }
 0x732   : > { %v5575_v35 = vpop.eup %5574  ;;  %v1453_v36 = vmul.f32 1.442695, %v1448_v32  ;;  %v1445_v37 = vmul.f32 0.6931472, %v5573_v33 }
 0x733   : > { %v1451_v38 = vmul.f32 1.442695, %v1447_v34  ;;  %v1443_v39 = vmul.f32 0.6931472, %v5575_v35 }
 0x734   : > { %v1450_v40 = vmul.f32 %v1446_v5, %v1445_v37 }
 0x735   : > { %5576 = vpow2.f32 %v1451_v38  ;;  %v1449_v41 = vmul.f32 %v1446_v5, %v1443_v39 }
 0x736   : > { %5578 = vpow2.f32 %v1453_v36  ;;  %v1457_v42 = vmul.f32 1.442695, %v1450_v40 }
 0x737   : > { %v1455_v43 = vmul.f32 1.442695, %v1449_v41 }
 0x739   : > { %5580 = vpow2.f32 %v1455_v43 }
 0x73a   : > { %5582 = vpow2.f32 %v1457_v42 }
 0x73f   : > { %v5577_v44 = vpop.eup %5576 }
 0x740   : > { %v5579_v45 = vpop.eup %5578  ;;  %4951 = vmatprep.mubr.msk.f32.mxu0 %vm1038_vm1, %v5577_v44 }
 0x741   : > { %4952 = vmatmul.mubr.msk.f32.vlgmr.msra.gmra.mrb[8].mxu0 %vm1038_vm1, %v5579_v45 }
 0x743   : > { %v5581_v46 = vpop.eup %5580 }
 0x744   : > { %v5583_v47 = vpop.eup %5582  ;;  %4954 = vmatprep.mubr.msk.f32.mxu0 %vm1038_vm1, %v5581_v46 }
 0x745   : > { %4955 = vmatmul.mubr.msk.f32.gmra.mrb[10].mxu0 %vm1038_vm1, %v5583_v47  ;;  %vm1705_vm1 = vcmask 121856  }
 0x814   : > { %v4953_v48 = vpop.f32.mrb[8].mxu0 }
 0x815   : > { %5584 = vlog2.f32 %v4953_v48  ;;  %v1541_v49 = vpop.f32.mrb[9].mxu0 }
 0x816   : > { %5586 = vlog2.f32 %v1541_v49 }
 0x818   : > { %v4956_v50 = vpop.f32.mrb[10].mxu0 }
 0x819   : > { %5588 = vlog2.f32 %v4956_v50  ;;  %v1551_v51 = vpop.f32.mrb[11].mxu0 }
 0x81a   : > { %5590 = vlog2.f32 %v1551_v51 }
 0x81f   : > { %v5585_v53 = vpop.eup %5584 }
 0x820   : > { %v5587_v55 = vpop.eup %5586  ;;  %v1563_v56 = vmul.f32 0.6931472, %v5585_v53 }
 0x821   : > { %v1561_v57 = vmul.f32 0.6931472, %v5587_v55  ;;  %v1652_v55 = vld [vmem:[%s7143_s6] sm:$0xff] }
 0x822   : > { %v1573_v58 = vmul.f32 %v1571_v54, %v1563_v56  ;;  %4981 = vmatprep.mubr.msk.f32.mxu0 %vm1336_vm6, %v1652_v55  ;;  %v5763_v56 = vmov 12  }
 0x823   : > { %v5589_v59 = vpop.eup %5588  ;;  %v1572_v60 = vmul.f32 %v1571_v54, %v1561_v57  ;;  %5484 = vset.pattern.permute.xlu1 %v5763_v56  ;;  %5485 = vset.pattern.permute.xlu0 %v5763_v56  ;;  %v6383_v57 = vld [vmem:[%s7145_s8] sm:$0xff] }
 0x824   : > { %v5591_v16 = vpop.eup %5590  ;;  %v1567_v0 = vmul.f32 0.6931472, %v5589_v59  ;;  %v1578_v61 = vmul.f32 1.442695, %v1573_v58  ;;  %v6389_v58 = vld [vmem:[%s7145_s8 + $0x8] sm:$0xff]  ;;  %v5764_v59 = vmov 13  }
 0x825   : > { %v1565_v63 = vmul.f32 0.6931472, %v5591_v16  ;;  %v1576_v3 = vmul.f32 1.442695, %v1572_v60  ;;  %v5765_v60 = vmov 14   ;;  %v6401_v16 = vld [vmem:[%s7145_s8 + $0x20] sm:$0xff] }
 0x826   : > { %v1575_v4 = vmul.f32 %v1571_v54, %v1567_v0  ;;  %5592 = vpow2.f32 %v1578_v61  ;;  %v6410_v0 = vld [vmem:[%s7145_s8 + $0x28] sm:$0xff]  ;;  %v6417_v61 = vld [vmem:[%s7145_s8 + $0x38] sm:$0xff] }
 0x827   : > { %v1574_v5 = vmul.f32 %v1571_v54, %v1565_v63  ;;  %5594 = vpow2.f32 %v1576_v3 }
 0x828   : > { %v1582_v6 = vmul.f32 1.442695, %v1575_v4 }
 0x829   : > { %v1580_v10 = vmul.f32 1.442695, %v1574_v5 }
 0x82a   : > { %5596 = vpow2.f32 %v1582_v6 }
 0x82b   : > { %5598 = vpow2.f32 %v1580_v10 }
 0x830   : > { %v5593_v12 = vpop.eup %5592 }
 0x831   : > { %v5595_v13 = vpop.eup %5594  ;;  %v1601_v14 = vmul.f32 %v5593_v12, %v1590_v24 }
 0x832   : > { %v1600_v9 = vmul.f32 %v5595_v13, %v1586_v52 }
 0x833   : > { %v1621_v18 = vadd.f32 %v1610_v17, %v1601_v14 }
 0x834   : > { %v5597_v19 = vpop.eup %5596  ;;  %v1620_v20 = vadd.f32 %v1606_v62, %v1600_v9 }
 0x835   : > { %v5599_v21 = vpop.eup %5598  ;;  %v4547_v22 = vmul.f32 -1.442695, %v1621_v18  ;;  %v1603_v23 = vmul.f32 %v5597_v19, %v1598_v11 }
 0x836   : > { %v4546_v25 = vmul.f32 -1.442695, %v1620_v20  ;;  %v1602_v26 = vmul.f32 %v5599_v21, %v1594_v15  ;;  %v1653_v21 = vld [vmem:[%s7143_s6 + $0x8] sm:$0xff] }
 0x837   : > { %5600 = vpow2.f32 %v4547_v22  ;;  %v1623_v27 = vadd.f32 %v1618_v8, %v1603_v23  ;;  %v1654_v22 = vld [vmem:[%s7143_s6 + $0x10] sm:$0xff]  ;;  %v1656_v23 = vld [vmem:[%s7143_s6 + $0x20] sm:$0xff] }
 0x838   : > { %5602 = vpow2.f32 %v4546_v25  ;;  %v1622_v28 = vadd.f32 %v1614_v2, %v1602_v26  ;;  %v1657_v2 = vld [vmem:[%s7143_s6 + $0x28] sm:$0xff]  ;;  %v1658_v25 = vld [vmem:[%s7143_s6 + $0x30] sm:$0xff]  ;;  %v1659_v26 = vld [vmem:[%s7143_s6 + $0x38] sm:$0xff] }
 0x839   : > { %v4549_v29 = vmul.f32 -1.442695, %v1623_v27 }
 0x83a   : > { %v4548_v32 = vmul.f32 -1.442695, %v1622_v28 }
 0x83b   : > { %5604 = vpow2.f32 %v4549_v29 }
 0x83c   : > { %5606 = vpow2.f32 %v4548_v32 }
 0x841   : > { %v5601_v33 = vpop.eup %5600 }
 0x842   : > { %v5603_v34 = vpop.eup %5602  ;;  %v1637_v35 = vadd.f32 1.0, %v5601_v33 }
 0x843   : > { %v1636_v36 = vadd.f32 1.0, %v5603_v34 }
 0x844   : > { %5608 = vrcp.f32 %v1637_v35 }
 0x845   : > { %v5605_v37 = vpop.eup %5604  ;;  %5610 = vrcp.f32 %v1636_v36 }
 0x846   : > { %v5607_v38 = vpop.eup %5606  ;;  %v1639_v39 = vadd.f32 1.0, %v5605_v37 }
 0x847   : > { %v1638_v40 = vadd.f32 1.0, %v5607_v38 }
 0x848   : > { %5612 = vrcp.f32 %v1639_v39 }
 0x849   : > { %5614 = vrcp.f32 %v1638_v40 }
 0x84e   : > { %v5609_v41 = vpop.eup %5608 }
 0x84f   : > { %v5611_v42 = vpop.eup %5610  ;;  %v1649_v43 = vmul.f32 %v5609_v41, %v1621_v18 }
 0x850   : > { %v1648_v44 = vmul.f32 %v5611_v42, %v1620_v20 }
 0x851   : > { %1690 = vrot.lane.b32.xlu0 %v1649_v43, %s5746_s22  ;;  %1707 = vst.msk [vmem:[#allocation2 + $0x28] sm:$0xff] %vm1705_vm1, %v1649_v43 }
 0x852   : > { %v5613_v45 = vpop.eup %5612  ;;  %1706 = vst.msk [vmem:[#allocation2 + $0x20] sm:$0xff] %vm1705_vm1, %v1648_v44  ;;  %1688 = vrot.lane.b32.xlu1 %v1648_v44, %s5746_s22 }
 0x853   : > { %v5615_v46 = vpop.eup %5614  ;;  %v1651_v47 = vmul.f32 %v5613_v45, %v1623_v27  ;;  %v5766_v27 = vmov 0.0|0.0  }
 0x854   : > { %v1650_v48 = vmul.f32 %v5615_v46, %v1622_v28  ;;  %5273 = vmatprep.subr.bf16.mxu1 %v5766_v27 }
 0x855   : > { %1709 = vst.msk [vmem:[#allocation2 + $0x38] sm:$0xff] %vm1705_vm1, %v1651_v47  ;;  %1694 = vrot.lane.b32.xlu0 %v1651_v47, %s5746_s22 }
 0x856   : > { %1708 = vst.msk [vmem:[#allocation2 + $0x30] sm:$0xff] %vm1705_vm1, %v1650_v48  ;;  %1692 = vrot.lane.b32.xlu1 %v1650_v48, %s5746_s22  ;;  %vm7194_vm1 = vmmov %vm7173_vm0  ;;  %s5771_s22 = smov 96  }
 0x858   : > { %v1732_v49 = vld [vmem:[#allocation2 + $0x28] sm:$0xff] }
 0x859   : > { %1712 = vrot.lane.b32.xlu0 %v1649_v43, %s5749_s24  ;;  %v1731_v50 = vld [vmem:[#allocation2 + $0x20] sm:$0xff]  ;;  %2061 = vst.msk [vmem:[#allocation2 + $0x28] sm:$0xff] %vm7183_vm5, %v5744_v1  ;;  %vm7195_vm5 = vmmov %vm7173_vm0 }
 0x85a   : > { %1710 = vrot.lane.b32.xlu1 %v1648_v44, %s5749_s24  ;;  %v6364_v51 = vpack.c.bf16 %v1732_v49, %v1731_v50  ;;  %2060 = vst.msk [vmem:[#allocation2 + $0x20] sm:$0xff] %vm7184_vm8, %v5744_v1  ;;  %vm7196_vm8 = vmmov %vm7173_vm0 }
 0x85c   : > { %v1734_v52 = vld [vmem:[#allocation2 + $0x38] sm:$0xff] }
 0x85d   : > { %1716 = vrot.lane.b32.xlu0 %v1651_v47, %s5749_s24  ;;  %v1733_v53 = vld [vmem:[#allocation2 + $0x30] sm:$0xff]  ;;  %2063 = vst.msk [vmem:[#allocation2 + $0x38] sm:$0xff] %vm7173_vm0, %v5744_v1 }
 0x85e   : > { %1714 = vrot.lane.b32.xlu1 %v1650_v48, %s5749_s24  ;;  %v6372_v54 = vpack.c.bf16 %v1734_v52, %v1733_v53  ;;  %2062 = vst.msk [vmem:[#allocation2 + $0x30] sm:$0xff] %vm7185_vm7, %v5744_v1  ;;  %vm7197_vm7 = vmmov %vm7173_vm0 }
 0x861   : > { %1744 = vperm.xlu0 %5485, %v6389_v58  }
 0x862   : > { %1740 = vperm.xlu1 %5484, %v6383_v57  }
 0x865   : > { %1748 = vperm.xlu0 %5485, %v6231_v30  }
 0x866   : > { %5486 = vset.pattern.permute.xlu1 %v5764_v59 }
 0x867   : > { %1905 = vperm.xlu1 %5486, %v6383_v57  }
 0x869   : > { %5488 = vset.pattern.permute.xlu0 %v5765_v60 }
 0x86a   : > { %1945 = vperm.xlu0 %5488, %v6383_v57  }
 0x86b   : > { %1909 = vperm.xlu1 %5486, %v6389_v58  }
 0x86e   : > { %1953 = vperm.xlu0 %5488, %v6231_v30  }
 0x86f   : > { %5487 = vset.pattern.permute.xlu1 %v5763_v56 }
 0x870   : > { %1752 = vperm.xlu1 %5487, %v6238_v31  }
 0x872   : > { %1961 = vperm.xlu0 %5488, %v6401_v16  }
 0x874   : > { %5489 = vset.pattern.permute.xlu1 %v5765_v60 }
 0x875   : > { %1949 = vperm.xlu1 %5489, %v6389_v58  }
 0x876   : > { %5495 = vset.pattern.permute.xlu0 %v5764_v59 }
 0x877   : > { %1917 = vperm.xlu0 %5495, %v6238_v31  }
 0x879   : > { %5490 = vset.pattern.permute.xlu1 %v5764_v59 }
 0x87a   : > { %1913 = vperm.xlu1 %5490, %v6231_v30   ;;  %v6426_v30 = vld [vmem:[%s7145_s8 + $0x30] sm:$0xff] }
 0x87b   : > { %1925 = vperm.xlu0 %5495, %v6410_v0  }
 0x87e   : > { %5491 = vset.pattern.permute.xlu1 %v5763_v56 }
 0x87f   : > { %1757 = vperm.xlu1 %5491, %v6401_v16   ;;  %1933 = vperm.xlu0 %5495, %v6417_v61  }
 0x883   : > { %1762 = vperm.xlu1 %5491, %v6410_v0  }
 0x887   : > { %5492 = vset.pattern.permute.xlu1 %v5765_v60 }
 0x888   : > { %1957 = vperm.xlu1 %5492, %v6238_v31  }
 0x88c   : > { %5493 = vset.pattern.permute.xlu1 %v5764_v59 }
 0x88d   : > { %1921 = vperm.xlu1 %5493, %v6401_v16  }
 0x891   : > { %5494 = vset.pattern.permute.xlu1 %v5763_v56 }
 0x892   : > { %1767 = vperm.xlu1 %5494, %v6426_v30  }
 0x896   : > { %1772 = vperm.xlu1 %5494, %v6417_v61  }
 0x89a   : > { %5496 = vset.pattern.permute.xlu1 %v5765_v60 }
 0x89b   : > { %1965 = vperm.xlu1 %5496, %v6410_v0  }
 0x89f   : > { %5497 = vset.pattern.permute.xlu1 %v5764_v59 }
 0x8a0   : > { %1929 = vperm.xlu1 %5497, %v6426_v30  }
 0x8a4   : > { %5498 = vset.pattern.permute.xlu1 %v5765_v60 }
 0x8a5   : > { %1969 = vperm.xlu1 %5498, %v6426_v30  }
 0x8a9   : > { %1973 = vperm.xlu1 %5498, %v6417_v61  }
 0x8c3   : > { %v1691_v31 = vpop.permute.xlu0 %1690 }
 0x8c4   : > { %1702 = vst.msk [vmem:[#allocation2 + $0x8] sm:$0xff] %vm1700_vm9, %v1691_v31  ;;  %v1689_v62 = vpop.permute.xlu1 %1688 }
 0x8c5   : > { %1701 = vst.msk [vmem:[#allocation2] sm:$0xff] %vm1700_vm9, %v1689_v62 }
 0x8c7   : > { %v1695_v63 = vpop.permute.xlu0 %1694 }
 0x8c8   : > { %1704 = vst.msk [vmem:[#allocation2 + $0x18] sm:$0xff] %vm1700_vm9, %v1695_v63  ;;  %v1693_v3 = vpop.permute.xlu1 %1692 }
 0x8c9   : > { %1703 = vst.msk [vmem:[#allocation2 + $0x10] sm:$0xff] %vm1700_vm9, %v1693_v3  ;;  %vm7198_vm9 = vmmov %vm7173_vm0 }
 0x8cb   : > { %v1713_v4 = vpop.permute.xlu0 %1712  ;;  %v1728_v5 = vld [vmem:[#allocation2 + $0x8] sm:$0xff] }
 0x8cc   : > { %1724 = vst.msk [vmem:[#allocation2 + $0x48] sm:$0xff] %vm1722_vm10, %v1713_v4  ;;  %v1711_v6 = vpop.permute.xlu1 %1710  ;;  %v1727_v10 = vld [vmem:[#allocation2] sm:$0xff] }
 0x8cd   : > { %2057 = vst.msk [vmem:[#allocation2 + $0x8] sm:$0xff] %vm7186_vm11, %v5744_v1  ;;  %v5249_v17 = vpack.c.bf16 %v1728_v5, %v1727_v10  ;;  %vm7200_vm11 = vmmov %vm7173_vm0 }
 0x8ce   : > { %1723 = vst.msk [vmem:[#allocation2 + $0x40] sm:$0xff] %vm1722_vm10, %v1711_v6 }
 0x8cf   : > { %2056 = vst.msk [vmem:[#allocation2] sm:$0xff] %vm7187_vm13, %v5744_v1  ;;  %5250 = vmatprep.subr.bf16.mxu0 %v5249_v17  ;;  %v1717_v24 = vpop.permute.xlu0 %1716  ;;  %v1730_v11 = vld [vmem:[#allocation2 + $0x18] sm:$0xff]  ;;  %vm7201_vm13 = vmmov %vm7173_vm0 }
 0x8d0   : > { %1726 = vst.msk [vmem:[#allocation2 + $0x58] sm:$0xff] %vm1722_vm10, %v1717_v24  ;;  %v1715_v12 = vpop.permute.xlu1 %1714  ;;  %5252 = vmatpush3.bf16.msra.mxu0 %v5249_v17  ;;  %v1729_v13 = vld [vmem:[#allocation2 + $0x10] sm:$0xff] }
 0x8d1   : > { %2059 = vst.msk [vmem:[#allocation2 + $0x18] sm:$0xff] %vm7188_vm14, %v5744_v1  ;;  %v5253_v14 = vpack.c.bf16 %v1730_v11, %v1729_v13  ;;  %vm7202_vm14 = vmmov %vm7173_vm0 }
 0x8d2   : > { %1725 = vst.msk [vmem:[#allocation2 + $0x50] sm:$0xff] %vm1722_vm10, %v1715_v12  ;;  %vm7199_vm10 = vmmov %vm7173_vm0 }
 0x8d3   : > { %2058 = vst.msk [vmem:[#allocation2 + $0x10] sm:$0xff] %vm7189_vm12, %v5744_v1  ;;  %5254 = vmatprep.subr.bf16.mxu0 %v5253_v14  ;;  %v1736_v15 = vld [vmem:[#allocation2 + $0x48] sm:$0xff]  ;;  %vm7203_vm12 = vmmov %vm7173_vm0 }
 0x8d4   : > { %5256 = vmatpush3.bf16.msra.mxu0 %v5253_v14  ;;  %2065 = vst.msk [vmem:[#allocation2 + $0x48] sm:$0xff] %vm7190_vm15, %v5744_v1  ;;  %vm7204_vm15 = vmmov %vm7173_vm0 }
 0x8d5   : > { %v1735_v9 = vld [vmem:[#allocation2 + $0x40] sm:$0xff]  ;;  %5258 = vmatprep.subr.bf16.mxu0 %v6364_v51 }
 0x8d6   : > { %2064 = vst.msk [vmem:[#allocation2 + $0x40] sm:$0xff] %vm7191_vm2, %v5744_v1  ;;  %v5265_v20 = vpack.c.bf16 %v1736_v15, %v1735_v9  ;;  %vm7205_vm2 = vmmov %vm7173_vm0 }
 0x8d7   : > { %v1738_v18 = vld [vmem:[#allocation2 + $0x58] sm:$0xff] }
 0x8d8   : > { %5260 = vmatpush3.bf16.msra.mxu0 %v6364_v51  ;;  %2067 = vst.msk [vmem:[#allocation2 + $0x58] sm:$0xff] %vm7192_vm3, %v5744_v1  ;;  %vm7206_vm3 = vmmov %vm7173_vm0 }
 0x8d9   : > { %v1737_v19 = vld [vmem:[#allocation2 + $0x50] sm:$0xff]  ;;  %5262 = vmatprep.subr.bf16.mxu0 %v6372_v54 }
 0x8da   : > { %2066 = vst.msk [vmem:[#allocation2 + $0x50] sm:$0xff] %vm7193_vm4, %v5744_v1  ;;  %v5269_v8 = vpack.c.bf16 %v1738_v18, %v1737_v19  ;;  %v1655_v1 = vld [vmem:[%s7143_s6 + $0x18] sm:$0xff]  ;;  %vm7207_vm4 = vmmov %vm7173_vm0 }
 0x8dc   : > { %5264 = vmatpush3.bf16.msra.mxu0 %v6372_v54 }
 0x8dd   : > { %5266 = vmatprep.subr.bf16.mxu0 %v5265_v20 }
 0x8e0   : > { %5268 = vmatpush3.bf16.msra.mxu0 %v5265_v20  ;;  %v1745_v38 = vpop.permute.xlu0 %1744 }
 0x8e1   : > { %5270 = vmatprep.subr.bf16.mxu0 %v5269_v8  ;;  %v1741_v28 = vpop.permute.xlu1 %1740 }
 0x8e4   : > { %5272 = vmatpush3.bf16.msra.mxu0 %v5269_v8  ;;  %v1749_v40 = vpop.permute.xlu0 %1748 }
 0x8e6   : > { %v1906_v29 = vpop.permute.xlu1 %1905 }
 0x8e7   : > { %4982 = vmatmul.mubr.msk.f32.vlgmr.msra.gmra.mrb[12].mxu0 %vm1336_vm6, %v1653_v21 }
 0x8e8   : > { %4984 = vmatprep.mubr.msk.f32.mxu0 %vm1336_vm6, %v1654_v22 }
 0x8e9   : > { %v1946_v42 = vpop.permute.xlu0 %1945 }
 0x8ea   : > { %v1910_v32 = vpop.permute.xlu1 %1909 }
 0x8eb   : > { %4985 = vmatmul.mubr.msk.f32.gmra.mrb[14].mxu0 %vm1336_vm6, %v1655_v1 }
 0x8ec   : > { %4987 = vmatprep.mubr.msk.f32.mxu0 %vm1336_vm6, %v1656_v23 }
 0x8ed   : > { %v1954_v44 = vpop.permute.xlu0 %1953 }
 0x8ef   : > { %4988 = vmatmul.mubr.msk.f32.gmra.mrb[16].mxu0 %vm1336_vm6, %v1657_v2  ;;  %v1753_v33 = vpop.permute.xlu1 %1752 }
 0x8f0   : > { %4990 = vmatprep.mubr.msk.f32.mxu0 %vm1336_vm6, %v1658_v25 }
 0x8f1   : > { %v1962_v46 = vpop.permute.xlu0 %1961 }
 0x8f3   : > { %4991 = vmatmul.mubr.msk.f32.gmra.mrb[18].mxu0 %vm1336_vm6, %v1659_v26  ;;  %vm2080_vm6 = vcmask 105472  }
 0x8f4   : > { %v1950_v34 = vpop.permute.xlu1 %1949 }
 0x8f6   : > { %v1918_v51 = vpop.permute.xlu0 %1917 }
 0x8f9   : > { %v1914_v35 = vpop.permute.xlu1 %1913 }
 0x8fa   : > { %v1926_v6 = vpop.permute.xlu0 %1925 }
 0x8fe   : > { %v1758_v36 = vpop.permute.xlu1 %1757  ;;  %v1934_v23 = vpop.permute.xlu0 %1933 }
 0x902   : > { %v1763_v37 = vpop.permute.xlu1 %1762 }
 0x907   : > { %v1958_v39 = vpop.permute.xlu1 %1957 }
 0x90c   : > { %v1922_v41 = vpop.permute.xlu1 %1921 }
 0x911   : > { %v1768_v43 = vpop.permute.xlu1 %1767 }
 0x915   : > { %v1773_v45 = vpop.permute.xlu1 %1772 }
 0x91a   : > { %v1966_v47 = vpop.permute.xlu1 %1965 }
 0x91f   : > { %v1930_v56 = vpop.permute.xlu1 %1929 }
 0x924   : > { %v1970_v14 = vpop.permute.xlu1 %1969 }
 0x9ba   : > { %v4983_v48 = vpop.f32.mrb[12].mxu0 }
 0x9bb   : > { %v1871_v49 = vadd.f32 %v4983_v48, %v1745_v38  ;;  %v1865_v50 = vpop.f32.mrb[13].mxu0 }
 0x9bc   : > { %v1866_v52 = vadd.f32 %v1865_v50, %v1741_v28 }
 0x9bd   : > { %v1937_v53 = vmul.f32 %v1910_v32, %v1871_v49  ;;  %v1974_v32 = vpop.permute.xlu1 %1973 }
 0x9be   : > { %v1936_v54 = vmul.f32 %v1906_v29, %v1866_v52  ;;  %v4986_v55 = vpop.f32.mrb[14].mxu0 }
 0x9bf   : > { %v6487_v59 = vadd.f32 %v1950_v34, %v1937_v53  ;;  %v1881_v60 = vadd.f32 %v4986_v55, %v1753_v33  ;;  %v1875_v31 = vpop.f32.mrb[15].mxu0 }
 0x9c0   : > { %v6489_v62 = vadd.f32 %v1946_v42, %v1936_v54  ;;  %v1876_v63 = vadd.f32 %v1875_v31, %v1749_v40 }
 0x9c1   : > { %v4559_v3 = vmul.f32 -1.442695, %v6487_v59  ;;  %v1939_v4 = vmul.f32 %v1918_v51, %v1881_v60 }
 0x9c2   : > { %v4558_v5 = vmul.f32 -1.442695, %v6489_v62  ;;  %v1938_v10 = vmul.f32 %v1914_v35, %v1876_v63  ;;  %v4989_v17 = vpop.f32.mrb[16].mxu0 }
 0x9c3   : > { %5616 = vpow2.f32 %v4559_v3  ;;  %v6493_v24 = vadd.f32 %v1958_v39, %v1939_v4  ;;  %v1891_v11 = vadd.f32 %v4989_v17, %v1763_v37  ;;  %v1885_v12 = vpop.f32.mrb[17].mxu0 }
 0x9c4   : > { %5618 = vpow2.f32 %v4558_v5  ;;  %v6495_v13 = vadd.f32 %v1954_v44, %v1938_v10  ;;  %v1886_v15 = vadd.f32 %v1885_v12, %v1758_v36 }
 0x9c5   : > { %v4561_v9 = vmul.f32 -1.442695, %v6493_v24  ;;  %v1941_v18 = vmul.f32 %v1926_v6, %v1891_v11 }
 0x9c6   : > { %v4560_v19 = vmul.f32 -1.442695, %v6495_v13  ;;  %v1940_v20 = vmul.f32 %v1922_v41, %v1886_v15  ;;  %v4992_v8 = vpop.f32.mrb[18].mxu0 }
 0x9c7   : > { %5620 = vpow2.f32 %v4561_v9  ;;  %v6499_v21 = vadd.f32 %v1966_v47, %v1941_v18  ;;  %v1901_v22 = vadd.f32 %v4992_v8, %v1773_v45  ;;  %v1895_v1 = vpop.f32.mrb[19].mxu0 }
 0x9c8   : > { %5622 = vpow2.f32 %v4560_v19  ;;  %v1980_v2 = vadd.f32 %v1962_v46, %v1940_v20  ;;  %v1896_v25 = vadd.f32 %v1895_v1, %v1768_v43 }
 0x9c9   : > { %v4563_v26 = vmul.f32 -1.442695, %v6499_v21  ;;  %v1943_v28 = vmul.f32 %v1934_v23, %v1901_v22  ;;  %v2041_v23 = vld [vmem:[%s7144_s7 + $0x8] sm:$0xff] }
 0x9ca   : > { %v4562_v29 = vmul.f32 -1.442695, %v1980_v2  ;;  %v1942_v33 = vmul.f32 %v1930_v56, %v1896_v25  ;;  %4566 = vmatprep.mubr.msk.f32.mxu1 %vm7194_vm1, %v2041_v23  ;;  %v5768_v25 = vmov 16   ;;  %vm7208_vm1 = vmmov %vm7173_vm0 }
 0x9cb   : > { %5624 = vpow2.f32 %v4563_v26  ;;  %v1983_v34 = vadd.f32 %v1974_v32, %v1943_v28  ;;  %v5769_v26 = vmov 17   ;;  %v5714_v28 = vld [vmem:[%s7145_s8 + $0x10] sm:$0xff] }
 0x9cc   : > { %5626 = vpow2.f32 %v4562_v29  ;;  %v6502_v35 = vadd.f32 %v1970_v14, %v1942_v33  ;;  %v5715_v29 = vld [vmem:[%s7145_s8 + $0x18] sm:$0xff] }
 0x9cd   : > { %v5617_v36 = vpop.eup %5616  ;;  %v4565_v37 = vmul.f32 -1.442695, %v1983_v34 }
 0x9ce   : > { %v5619_v38 = vpop.eup %5618  ;;  %v2009_v39 = vadd.f32 1.0, %v5617_v36  ;;  %v4564_v40 = vmul.f32 -1.442695, %v6502_v35 }
 0x9cf   : > { %v2008_v41 = vadd.f32 1.0, %v5619_v38  ;;  %5628 = vpow2.f32 %v4565_v37 }
 0x9d0   : > { %5630 = vrcp.f32 %v2009_v39 }
 0x9d1   : > { %v5621_v42 = vpop.eup %5620  ;;  %5632 = vrcp.f32 %v2008_v41 }
 0x9d2   : > { %v5623_v43 = vpop.eup %5622  ;;  %v2011_v44 = vadd.f32 1.0, %v5621_v42  ;;  %5634 = vpow2.f32 %v4564_v40 }
 0x9d3   : > { %v2010_v45 = vadd.f32 1.0, %v5623_v43 }
 0x9d4   : > { %5636 = vrcp.f32 %v2011_v44 }
 0x9d5   : > { %v5625_v46 = vpop.eup %5624  ;;  %5638 = vrcp.f32 %v2010_v45 }
 0x9d6   : > { %v5627_v47 = vpop.eup %5626  ;;  %v2013_v48 = vadd.f32 1.0, %v5625_v46 }
 0x9d7   : > { %v2012_v49 = vadd.f32 1.0, %v5627_v47 }
 0x9d8   : > { %5640 = vrcp.f32 %v2013_v48 }
 0x9d9   : > { %v5629_v50 = vpop.eup %5628  ;;  %5642 = vrcp.f32 %v2012_v49 }
 0x9da   : > { %v5631_v51 = vpop.eup %5630  ;;  %v2015_v52 = vadd.f32 1.0, %v5629_v50 }
 0x9db   : > { %v5633_v53 = vpop.eup %5632  ;;  %v2033_v54 = vmul.f32 %v5631_v51, %v6487_v59 }
 0x9dc   : > { %v5635_v55 = vpop.eup %5634  ;;  %5644 = vrcp.f32 %v2015_v52  ;;  %v2032_v56 = vmul.f32 %v5633_v53, %v6489_v62 }
 0x9dd   : > { %2082 = vst.msk [vmem:[#allocation2 + $0x8] sm:$0xff] %vm2080_vm6, %v2033_v54  ;;  %v2014_v60 = vadd.f32 1.0, %v5635_v55  ;;  %2099 = vrot.lane.b32.xlu1 %v2033_v54, %s5749_s24 }
 0x9de   : > { %v5637_v31 = vpop.eup %5636  ;;  %2097 = vrot.lane.b32.xlu0 %v2032_v56, %s5749_s24  ;;  %2081 = vst.msk [vmem:[#allocation2] sm:$0xff] %vm2080_vm6, %v2032_v56 }
 0x9df   : > { %v5639_v63 = vpop.eup %5638  ;;  %v2035_v3 = vmul.f32 %v5637_v31, %v6493_v24  ;;  %5646 = vrcp.f32 %v2014_v60 }
 0x9e0   : > { %v2034_v59 = vmul.f32 %v5639_v63, %v6495_v13 }
 0x9e1   : > { %2084 = vst.msk [vmem:[#allocation2 + $0x18] sm:$0xff] %vm2080_vm6, %v2035_v3  ;;  %2103 = vrot.lane.b32.xlu1 %v2035_v3, %s5749_s24 }
 0x9e2   : > { %v5641_v62 = vpop.eup %5640  ;;  %2101 = vrot.lane.b32.xlu0 %v2034_v59, %s5749_s24  ;;  %2083 = vst.msk [vmem:[#allocation2 + $0x10] sm:$0xff] %vm2080_vm6, %v2034_v59 }
 0x9e3   : > { %v5643_v4 = vpop.eup %5642  ;;  %v2037_v5 = vmul.f32 %v5641_v62, %v6499_v21 }
 0x9e4   : > { %v2036_v6 = vmul.f32 %v5643_v4, %v1980_v2  ;;  %v2162_v10 = vld [vmem:[#allocation2 + $0x8] sm:$0xff]  ;;  %v5767_v2 = vmov 15  }
 0x9e5   : > { %2086 = vst.msk [vmem:[#allocation2 + $0x28] sm:$0xff] %vm2080_vm6, %v2037_v5  ;;  %2107 = vrot.lane.b32.xlu1 %v2037_v5, %s5749_s24  ;;  %v2161_v17 = vld [vmem:[#allocation2] sm:$0xff]  ;;  %5499 = vset.pattern.permute.xlu0 %v5767_v2 }
 0x9e6   : > { %v5645_v24 = vpop.eup %5644  ;;  %2105 = vrot.lane.b32.xlu0 %v2036_v6, %s5749_s24  ;;  %2085 = vst.msk [vmem:[#allocation2 + $0x20] sm:$0xff] %vm2080_vm6, %v2036_v6  ;;  %v5274_v11 = vpack.c.bf16 %v2162_v10, %v2161_v17  ;;  %5500 = vset.pattern.permute.xlu1 %v5767_v2  ;;  %v2043_v10 = vld [vmem:[%s7144_s7 + $0x18] sm:$0xff]  ;;  %v2042_v17 = vld [vmem:[%s7144_s7 + $0x10] sm:$0xff] }
 0x9e7   : > { %v2039_v12 = vmul.f32 %v5645_v24, %v1983_v34  ;;  %v2044_v24 = vld [vmem:[%s7144_s7 + $0x20] sm:$0xff] }
 0x9e8   : > { %5275 = vmatpush1.bf16.msra.mxu1 %v5274_v11  ;;  %v2164_v13 = vld [vmem:[#allocation2 + $0x18] sm:$0xff] }
 0x9e9   : > { %v5647_v14 = vpop.eup %5646  ;;  %2088 = vst.msk [vmem:[#allocation2 + $0x38] sm:$0xff] %vm2080_vm6, %v2039_v12  ;;  %2111 = vrot.lane.b32.xlu1 %v2039_v12, %s5749_s24  ;;  %5276 = vmatprep.subr.bf16.mxu1 %v5766_v27  ;;  %v2163_v15 = vld [vmem:[#allocation2 + $0x10] sm:$0xff]  ;;  %v2047_v11 = vld [vmem:[%s7144_s7 + $0x38] sm:$0xff] }
 0x9ea   : > { %v2038_v9 = vmul.f32 %v5647_v14, %v6502_v35  ;;  %v5277_v18 = vpack.c.bf16 %v2164_v13, %v2163_v15  ;;  %v2049_v13 = vld [vmem:[%s7144_s7 + $0x48] sm:$0xff]  ;;  %v2048_v14 = vld [vmem:[%s7144_s7 + $0x40] sm:$0xff]  ;;  %v2051_v15 = vld [vmem:[%s7144_s7 + $0x58] sm:$0xff] }
 0x9ec   : > { %2087 = vst.msk [vmem:[#allocation2 + $0x30] sm:$0xff] %vm2080_vm6, %v2038_v9  ;;  %2109 = vrot.lane.b32.xlu0 %v2038_v9, %s5749_s24  ;;  %5278 = vmatpush1.bf16.msra.mxu1 %v5277_v18  ;;  %v2166_v19 = vld [vmem:[#allocation2 + $0x28] sm:$0xff] }
 0x9ed   : > { %2131 = vrot.lane.b32.xlu1 %v2033_v54, %s5745_s21  ;;  %5279 = vmatprep.subr.bf16.mxu1 %v5766_v27  ;;  %v2165_v20 = vld [vmem:[#allocation2 + $0x20] sm:$0xff]  ;;  %v2053_v18 = vld [vmem:[%s7144_s7 + $0x68] sm:$0xff] }
 0x9ee   : > { %v5280_v8 = vpack.c.bf16 %v2166_v19, %v2165_v20  ;;  %v2052_v19 = vld [vmem:[%s7144_s7 + $0x60] sm:$0xff]  ;;  %v2055_v20 = vld [vmem:[%s7144_s7 + $0x78] sm:$0xff] }
 0x9f0   : > { %2129 = vrot.lane.b32.xlu0 %v2032_v56, %s5745_s21  ;;  %5281 = vmatpush1.bf16.msra.mxu1 %v5280_v8  ;;  %v2168_v21 = vld [vmem:[#allocation2 + $0x38] sm:$0xff]  ;;  %v2054_v8 = vld [vmem:[%s7144_s7 + $0x70] sm:$0xff] }
 0x9f1   : > { %2135 = vrot.lane.b32.xlu1 %v2035_v3, %s5745_s21  ;;  %5282 = vmatprep.subr.bf16.mxu1 %v5766_v27 }
 0x9f3   : > { %v2167_v22 = vld [vmem:[#allocation2 + $0x30] sm:$0xff] }
 0x9f4   : > { %2133 = vrot.lane.b32.xlu0 %v2034_v59, %s5745_s21  ;;  %v5283_v1 = vpack.c.bf16 %v2168_v21, %v2167_v22  ;;  %v2482_v21 = vld [vmem:[%s7146_s9] sm:$0xff] }
 0x9f5   : > { %2139 = vrot.lane.b32.xlu1 %v2037_v5, %s5745_s21  ;;  %5009 = vmatprep.mubr.msk.f32.mxu0 %vm7201_vm13, %v2482_v21  ;;  %vm7214_vm13 = vmmov %vm7173_vm0 }
 0x9f6   : > { %5284 = vmatpush1.bf16.msra.mxu1 %v5283_v1 }
 0x9f7   : > { %5285 = vmatprep.subr.bf16.mxu1 %v5766_v27 }
 0x9f8   : > { %2137 = vrot.lane.b32.xlu0 %v2036_v6, %s5745_s21  ;;  %v2040_v6 = vld [vmem:[%s7144_s7] sm:$0xff] }
 0x9f9   : > { %2143 = vrot.lane.b32.xlu1 %v2039_v12, %s5745_s21  ;;  %v2046_v12 = vld [vmem:[%s7144_s7 + $0x30] sm:$0xff] }
 0x9fc   : > { %2141 = vrot.lane.b32.xlu0 %v2038_v9, %s5745_s21  ;;  %v2050_v9 = vld [vmem:[%s7144_s7 + $0x50] sm:$0xff] }
 0x9fd   : > { %2190 = vperm.xlu1 %5500, %v6389_v58  }
 0xa00   : > { %2186 = vperm.xlu0 %5499, %v6383_v57  }
 0xa01   : > { %5501 = vset.pattern.permute.xlu1 %v5768_v25 }
 0xa02   : > { %2347 = vperm.xlu1 %5501, %v6383_v57  }
 0xa04   : > { %5503 = vset.pattern.permute.xlu0 %v5769_v26 }
 0xa05   : > { %2387 = vperm.xlu0 %5503, %v6383_v57  }
 0xa06   : > { %5502 = vset.pattern.permute.xlu1 %v5767_v2 }
 0xa07   : > { %2194 = vperm.xlu1 %5502, %v5714_v28  }
 0xa09   : > { %2395 = vperm.xlu0 %5503, %v5714_v28  }
 0xa0b   : > { %2198 = vperm.xlu1 %5502, %v5715_v29  }
 0xa0d   : > { %2403 = vperm.xlu0 %5503, %v6401_v16  }
 0xa0f   : > { %5504 = vset.pattern.permute.xlu1 %v5769_v26 }
 0xa10   : > { %2391 = vperm.xlu1 %5504, %v6389_v58  }
 0xa11   : > { %5510 = vset.pattern.permute.xlu0 %v5768_v25 }
 0xa12   : > { %2351 = vperm.xlu0 %5510, %v6389_v58  }
 0xa14   : > { %5505 = vset.pattern.permute.xlu1 %v5768_v25 }
 0xa15   : > { %2355 = vperm.xlu1 %5505, %v5714_v28   ;;  %v2508_v28 = vld [vmem:[%s7147_s10 + $0x10] sm:$0xff] }
 0xa16   : > { %2359 = vperm.xlu0 %5510, %v5715_v29  }
 0xa19   : > { %5506 = vset.pattern.permute.xlu1 %v5767_v2 }
 0xa1a   : > { %2367 = vperm.xlu0 %5510, %v6410_v0   ;;  %2202 = vperm.xlu1 %5506, %v6401_v16  }
 0xa1e   : > { %2375 = vperm.xlu0 %5510, %v6417_v61   ;;  %2206 = vperm.xlu1 %5506, %v6410_v0  }
 0xa22   : > { %5514 = vset.pattern.permute.xlu0 %v5747_v7  ;;  %5507 = vset.pattern.permute.xlu1 %v5769_v26 }
 0xa23   : > { %2399 = vperm.xlu1 %5507, %v5715_v29  }
 0xa27   : > { %5508 = vset.pattern.permute.xlu1 %v5768_v25 }
 0xa28   : > { %2363 = vperm.xlu1 %5508, %v6401_v16  }
 0xa2c   : > { %5509 = vset.pattern.permute.xlu1 %v5767_v2  ;;  %v2506_v2 = vld [vmem:[%s7147_s10] sm:$0xff] }
 0xa2d   : > { %2210 = vperm.xlu1 %5509, %v6426_v30   ;;  %2532 = vperm.xlu0 %5514, %v2506_v2  }
 0xa31   : > { %2214 = vperm.xlu1 %5509, %v6417_v61  }
 0xa35   : > { %5511 = vset.pattern.permute.xlu1 %v5769_v26 }
 0xa36   : > { %2407 = vperm.xlu1 %5511, %v6410_v0  }
 0xa3a   : > { %5512 = vset.pattern.permute.xlu1 %v5768_v25  ;;  %v2507_v25 = vld [vmem:[%s7147_s10 + $0x8] sm:$0xff] }
 0xa3b   : > { %2371 = vperm.xlu1 %5512, %v6426_v30  }
 0xa3f   : > { %5513 = vset.pattern.permute.xlu1 %v5769_v26  ;;  %v2509_v26 = vld [vmem:[%s7147_s10 + $0x18] sm:$0xff] }
 0xa40   : > { %2411 = vperm.xlu1 %5513, %v6426_v30   ;;  %2547 = vperm.xlu0 %5514, %v2509_v26  }
 0xa44   : > { %2415 = vperm.xlu1 %5513, %v6417_v61  }
 0xa48   : > { %5515 = vset.pattern.permute.xlu1 %v5747_v7 }
 0xa49   : > { %2537 = vperm.xlu1 %5515, %v2507_v25  }
 0xa4d   : > { %2542 = vperm.xlu1 %5515, %v2508_v28  }
 0xa4f   : > { %v2100_v57 = vpop.permute.xlu1 %2099 }
 0xa50   : > { %2122 = vst.msk [vmem:[#allocation2 + $0x48] sm:$0xff] %vm2080_vm6, %v2100_v57  ;;  %v2098_v58 = vpop.permute.xlu0 %2097  ;;  %v2515_v57 = vld [vmem:[%s7147_s10 + $0x48] sm:$0xff] }
 0xa51   : > { %2121 = vst.msk [vmem:[#allocation2 + $0x40] sm:$0xff] %vm2080_vm6, %v2098_v58  ;;  %v2514_v58 = vld [vmem:[%s7147_s10 + $0x40] sm:$0xff]  ;;  %2577 = vperm.xlu0 %5514, %v2515_v57  }
 0xa52   : > { %2572 = vperm.xlu1 %5515, %v2514_v58  }
 0xa53   : > { %v2104_v32 = vpop.permute.xlu1 %2103 }
 0xa54   : > { %2124 = vst.msk [vmem:[#allocation2 + $0x58] sm:$0xff] %vm2080_vm6, %v2104_v32  ;;  %v2102_v33 = vpop.permute.xlu0 %2101 }
 0xa55   : > { %2123 = vst.msk [vmem:[#allocation2 + $0x50] sm:$0xff] %vm2080_vm6, %v2102_v33  ;;  %v2517_v33 = vld [vmem:[%s7147_s10 + $0x58] sm:$0xff] }
 0xa56   : > { %2587 = vperm.xlu0 %5514, %v2517_v33  }
 0xa57   : > { %v2108_v16 = vpop.permute.xlu1 %2107  ;;  %v2170_v34 = vld [vmem:[#allocation2 + $0x48] sm:$0xff] }
 0xa58   : > { %2126 = vst.msk [vmem:[#allocation2 + $0x68] sm:$0xff] %vm2080_vm6, %v2108_v16  ;;  %v2106_v35 = vpop.permute.xlu0 %2105  ;;  %v2169_v36 = vld [vmem:[#allocation2 + $0x40] sm:$0xff]  ;;  %v2516_v16 = vld [vmem:[%s7147_s10 + $0x50] sm:$0xff] }
 0xa59   : > { %2125 = vst.msk [vmem:[#allocation2 + $0x60] sm:$0xff] %vm2080_vm6, %v2106_v35  ;;  %v5286_v37 = vpack.c.bf16 %v2170_v34, %v2169_v36  ;;  %2582 = vperm.xlu1 %5515, %v2516_v16  }
 0xa5b   : > { %v2112_v38 = vpop.permute.xlu1 %2111  ;;  %5287 = vmatpush1.bf16.msra.mxu1 %v5286_v37  ;;  %v2172_v0 = vld [vmem:[#allocation2 + $0x58] sm:$0xff] }
 0xa5c   : > { %2128 = vst.msk [vmem:[#allocation2 + $0x78] sm:$0xff] %vm2080_vm6, %v2112_v38  ;;  %5288 = vmatprep.subr.bf16.mxu1 %v5766_v27  ;;  %v2171_v39 = vld [vmem:[#allocation2 + $0x50] sm:$0xff] }
 0xa5d   : > { %v5289_v40 = vpack.c.bf16 %v2172_v0, %v2171_v39 }
 0xa5e   : > { %v2110_v41 = vpop.permute.xlu0 %2109 }
 0xa5f   : > { %2127 = vst.msk [vmem:[#allocation2 + $0x70] sm:$0xff] %vm2080_vm6, %v2110_v41  ;;  %v2132_v42 = vpop.permute.xlu1 %2131  ;;  %5290 = vmatpush1.bf16.msra.mxu1 %v5289_v40  ;;  %v2174_v43 = vld [vmem:[#allocation2 + $0x68] sm:$0xff] }
 0xa60   : > { %2154 = vst.msk [vmem:[#allocation2 + $0x88] sm:$0xff] %vm2080_vm6, %v2132_v42  ;;  %5291 = vmatprep.subr.bf16.mxu1 %v5766_v27  ;;  %v2173_v44 = vld [vmem:[#allocation2 + $0x60] sm:$0xff] }
 0xa61   : > { %v5292_v45 = vpack.c.bf16 %v2174_v43, %v2173_v44 }
 0xa62   : > { %v2130_v46 = vpop.permute.xlu0 %2129 }
 0xa63   : > { %2153 = vst.msk [vmem:[#allocation2 + $0x80] sm:$0xff] %vm2080_vm6, %v2130_v46  ;;  %v2136_v47 = vpop.permute.xlu1 %2135  ;;  %5293 = vmatpush1.bf16.msra.mxu1 %v5292_v45  ;;  %v2176_v30 = vld [vmem:[#allocation2 + $0x78] sm:$0xff] }
 0xa64   : > { %2156 = vst.msk [vmem:[#allocation2 + $0x98] sm:$0xff] %vm2080_vm6, %v2136_v47  ;;  %5294 = vmatprep.subr.bf16.mxu1 %v5766_v27 }
 0xa66   : > { %v2134_v48 = vpop.permute.xlu0 %2133  ;;  %v2175_v49 = vld [vmem:[#allocation2 + $0x70] sm:$0xff] }
 0xa67   : > { %2155 = vst.msk [vmem:[#allocation2 + $0x90] sm:$0xff] %vm2080_vm6, %v2134_v48  ;;  %v2140_v50 = vpop.permute.xlu1 %2139  ;;  %v5295_v51 = vpack.c.bf16 %v2176_v30, %v2175_v49  ;;  %v2178_v61 = vld [vmem:[#allocation2 + $0x88] sm:$0xff] }
 0xa68   : > { %2158 = vst.msk [vmem:[#allocation2 + $0xa8] sm:$0xff] %vm2080_vm6, %v2140_v50 }
 0xa69   : > { %5296 = vmatpush1.bf16.msra.mxu1 %v5295_v51 }
 0xa6a   : > { %v2138_v52 = vpop.permute.xlu0 %2137  ;;  %5297 = vmatprep.subr.bf16.mxu1 %v5766_v27  ;;  %v2177_v53 = vld [vmem:[#allocation2 + $0x80] sm:$0xff] }
 0xa6b   : > { %2157 = vst.msk [vmem:[#allocation2 + $0xa0] sm:$0xff] %vm2080_vm6, %v2138_v52  ;;  %v2144_v54 = vpop.permute.xlu1 %2143  ;;  %v5298_v55 = vpack.c.bf16 %v2178_v61, %v2177_v53  ;;  %v2180_v7 = vld [vmem:[#allocation2 + $0x98] sm:$0xff] }
 0xa6c   : > { %2160 = vst.msk [vmem:[#allocation2 + $0xb8] sm:$0xff] %vm2080_vm6, %v2144_v54 }
 0xa6d   : > { %5299 = vmatpush1.bf16.msra.mxu1 %v5298_v55 }
 0xa6e   : > { %v2142_v56 = vpop.permute.xlu0 %2141  ;;  %5300 = vmatprep.subr.bf16.mxu1 %v5766_v27  ;;  %v2179_v60 = vld [vmem:[#allocation2 + $0x90] sm:$0xff] }
 0xa6f   : > { %2159 = vst.msk [vmem:[#allocation2 + $0xb0] sm:$0xff] %vm2080_vm6, %v2142_v56  ;;  %v5301_v31 = vpack.c.bf16 %v2180_v7, %v2179_v60  ;;  %v2182_v63 = vld [vmem:[#allocation2 + $0xa8] sm:$0xff] }
 0xa71   : > { %5302 = vmatpush1.bf16.msra.mxu1 %v5301_v31 }
 0xa72   : > { %5303 = vmatprep.subr.bf16.mxu1 %v5766_v27  ;;  %v2181_v3 = vld [vmem:[#allocation2 + $0xa0] sm:$0xff] }
 0xa73   : > { %v5304_v59 = vpack.c.bf16 %v2182_v63, %v2181_v3  ;;  %v2184_v62 = vld [vmem:[#allocation2 + $0xb8] sm:$0xff] }
 0xa75   : > { %5305 = vmatpush1.bf16.msra.mxu1 %v5304_v59 }
 0xa76   : > { %5306 = vmatprep.subr.bf16.mxu1 %v5766_v27  ;;  %v2183_v4 = vld [vmem:[#allocation2 + $0xb0] sm:$0xff]  ;;  %v2045_v27 = vld [vmem:[%s7144_s7 + $0x28] sm:$0xff] }
 0xa77   : > { %v5307_v5 = vpack.c.bf16 %v2184_v62, %v2183_v4 }
 0xa79   : > { %5308 = vmatpush1.bf16.msra.mxu1 %v5307_v5 }
 0xa7c   : > { %2306 = vmatmul.mubr.f32.vlgmr.msra.gmra.mrb[6].mxu1 %v2040_v6  ;;  %v2191_v22 = vpop.permute.xlu1 %2190 }
 0xa7d   : > { %4567 = vmatprep.mubr.msk.f32.mxu1 %vm7195_vm5, %v2043_v10  ;;  %vm7209_vm5 = vmmov %vm7173_vm0 }
 0xa7f   : > { %v2187_v35 = vpop.permute.xlu0 %2186 }
 0xa80   : > { %2311 = vmatmul.mubr.f32.gmra.mrb[8].mxu1 %v2042_v17 }
 0xa81   : > { %4568 = vmatprep.mubr.msk.f32.mxu1 %vm7196_vm8, %v2045_v27  ;;  %v2348_v1 = vpop.permute.xlu1 %2347  ;;  %vm7210_vm8 = vmmov %vm7173_vm0 }
 0xa84   : > { %2316 = vmatmul.mubr.f32.gmra.mrb[10].mxu1 %v2044_v24  ;;  %v2388_v37 = vpop.permute.xlu0 %2387 }
 0xa85   : > { %4569 = vmatprep.mubr.msk.f32.mxu1 %vm7173_vm0, %v2047_v11 }
 0xa86   : > { %v2195_v23 = vpop.permute.xlu1 %2194 }
 0xa88   : > { %2321 = vmatmul.mubr.f32.gmra.mrb[12].mxu1 %v2046_v12  ;;  %v2396_v39 = vpop.permute.xlu0 %2395 }
 0xa89   : > { %4570 = vmatprep.mubr.msk.f32.mxu1 %vm7197_vm7, %v2049_v13  ;;  %vm7211_vm7 = vmmov %vm7173_vm0 }
 0xa8a   : > { %v2199_v29 = vpop.permute.xlu1 %2198 }
 0xa8c   : > { %2326 = vmatmul.mubr.f32.gmra.mrb[14].mxu1 %v2048_v14  ;;  %v2404_v41 = vpop.permute.xlu0 %2403 }
 0xa8d   : > { %4571 = vmatprep.mubr.msk.f32.mxu1 %vm7198_vm9, %v2051_v15  ;;  %vm2939_vm9 = vcmask 130048  }
 0xa8f   : > { %v2392_v32 = vpop.permute.xlu1 %2391 }
 0xa90   : > { %2331 = vmatmul.mubr.f32.gmra.mrb[16].mxu1 %v2050_v9 }
 0xa91   : > { %4572 = vmatprep.mubr.msk.f32.mxu1 %vm7199_vm10, %v2053_v18  ;;  %v2352_v30 = vpop.permute.xlu0 %2351  ;;  %vm7212_vm10 = vmmov %vm7173_vm0 }
 0xa94   : > { %2336 = vmatmul.mubr.f32.gmra.mrb[18].mxu1 %v2052_v19  ;;  %v2356_v34 = vpop.permute.xlu1 %2355 }
 0xa95   : > { %4573 = vmatprep.mubr.msk.f32.mxu1 %vm7200_vm11, %v2055_v20  ;;  %v2360_v62 = vpop.permute.xlu0 %2359  ;;  %vm7213_vm11 = vmmov %vm7173_vm0 }
 0xa98   : > { %2341 = vmatmul.mubr.f32.gmra.mrb[20].mxu1 %v2054_v8 }
 0xa99   : > { %v2203_v36 = vpop.permute.xlu1 %2202  ;;  %v2368_v8 = vpop.permute.xlu0 %2367 }
 0xa9d   : > { %v2207_v38 = vpop.permute.xlu1 %2206 }
 0xaa2   : > { %v2400_v0 = vpop.permute.xlu1 %2399 }
 0xaa7   : > { %v2364_v40 = vpop.permute.xlu1 %2363 }
 0xaac   : > { %v2211_v46 = vpop.permute.xlu1 %2210 }
 0xab0   : > { %v2215_v7 = vpop.permute.xlu1 %2214 }
 0xab5   : > { %v2408_v4 = vpop.permute.xlu1 %2407 }
 0xaba   : > { %v2372_v15 = vpop.permute.xlu1 %2371 }
 0xb4f   : > { %v2307_v42 = vpop.f32.mrb[6].mxu1 }
 0xb50   : > { %v2308_v43 = vadd.f32 %v2307_v42, %v2187_v35  ;;  %v2309_v44 = vpop.f32.mrb[7].mxu1 }
 0xb52   : > { %v2378_v45 = vmul.f32 %v2348_v1, %v2308_v43 }
 0xb53   : > { %v2312_v47 = vpop.f32.mrb[8].mxu1 }
 0xb54   : > { %v6672_v48 = vadd.f32 %v2388_v37, %v2378_v45  ;;  %v2313_v49 = vadd.f32 %v2312_v47, %v2191_v22  ;;  %v2314_v50 = vpop.f32.mrb[9].mxu1  ;;  %v2376_v37 = vpop.permute.xlu0 %2375 }
 0xb56   : > { %v4574_v51 = vmul.f32 -1.442695, %v6672_v48  ;;  %v2379_v61 = vmul.f32 %v2352_v30, %v2313_v49 }
 0xb57   : > { %v2317_v52 = vpop.f32.mrb[10].mxu1 }
 0xb58   : > { %5648 = vpow2.f32 %v4574_v51  ;;  %v6675_v53 = vadd.f32 %v2392_v32, %v2379_v61  ;;  %v2318_v54 = vadd.f32 %v2317_v52, %v2195_v23  ;;  %v2319_v55 = vpop.f32.mrb[11].mxu1 }
 0xb5a   : > { %v4575_v56 = vmul.f32 -1.442695, %v6675_v53  ;;  %v2380_v60 = vmul.f32 %v2356_v34, %v2318_v54 }
 0xb5b   : > { %v2322_v31 = vpop.f32.mrb[12].mxu1 }
 0xb5c   : > { %5650 = vpow2.f32 %v4575_v56  ;;  %v6678_v63 = vadd.f32 %v2396_v39, %v2380_v60  ;;  %v2323_v3 = vadd.f32 %v2322_v31, %v2199_v29  ;;  %v2324_v59 = vpop.f32.mrb[13].mxu1  ;;  %v2412_v29 = vpop.permute.xlu1 %2411 }
 0xb5e   : > { %v4576_v5 = vmul.f32 -1.442695, %v6678_v63  ;;  %v2381_v6 = vmul.f32 %v2360_v62, %v2323_v3 }
 0xb5f   : > { %v2327_v10 = vpop.f32.mrb[14].mxu1 }
 0xb60   : > { %5652 = vpow2.f32 %v4576_v5  ;;  %v6681_v17 = vadd.f32 %v2400_v0, %v2381_v6  ;;  %v2328_v27 = vadd.f32 %v2327_v10, %v2203_v36  ;;  %v2329_v24 = vpop.f32.mrb[15].mxu1 }
 0xb61   : > { %v2483_v24 = vld [vmem:[%s7146_s9 + $0x8] sm:$0xff] }
 0xb62   : > { %v5649_v11 = vpop.eup %5648  ;;  %v4577_v12 = vmul.f32 -1.442695, %v6681_v17  ;;  %v2382_v13 = vmul.f32 %v2364_v40, %v2328_v27 }
 0xb63   : > { %v2450_v14 = vadd.f32 1.0, %v5649_v11  ;;  %v2332_v9 = vpop.f32.mrb[16].mxu1  ;;  %v2484_v11 = vld [vmem:[%s7146_s9 + $0x10] sm:$0xff] }
 0xb64   : > { %5654 = vpow2.f32 %v4577_v12  ;;  %v6684_v18 = vadd.f32 %v2404_v41, %v2382_v13  ;;  %v2333_v19 = vadd.f32 %v2332_v9, %v2207_v38  ;;  %v2334_v20 = vpop.f32.mrb[17].mxu1  ;;  %v2416_v41 = vpop.permute.xlu1 %2415  ;;  %v2485_v12 = vld [vmem:[%s7146_s9 + $0x18] sm:$0xff]  ;;  %v2486_v13 = vld [vmem:[%s7146_s9 + $0x20] sm:$0xff] }
 0xb65   : > { %5656 = vrcp.f32 %v2450_v14  ;;  %v2487_v14 = vld [vmem:[%s7146_s9 + $0x28] sm:$0xff]  ;;  %v2489_v9 = vld [vmem:[%s7146_s9 + $0x38] sm:$0xff]  ;;  %v2492_v20 = vld [vmem:[%s7146_s9 + $0x50] sm:$0xff] }
 0xb66   : > { %v5651_v21 = vpop.eup %5650  ;;  %v4578_v22 = vmul.f32 -1.442695, %v6684_v18  ;;  %v2383_v1 = vmul.f32 %v2368_v8, %v2333_v19  ;;  %v2491_v19 = vld [vmem:[%s7146_s9 + $0x48] sm:$0xff]  ;;  %v2493_v8 = vld [vmem:[%s7146_s9 + $0x58] sm:$0xff] }
 0xb67   : > { %v2451_v23 = vadd.f32 1.0, %v5651_v21  ;;  %v2337_v2 = vpop.f32.mrb[18].mxu1 }
 0xb68   : > { %5658 = vpow2.f32 %v4578_v22  ;;  %v2423_v25 = vadd.f32 %v2408_v4, %v2383_v1  ;;  %v2338_v26 = vadd.f32 %v2337_v2, %v2211_v46  ;;  %v2339_v28 = vpop.f32.mrb[19].mxu1  ;;  %v2538_v21 = vpop.permute.xlu1 %2537 }
 0xb69   : > { %5660 = vrcp.f32 %v2451_v23  ;;  %v2533_v1 = vpop.permute.xlu0 %2532 }
 0xb6a   : > { %v5653_v57 = vpop.eup %5652  ;;  %v4579_v58 = vmul.f32 -1.442695, %v2423_v25  ;;  %v2384_v32 = vmul.f32 %v2372_v15, %v2338_v26  ;;  %v2488_v15 = vld [vmem:[%s7146_s9 + $0x30] sm:$0xff] }
 0xb6b   : > { %v2452_v33 = vadd.f32 1.0, %v5653_v57  ;;  %v2342_v16 = vpop.f32.mrb[20].mxu1 }
 0xb6c   : > { %5662 = vpow2.f32 %v4579_v58  ;;  %v2424_v34 = vadd.f32 %v2412_v29, %v2384_v32  ;;  %v2343_v35 = vadd.f32 %v2342_v16, %v2215_v7  ;;  %v2344_v36 = vpop.f32.mrb[21].mxu1  ;;  %v2543_v26 = vpop.permute.xlu1 %2542 }
 0xb6d   : > { %5664 = vrcp.f32 %v2452_v33  ;;  %v2548_v58 = vpop.permute.xlu0 %2547 }
 0xb6e   : > { %v5655_v38 = vpop.eup %5654  ;;  %v4580_v0 = vmul.f32 -1.442695, %v2424_v34  ;;  %v2385_v39 = vmul.f32 %v2376_v37, %v2343_v35 }
 0xb6f   : > { %v2453_v40 = vadd.f32 1.0, %v5655_v38  ;;  %v5657_v43 = vpop.eup %5656 }
 0xb70   : > { %5666 = vpow2.f32 %v4580_v0  ;;  %v2425_v42 = vadd.f32 %v2416_v41, %v2385_v39  ;;  %v2474_v49 = vmul.f32 %v5657_v43, %v6672_v48  ;;  %v2573_v37 = vpop.permute.xlu1 %2572 }
 0xb71   : > { %5668 = vrcp.f32 %v2453_v40  ;;  %v2578_v36 = vpop.permute.xlu0 %2577 }
 0xb72   : > { %v5659_v44 = vpop.eup %5658  ;;  %v4581_v45 = vmul.f32 -1.442695, %v2425_v42 }
 0xb73   : > { %v5661_v46 = vpop.eup %5660  ;;  %v2454_v47 = vadd.f32 1.0, %v5659_v44 }
 0xb74   : > { %v2475_v30 = vmul.f32 %v5661_v46, %v6675_v53  ;;  %5670 = vpow2.f32 %v4581_v45  ;;  %v2583_v44 = vpop.permute.xlu1 %2582 }
 0xb75   : > { %5672 = vrcp.f32 %v2454_v47  ;;  %v2588_v41 = vpop.permute.xlu0 %2587 }
 0xb76   : > { %v5663_v50 = vpop.eup %5662  ;;  %v5309_v51 = vpack.c.bf16 %v2475_v30, %v2474_v49 }
 0xb77   : > { %v2455_v61 = vadd.f32 1.0, %v5663_v50  ;;  %v5665_v52 = vpop.eup %5664 }
 0xb78   : > { %5310 = vmatprep.subr.bf16.mxu0 %v5309_v51  ;;  %v2476_v56 = vmul.f32 %v5665_v52, %v6678_v63  ;;  %v2494_v52 = vld [vmem:[%s7146_s9 + $0x60] sm:$0xff] }
 0xb79   : > { %5674 = vrcp.f32 %v2455_v61  ;;  %5312 = vmatpush3.bf16.msra.mxu0 %v5309_v51 }
 0xb7a   : > { %v5667_v54 = vpop.eup %5666 }
 0xb7b   : > { %v5669_v55 = vpop.eup %5668  ;;  %v2456_v7 = vadd.f32 1.0, %v5667_v54  ;;  %v2495_v54 = vld [vmem:[%s7146_s9 + $0x68] sm:$0xff] }
 0xb7c   : > { %v2477_v60 = vmul.f32 %v5669_v55, %v6681_v17  ;;  %v2496_v55 = vld [vmem:[%s7146_s9 + $0x70] sm:$0xff] }
 0xb7d   : > { %5676 = vrcp.f32 %v2456_v7  ;;  %v2497_v7 = vld [vmem:[%s7146_s9 + $0x78] sm:$0xff] }
 0xb7e   : > { %v5671_v31 = vpop.eup %5670  ;;  %v5313_v53 = vpack.c.bf16 %v2477_v60, %v2476_v56  ;;  %v2498_v56 = vld [vmem:[%s7146_s9 + $0x80] sm:$0xff]  ;;  %v2499_v60 = vld [vmem:[%s7146_s9 + $0x88] sm:$0xff] }
 0xb7f   : > { %v2457_v3 = vadd.f32 1.0, %v5671_v31  ;;  %v5673_v48 = vpop.eup %5672 }
 0xb80   : > { %5314 = vmatprep.subr.bf16.mxu0 %v5313_v53  ;;  %v2478_v62 = vmul.f32 %v5673_v48, %v6684_v18  ;;  %v2490_v18 = vld [vmem:[%s7146_s9 + $0x40] sm:$0xff] }
 0xb81   : > { %5678 = vrcp.f32 %v2457_v3  ;;  %5316 = vmatpush3.bf16.msra.mxu0 %v5313_v53 }
 0xb83   : > { %v5675_v59 = vpop.eup %5674 }
 0xb84   : > { %v2479_v4 = vmul.f32 %v5675_v59, %v2423_v25 }
 0xb86   : > { %v5317_v5 = vpack.c.bf16 %v2479_v4, %v2478_v62 }
 0xb87   : > { %v5677_v6 = vpop.eup %5676 }
 0xb88   : > { %5318 = vmatprep.subr.bf16.mxu0 %v5317_v5  ;;  %v2480_v63 = vmul.f32 %v5677_v6, %v2424_v34 }
 0xb89   : > { %5320 = vmatpush3.bf16.msra.mxu0 %v5317_v5 }
 0xb8b   : > { %v5679_v10 = vpop.eup %5678 }
 0xb8c   : > { %v2481_v27 = vmul.f32 %v5679_v10, %v2425_v42 }
 0xb8e   : > { %v5321_v17 = vpack.c.bf16 %v2481_v27, %v2480_v63 }
 0xb90   : > { %5322 = vmatprep.subr.bf16.mxu0 %v5321_v17 }
 0xb91   : > { %5324 = vmatpush3.bf16.msra.mxu0 %v5321_v17  ;;  %v2500_v17 = vld [vmem:[%s7146_s9 + $0x90] sm:$0xff] }
 0xb94   : > { %5010 = vmatmul.mubr.msk.f32.vlgmr.msra.gmra.mrb[20].mxu0 %vm7202_vm14, %v2483_v24  ;;  %vm7215_vm14 = vmmov %vm7173_vm0  ;;  %v2501_v24 = vld [vmem:[%s7146_s9 + $0x98] sm:$0xff] }
 0xb95   : > { %5012 = vmatprep.mubr.msk.f32.mxu0 %vm7203_vm12, %v2484_v11  ;;  %vm7216_vm12 = vmmov %vm7173_vm0  ;;  %v6787_v11 = vld [vmem:[%s7148_s11] sm:$0xff] }
 0xb98   : > { %5013 = vmatmul.mubr.msk.f32.gmra.mrb[22].mxu0 %vm7204_vm15, %v2485_v12  ;;  %vm7217_vm15 = vmmov %vm7173_vm0 }
 0xb99   : > { %5015 = vmatprep.mubr.msk.f32.mxu0 %vm7205_vm2, %v2486_v13  ;;  %vm3026_vm2 = vcmask 102400  }
 0xb9c   : > { %5016 = vmatmul.mubr.msk.f32.gmra.mrb[24].mxu0 %vm7206_vm3, %v2487_v14  ;;  %vm7218_vm3 = vmmov %vm7173_vm0 }
 0xb9d   : > { %5018 = vmatprep.mubr.msk.f32.mxu0 %vm7207_vm4, %v2488_v15  ;;  %vm7219_vm4 = vmmov %vm7173_vm0 }
 0xba0   : > { %5019 = vmatmul.mubr.msk.f32.gmra.mrb[26].mxu0 %vm7208_vm1, %v2489_v9  ;;  %vm7220_vm1 = vmmov %vm7173_vm0 }
 0xba1   : > { %5021 = vmatprep.mubr.msk.f32.mxu0 %vm7209_vm5, %v2490_v18  ;;  %vm7221_vm5 = vmmov %vm7173_vm0 }
 0xba4   : > { %5022 = vmatmul.mubr.msk.f32.gmra.mrb[28].mxu0 %vm7210_vm8, %v2491_v19  ;;  %vm7222_vm8 = vmmov %vm7173_vm0 }
 0xba5   : > { %5024 = vmatprep.mubr.msk.f32.mxu0 %vm7173_vm0, %v2492_v20 }
 0xba8   : > { %5025 = vmatmul.mubr.msk.f32.gmra.mrb[30].mxu0 %vm7211_vm7, %v2493_v8  ;;  %vm6907_vm7 = vmpackc.low %vm2080_vm6, %vm2080_vm6 }
 0xba9   : > { %5027 = vmatprep.mubr.msk.f32.mxu0 %vm7212_vm10, %v2494_v52  ;;  %v6860_v52 = vld [vmem:[%s7148_s11 + $0x8] sm:$0xff] }
 0xbac   : > { %5028 = vmatmul.mubr.msk.f32.gmra.mrb[32].mxu0 %vm7213_vm11, %v2495_v54  ;;  %v6865_v54 = vld [vmem:[%s7148_s11 + $0x10] sm:$0xff] }
 0xbad   : > { %5030 = vmatprep.mubr.msk.f32.mxu0 %vm7214_vm13, %v2496_v55  ;;  %v2519_v55 = vld [vmem:[%s7147_s10 + $0x68] sm:$0xff] }
 0xbb0   : > { %5031 = vmatmul.mubr.msk.f32.gmra.mrb[34].mxu0 %vm7215_vm14, %v2497_v7  ;;  %v6875_v7 = vld [vmem:[%s7148_s11 + $0x20] sm:$0xff] }
 0xbb1   : > { %5033 = vmatprep.mubr.msk.f32.mxu0 %vm7216_vm12, %v2498_v56  ;;  %v6881_v56 = vld [vmem:[%s7148_s11 + $0x30] sm:$0xff] }
 0xbb4   : > { %5034 = vmatmul.mubr.msk.f32.gmra.mrb[36].mxu0 %vm7217_vm15, %v2499_v60  ;;  %v6887_v60 = vld [vmem:[%s7148_s11 + $0x18] sm:$0xff] }
 0xbb5   : > { %5036 = vmatprep.mubr.msk.f32.mxu0 %vm7218_vm3, %v2500_v17 }
 0xbb8   : > { %5037 = vmatmul.mubr.msk.f32.gmra.mrb[38].mxu0 %vm7219_vm4, %v2501_v24 }
 0xc67   : > { %v5011_v22 = vpop.f32.mrb[20].mxu0 }
 0xc68   : > { %v2788_v23 = vpop.f32.mrb[21].mxu0  ;;  %v2794_v29 = vadd.f32 %v5011_v22, %v2538_v21 }
 0xc69   : > { %v2789_v2 = vadd.f32 %v2788_v23, %v2533_v1  ;;  %v2523_v1 = vld [vmem:[%s7147_s10 + $0x88] sm:$0xff] }
 0xc6b   : > { %v5014_v25 = vpop.f32.mrb[22].mxu0  ;;  %2907 = vxpose.xlu1.b32.start [1/2] (short) (narrow) %v2789_v2, 16 }
 0xc6c   : > { %v2798_v28 = vpop.f32.mrb[23].mxu0  ;;  %v2804_v16 = vadd.f32 %v5014_v25, %v2548_v58  ;;  %v2522_v58 = vld [vmem:[%s7147_s10 + $0x80] sm:$0xff] }
 0xc6d   : > { %v2799_v57 = vadd.f32 %v2798_v28, %v2543_v26  ;;  %v2502_v28 = vld [vmem:[%s7146_s9 + $0xa0] sm:$0xff] }
 0xc6e   : > { %5039 = vmatprep.mubr.msk.f32.mxu0 %vm7220_vm1, %v2502_v28 }
 0xc6f   : > { %3141 = vxpose.xlu0.b32.start [1/2] (short) (narrow) %v2799_v57, 16  ;;  %2908 = vxpose.xlu1.b32.end [2/2] (short) (narrow) %v2794_v29, 16  ;;  %v6736_v32 = vpop.f32.mrb[24].mxu0  ;;  %v2503_v29 = vld [vmem:[%s7146_s9 + $0xa8] sm:$0xff] }
 0xc70   : > { %v6738_v33 = vpop.f32.mrb[25].mxu0  ;;  %5040 = vmatmul.mubr.msk.f32.gmra.mrb[40].mxu0 %vm7221_vm5, %v2503_v29 }
 0xc73   : > { %3142 = vxpose.xlu0.b32.end [2/2] (short) (narrow) %v2804_v16, 16  ;;  %v6740_v34 = vpop.f32.mrb[26].mxu0  ;;  %v2504_v16 = vld [vmem:[%s7146_s9 + $0xb0] sm:$0xff] }
 0xc74   : > { %v6742_v35 = vpop.f32.mrb[27].mxu0  ;;  %5042 = vmatprep.mubr.msk.f32.mxu0 %vm7222_vm8, %v2504_v16 }
 0xc77   : > { %v5023_v38 = vpop.f32.mrb[28].mxu0 }
 0xc78   : > { %v2834_v0 = vadd.f32 %v5023_v38, %v2578_v36  ;;  %v2828_v39 = vpop.f32.mrb[29].mxu0  ;;  %v2505_v36 = vld [vmem:[%s7146_s9 + $0xb8] sm:$0xff] }
 0xc79   : > { %v2829_v40 = vadd.f32 %v2828_v39, %v2573_v37  ;;  %5043 = vmatmul.mubr.msk.f32.gmra.mrb[42].mxu0 %vm7173_vm0, %v2505_v36 }
 0xc7b   : > { %v5325_v42 = vpack.c.bf16 %v2834_v0, %v2829_v40  ;;  %v5026_v43 = vpop.f32.mrb[30].mxu0 }
 0xc7c   : > { %v2844_v45 = vadd.f32 %v5026_v43, %v2588_v41  ;;  %v2838_v46 = vpop.f32.mrb[31].mxu0 }
 0xc7d   : > { %v2839_v47 = vadd.f32 %v2838_v46, %v2583_v44  ;;  %5326 = vmatprep.subr.bf16.mxu1 %v5325_v42  ;;  %v2524_v46 = vld [vmem:[%s7147_s10 + $0x90] sm:$0xff] }
 0xc7e   : > { %5328 = vmatpush3.bf16.msra.mxu1 %v5325_v42 }
 0xc7f   : > { %v5335_v30 = vpack.c.bf16 %v2844_v45, %v2839_v47  ;;  %v6791_v12 = vpop.f32.mrb[32].mxu0 }
 0xc80   : > { %v6804_v23 = vpop.f32.mrb[33].mxu0 }
 0xc81   : > { %5336 = vmatprep.subr.bf16.mxu1 %v5335_v30 }
 0xc83   : > { %v6806_v2 = vpop.f32.mrb[34].mxu0 }
 0xc84   : > { %v6808_v25 = vpop.f32.mrb[35].mxu0 }
 0xc87   : > { %v6810_v26 = vpop.f32.mrb[36].mxu0 }
 0xc88   : > { %v2868_v57 = vpop.f32.mrb[37].mxu0 }
 0xc8b   : > { %v6842_v47 = vpop.f32.mrb[38].mxu0 }
 0xceb   : > { %v2923_v49 = vpop.trf.xlu1 }
 0xcec   : > { %5049 = vmatprep.mubr.msk.f32.mxu1 %vm2939_vm9, %v2923_v49  ;;  %v2878_v49 = vpop.f32.mrb[39].mxu0 }
 0xcef   : > { %v2924_v50 = vpop.trf.xlu1  ;;  %v3157_v51 = vpop.trf.xlu0 }
 0xcf0   : > { %5050 = vmatmul.mubr.msk.f32.vlgmr.msra.gmra.mrb[22].mxu1 %vm2939_vm9, %v2924_v50  ;;  %v2525_v50 = vld [vmem:[%s7147_s10 + $0x98] sm:$0xff] }
 0xcf1   : > { %5338 = vmatpush3.bf16.msra.mxu1 %v5335_v30  ;;  %5063 = vmatprep.mubr.msk.f32.mxu1 %vm2939_vm9, %v3157_v51  ;;  %v2510_v30 = vld [vmem:[%s7147_s10 + $0x20] sm:$0xff]  ;;  %v2511_v51 = vld [vmem:[%s7147_s10 + $0x28] sm:$0xff] }
 0xcf3   : > { %v3158_v61 = vpop.trf.xlu0 }
 0xcf4   : > { %5064 = vmatmul.mubr.msk.f32.vlgmr.msra.gmra.mrb[24].mxu1 %vm2939_vm9, %v3158_v61  ;;  %v2518_v61 = vld [vmem:[%s7147_s10 + $0x60] sm:$0xff] }
 0xcf5   : > { %5093 = vmatprep.mubr.msk.f32.mxu1 %vm2939_vm9, %v6787_v11 }
 0xdc3   : > { %v5051_v31 = vpop.f32.mrb[22].mxu1 }
 0xdc4   : > { %v3022_v53 = vmul.f32 0.25, %v5051_v31  ;;  %v3012_v3 = vpop.f32.mrb[23].mxu1  ;;  %v6893_v31 = vld [vmem:[%s7148_s11 + $0x28] sm:$0xff] }
 0xdc5   : > { %v3021_v48 = vmul.f32 0.25, %v3012_v3 }
 0xdc6   : > { %v3027_v59 = vsel %vm3026_vm2, %v3022_v53, -inf }
 0xdc7   : > { %3028 = vmax.xlane.f32.xlu1 %v3027_v59  ;;  %v5065_v62 = vpop.f32.mrb[24].mxu1  ;;  %v3023_v4 = vsel %vm2080_vm6, %v3021_v48, -inf }
 0xdc8   : > { %v3255_v5 = vmul.f32 0.25, %v5065_v62  ;;  %3024 = vmax.xlane.f32.xlu0 %v3023_v4  ;;  %v3245_v6 = vpop.f32.mrb[25].mxu1 }
 0xdc9   : > { %v3254_v10 = vmul.f32 0.25, %v3245_v6 }
 0xdca   : > { %v3259_v63 = vsel %vm3026_vm2, %v3255_v5, -inf }
 0xdcb   : > { %3260 = vmax.xlane.f32.xlu1 %v3259_v63  ;;  %v3256_v27 = vsel %vm2080_vm6, %v3254_v10, -inf }
 0xdcc   : > { %3257 = vmax.xlane.f32.xlu0 %v3256_v27 }
 0xe54   : > { %v3029_v13 = vpop.xlane.xlu1 %3028 }
 0xe55   : > { %v3031_v14 = vsub.f32 %v3022_v53, %v3029_v13  ;;  %v3025_v15 = vpop.xlane.xlu0 %3024  ;;  %v6899_v53 = vld [vmem:[%s7148_s11 + $0x38] sm:$0xff] }
 0xe56   : > { %v3030_v9 = vsub.f32 %v3021_v48, %v3025_v15 }
 0xe57   : > { %v3034_v18 = vmul.f32 1.442695, %v3031_v14 }
 0xe58   : > { %v3032_v19 = vmul.f32 1.442695, %v3030_v9  ;;  %v3261_v37 = vpop.xlane.xlu1 %3260 }
 0xe59   : > { %5680 = vpow2.f32 %v3034_v18  ;;  %v3258_v38 = vpop.xlane.xlu0 %3257  ;;  %v3263_v0 = vsub.f32 %v3255_v5, %v3261_v37 }
 0xe5a   : > { %5682 = vpow2.f32 %v3032_v19  ;;  %v3262_v39 = vsub.f32 %v3254_v10, %v3258_v38 }
 0xe5b   : > { %v3266_v40 = vmul.f32 1.442695, %v3263_v0 }
 0xe5c   : > { %v3264_v41 = vmul.f32 1.442695, %v3262_v39  ;;  %v6934_v39 = vpop.f32.mrb[40].mxu0 }
 0xe5d   : > { %5684 = vpow2.f32 %v3266_v40  ;;  %v6936_v40 = vpop.f32.mrb[41].mxu0 }
 0xe5e   : > { %5686 = vpow2.f32 %v3264_v41  ;;  %v6938_v41 = vpop.f32.mrb[42].mxu0 }
 0xe63   : > { %v6793_v20 = vpop.eup %5680 }
 0xe64   : > { %v6795_v8 = vpop.eup %5682  ;;  %v3039_v21 = vsel %vm3026_vm2, %v6793_v20, 0.0 }
 0xe65   : > { %3040 = vadd.xlane.f32.xlu1 %v3039_v21  ;;  %v3036_v22 = vsel %vm2080_vm6, %v6795_v8, 0.0 }
 0xe66   : > { %3037 = vadd.xlane.f32.xlu0 %v3036_v22 }
 0xe67   : > { %v6831_v42 = vpop.eup %5684 }
 0xe68   : > { %v6833_v43 = vpop.eup %5686  ;;  %v3271_v44 = vsel %vm3026_vm2, %v6831_v42, 0.0 }
 0xe69   : > { %v3268_v45 = vsel %vm2080_vm6, %v6833_v43, 0.0 }
 0xe76   : > { %2617 = vperm.xlu1 %5515, %v2523_v1  }
 0xe7c   : > { %2612 = vperm.xlu0 %5514, %v2522_v58  }
 0xe9a   : > { %3272 = vadd.xlane.f32.xlu1 %v3271_v44 }
 0xe9b   : > { %3269 = vadd.xlane.f32.xlu0 %v3268_v45 }
 0xeab   : > { %2622 = vperm.xlu1 %5515, %v2524_v46  }
 0xeaf   : > { %2552 = vperm.xlu1 %5515, %v2510_v30  }
 0xeb1   : > { %2627 = vperm.xlu0 %5514, %v2525_v50  }
 0xeb3   : > { %3373 = vrot.lane.b32.xlu1 %v6787_v11, %s5770_s16 }
 0xeb5   : > { %2557 = vperm.xlu0 %5514, %v2511_v51  }
 0xeb7   : > { %2592 = vperm.xlu1 %5515, %v2518_v61  }
 0xeb9   : > { %3375 = vrot.lane.b32.xlu0 %v6860_v52, %s5770_s16 }
 0xebb   : > { %3377 = vrot.lane.b32.xlu1 %v6865_v54, %s5770_s16 }
 0xebd   : > { %2597 = vperm.xlu0 %5514, %v2519_v55  }
 0xebf   : > { %3381 = vrot.lane.b32.xlu1 %v6875_v7, %s5770_s16 }
 0xec1   : > { %3379 = vrot.lane.b32.xlu0 %v6887_v60, %s5770_s16 }
 0xec3   : > { %3385 = vrot.lane.b32.xlu1 %v6881_v56, %s5770_s16 }
 0xec5   : > { %3383 = vrot.lane.b32.xlu0 %v6893_v31, %s5770_s16 }
 0xec9   : > { %3387 = vrot.lane.b32.xlu0 %v6899_v53, %s5770_s16  ;;  %s5772_s16 = smov 80  }
 0xef2   : > { %v3041_v3 = vpop.xlane.xlu1 %3040 }
 0xef3   : > { %5688 = vrcp.f32 %v3041_v3  ;;  %v3038_v48 = vpop.xlane.xlu0 %3037 }
 0xef4   : > { %5690 = vrcp.f32 %v3038_v48 }
 0xef6   : > { %v2618_v17 = vpop.permute.xlu1 %2617 }
 0xef7   : > { %v2874_v24 = vadd.f32 %v6810_v26, %v2618_v17 }
 0xefb   : > { %v2613_v59 = vpop.permute.xlu0 %2612 }
 0xefc   : > { %v2869_v62 = vadd.f32 %v2868_v57, %v2613_v59 }
 0xefd   : > { %v5689_v4 = vpop.eup %5688 }
 0xefe   : > { %v5691_v5 = vpop.eup %5690  ;;  %5056 = vmatprep.mubr.msk.f32.mxu0 %vm2080_vm6, %v2869_v62  ;;  %v3045_v6 = vmul.f32 %v5689_v4, %v6793_v20 }
 0xeff   : > { %v3044_v10 = vmul.f32 %v5691_v5, %v6795_v8 }
 0xf01   : > { %v5329_v27 = vpack.c.bf16 %v3045_v6, %v3044_v10 }
 0xf03   : > { %5331 = vmatprep.subr.msk.bf16.mxu0 %vm6907_vm7, %v5329_v27 }
 0xf04   : > { %5334 = vmatpush3.bf16.xpose.msk.msra.mxu0 %vm6907_vm7, %v5329_v27 }
 0xf0b   : > { %5057 = vmatmul.mubr.msk.f32.vlgmr.msra.gmra.mrb[44].mxu0 %vm2080_vm6, %v2874_v24 }
 0xf27   : > { %v3273_v13 = vpop.xlane.xlu1 %3272 }
 0xf28   : > { %5692 = vrcp.f32 %v3273_v13  ;;  %v3270_v14 = vpop.xlane.xlu0 %3269 }
 0xf29   : > { %5694 = vrcp.f32 %v3270_v14 }
 0xf2b   : > { %v2623_v15 = vpop.permute.xlu1 %2622 }
 0xf2c   : > { %v2879_v9 = vadd.f32 %v2878_v49, %v2623_v15 }
 0xf2e   : > { %5070 = vmatprep.mubr.msk.f32.mxu0 %vm2080_vm6, %v2879_v9 }
 0xf2f   : > { %v2553_v18 = vpop.permute.xlu1 %2552 }
 0xf30   : > { %v2809_v19 = vadd.f32 %v6738_v33, %v2553_v18  ;;  %v2628_v20 = vpop.permute.xlu0 %2627  ;;  %v2512_v18 = vld [vmem:[%s7147_s10 + $0x30] sm:$0xff] }
 0xf31   : > { %v2884_v38 = vadd.f32 %v6842_v47, %v2628_v20  ;;  %v2526_v20 = vld [vmem:[%s7147_s10 + $0xa0] sm:$0xff] }
 0xf32   : > { %v5693_v8 = vpop.eup %5692  ;;  %3631 = vxpose.xlu1.b32.start [1/2] (short) (narrow) %v2809_v19, 16  ;;  %v2520_v19 = vld [vmem:[%s7147_s10 + $0x70] sm:$0xff] }
 0xf33   : > { %v5695_v21 = vpop.eup %5694  ;;  %v3277_v22 = vmul.f32 %v5693_v8, %v6831_v42  ;;  %v3374_v1 = vpop.permute.xlu1 %3373 }
 0xf34   : > { %v2558_v26 = vpop.permute.xlu0 %2557  ;;  %v3276_v28 = vmul.f32 %v5695_v21, %v6833_v43 }
 0xf35   : > { %v2814_v29 = vadd.f32 %v6736_v32, %v2558_v26  ;;  %v2513_v32 = vld [vmem:[%s7147_s10 + $0x38] sm:$0xff] }
 0xf36   : > { %v5339_v57 = vpack.c.bf16 %v3277_v22, %v3276_v28 }
 0xf37   : > { %3632 = vxpose.xlu1.b32.end [2/2] (short) (narrow) %v2814_v29, 16  ;;  %v2593_v33 = vpop.permute.xlu1 %2592 }
 0xf38   : > { %5341 = vmatprep.subr.msk.bf16.mxu0 %vm6907_vm7, %v5339_v57  ;;  %v3376_v58 = vpop.permute.xlu0 %3375  ;;  %v2849_v36 = vadd.f32 %v6804_v23, %v2593_v33  ;;  %v6940_v23 = vpop.f32.mrb[43].mxu0 }
 0xf39   : > { %5344 = vmatpush3.bf16.xpose.msk.msra.mxu0 %vm6907_vm7, %v5339_v57 }
 0xf3b   : > { %v3378_v44 = vpop.permute.xlu1 %3377 }
 0xf3c   : > { %v2598_v16 = vpop.permute.xlu0 %2597 }
 0xf3d   : > { %v2854_v37 = vadd.f32 %v6791_v12, %v2598_v16 }
 0xf3f   : > { %v5353_v0 = vpack.c.bf16 %v2854_v37, %v2849_v36  ;;  %v3382_v30 = vpop.permute.xlu1 %3381 }
 0xf40   : > { %5071 = vmatmul.mubr.msk.f32.vlgmr.msra.gmra.mrb[46].mxu0 %vm2080_vm6, %v2884_v38  ;;  %v3380_v49 = vpop.permute.xlu0 %3379 }
 0xf41   : > { %5077 = vmatprep.mubr.msk.f32.mxu0 %vm2939_vm9, %v3374_v1 }
 0xf43   : > { %v3386_v50 = vpop.permute.xlu1 %3385 }
 0xf44   : > { %v3384_v51 = vpop.permute.xlu0 %3383 }
 0xf48   : > { %v3388_v55 = vpop.permute.xlu0 %3387 }
 0xf55   : > { %2567 = vperm.xlu1 %5515, %v2513_v32   ;;  %v2521_v32 = vld [vmem:[%s7147_s10 + $0x78] sm:$0xff] }
 0xfb3   : > { %v3647_v61 = vpop.trf.xlu1 }
 0xfb7   : > { %v3648_v3 = vpop.trf.xlu1 }
 0xfde   : > { %v5058_v12 = vpop.f32.mrb[44].mxu0 }
 0xfdf   : > { %v3124_v42 = vpop.f32.mrb[45].mxu0 }
 0xfe0   : > { %v5349_v43 = vpack.c.bf16 %v5058_v12, %v3124_v42  ;;  %v2527_v12 = vld [vmem:[%s7147_s10 + $0xa8] sm:$0xff]  ;;  %v2568_v42 = vpop.permute.xlu1 %2567 }
 0xfe2   : > { %5350 = vmatprep.subr.bf16.mxu1 %v5349_v43 }
 0xfe3   : > { %5352 = vmatpush3.bf16.msra.mxu1 %v5349_v43  ;;  %v2824_v43 = vadd.f32 %v6740_v34, %v2568_v42 }
 0xfe6   : > { %5094 = vmatmul.mubr.msk.f32.vlgmr.msra.gmra.mrb[26].mxu1 %vm2939_vm9, %v6860_v52 }
 0xfe7   : > { %5096 = vmatprep.mubr.msk.f32.mxu1 %vm2939_vm9, %v6865_v54 }
 0xfea   : > { %5097 = vmatmul.mubr.msk.f32.gmra.mrb[28].mxu1 %vm2939_vm9, %v6887_v60 }
 0xfeb   : > { %5099 = vmatprep.mubr.msk.f32.mxu1 %vm2939_vm9, %v6875_v7 }
 0xfee   : > { %5100 = vmatmul.mubr.msk.f32.gmra.mrb[30].mxu1 %vm2939_vm9, %v6893_v31 }
 0xfef   : > { %5102 = vmatprep.mubr.msk.f32.mxu1 %vm2939_vm9, %v6881_v56 }
 0xff2   : > { %5103 = vmatmul.mubr.msk.f32.gmra.mrb[32].mxu1 %vm2939_vm9, %v6899_v53 }
0x1013   : > { %v5072_v45 = vpop.f32.mrb[46].mxu0 }
0x1014   : > { %v3356_v46 = vpop.f32.mrb[47].mxu0 }
0x1015   : > { %v5345_v47 = vpack.c.bf16 %v5072_v45, %v3356_v46 }
0x1017   : > { %5346 = vmatprep.subr.bf16.mxu0 %v5345_v47 }
0x1018   : > { %5348 = vmatpush3.bf16.msra.mxu0 %v5345_v47 }
0x1019   : > { %5354 = vmatprep.subr.bf16.mxu0 %v5353_v0 }
0x101b   : > { %5078 = vmatmul.mubr.msk.f32.vlgmr.msra.gmra.mrb[48].mxu0 %vm2939_vm9, %v3376_v58 }
0x101c   : > { %5080 = vmatprep.mubr.msk.f32.mxu0 %vm2939_vm9, %v3378_v44  ;;  %5356 = vmatpush3.bf16.msra.mxu0 %v5353_v0 }
0x101f   : > { %5081 = vmatmul.mubr.msk.f32.gmra.mrb[50].mxu0 %vm2939_vm9, %v3380_v49 }
0x1020   : > { %5083 = vmatprep.mubr.msk.f32.mxu0 %vm2939_vm9, %v3382_v30 }
0x1023   : > { %5084 = vmatmul.mubr.msk.f32.gmra.mrb[52].mxu0 %vm2939_vm9, %v3384_v51 }
0x1024   : > { %5086 = vmatprep.mubr.msk.f32.mxu0 %vm2939_vm9, %v3386_v50 }
0x1027   : > { %5087 = vmatmul.mubr.msk.f32.gmra.mrb[54].mxu0 %vm2939_vm9, %v3388_v55 }
0x1028   : > { %5109 = vmatprep.mubr.msk.f32.mxu0 %vm2939_vm9, %v3647_v61 }
0x102b   : > { %5110 = vmatmul.mubr.msk.f32.vlgmr.msra.gmra.mrb[56].mxu0 %vm2939_vm9, %v3648_v3 }
0x10ee   : > { %v6965_v48 = vpop.f32.mrb[48].mxu0 }
0x10ef   : > { %v6967_v59 = vpop.f32.mrb[49].mxu0 }
0x10f2   : > { %v6969_v62 = vpop.f32.mrb[50].mxu0 }
0x10f3   : > { %v6971_v4 = vpop.f32.mrb[51].mxu0 }
0x10f6   : > { %v6973_v5 = vpop.f32.mrb[52].mxu0 }
0x10f7   : > { %v6975_v6 = vpop.f32.mrb[53].mxu0 }
0x10fa   : > { %v6977_v10 = vpop.f32.mrb[54].mxu0 }
0x10fb   : > { %v6979_v27 = vpop.f32.mrb[55].mxu0 }
0x10fe   : > { %v5111_v17 = vpop.f32.mrb[56].mxu0 }
0x10ff   : > { %v3735_v24 = vpop.f32.mrb[57].mxu0  ;;  %v3745_v14 = vmul.f32 0.25, %v5111_v17 }
0x1100   : > { %v3744_v13 = vmul.f32 0.25, %v3735_v24 }
0x1101   : > { %v3749_v9 = vsel %vm3026_vm2, %v3745_v14, -inf }
0x1102   : > { %v3746_v15 = vsel %vm2080_vm6, %v3744_v13, -inf }
0x1103   : > { %3747 = vmax.xlane.f32.xlu0 %v3746_v15 }
0x1107   : > { %3750 = vmax.xlane.f32.xlu0 %v3749_v9 }
0x111d   : > { %2562 = vperm.xlu0 %5514, %v2512_v18  }
0x1121   : > { %2602 = vperm.xlu0 %5514, %v2520_v19   ;;  %v2528_v19 = vld [vmem:[%s7147_s10 + $0xb0] sm:$0xff] }
0x1125   : > { %2632 = vperm.xlu0 %5514, %v2526_v20   ;;  %v4370_v20 = vld [vmem:[%s7149_s12 + $0x8] sm:$0xff] }
0x1190   : > { %v3748_v8 = vpop.xlane.xlu0 %3747 }
0x1191   : > { %v3752_v21 = vsub.f32 %v3744_v13, %v3748_v8  ;;  %v4372_v8 = vld [vmem:[%s7149_s12 + $0x18] sm:$0xff] }
0x1193   : > { %v3754_v22 = vmul.f32 1.442695, %v3752_v21  ;;  %v4374_v21 = vld [vmem:[%s7149_s12 + $0x28] sm:$0xff] }
0x1194   : > { %v3751_v1 = vpop.xlane.xlu0 %3750 }
0x1195   : > { %5696 = vpow2.f32 %v3754_v22  ;;  %v3753_v26 = vsub.f32 %v3745_v14, %v3751_v1  ;;  %v4376_v22 = vld [vmem:[%s7149_s12 + $0x38] sm:$0xff] }
0x1197   : > { %v3756_v28 = vmul.f32 1.442695, %v3753_v26 }
0x1199   : > { %5698 = vpow2.f32 %v3756_v28 }
0x119c   : > { %v2563_v29 = vpop.permute.xlu0 %2562 }
0x119f   : > { %v5697_v57 = vpop.eup %5696 }
0x11a0   : > { %v2603_v58 = vpop.permute.xlu0 %2602  ;;  %v3758_v33 = vsel %vm2080_vm6, %v5697_v57, 0.0 }
0x11a1   : > { %v2859_v16 = vadd.f32 %v6808_v25, %v2603_v58  ;;  %3759 = vadd.xlane.f32.xlu0 %v3758_v33  ;;  %v2819_v25 = vadd.f32 %v6742_v35, %v2563_v29 }
0x11a3   : > { %v5699_v36 = vpop.eup %5698 }
0x11a4   : > { %v2633_v37 = vpop.permute.xlu0 %2632  ;;  %v3761_v38 = vsel %vm3026_vm2, %v5699_v36, 0.0 }
0x11a5   : > { %v2889_v0 = vadd.f32 %v6936_v40, %v2633_v37  ;;  %3762 = vadd.xlane.f32.xlu1 %v3761_v38 }
0x11a7   : > { %5116 = vmatprep.mubr.msk.f32.mxu0 %vm2080_vm6, %v2889_v0 }
0x11b6   : > { %2607 = vperm.xlu1 %5515, %v2521_v32   ;;  %v2529_v32 = vld [vmem:[%s7147_s10 + $0xb8] sm:$0xff] }
0x11b7   : > { %2637 = vperm.xlu0 %5514, %v2527_v12  }
0x11d5   : > { %4000 = vxpose.xlu0.b32.start [1/2] (short) (narrow) %v2819_v25, 16 }
0x11d9   : > { %4001 = vxpose.xlu0.b32.end [2/2] (short) (narrow) %v2824_v43, 16 }
0x122e   : > { %v3760_v40 = vpop.xlane.xlu0 %3759 }
0x122f   : > { %5700 = vrcp.f32 %v3760_v40 }
0x1232   : > { %v3763_v44 = vpop.xlane.xlu1 %3762 }
0x1233   : > { %5702 = vrcp.f32 %v3763_v44 }
0x1236   : > { %v2608_v45 = vpop.permute.xlu1 %2607  ;;  %v2638_v34 = vpop.permute.xlu0 %2637 }
0x1237   : > { %v2864_v46 = vadd.f32 %v6806_v2, %v2608_v45  ;;  %v2894_v35 = vadd.f32 %v6934_v39, %v2638_v34 }
0x1239   : > { %v5367_v47 = vpack.c.bf16 %v2864_v46, %v2859_v16  ;;  %v5701_v30 = vpop.eup %5700 }
0x123a   : > { %v3766_v50 = vmul.f32 %v5701_v30, %v5697_v57 }
0x123d   : > { %v5703_v49 = vpop.eup %5702 }
0x123e   : > { %v3767_v51 = vmul.f32 %v5703_v49, %v5699_v36 }
0x1240   : > { %v5357_v61 = vpack.c.bf16 %v3767_v51, %v3766_v50 }
0x1242   : > { %5359 = vmatprep.subr.msk.bf16.mxu0 %vm6907_vm7, %v5357_v61 }
0x1243   : > { %5362 = vmatpush3.bf16.xpose.msk.msra.mxu0 %vm6907_vm7, %v5357_v61 }
0x1244   : > { %5368 = vmatprep.subr.bf16.mxu0 %v5367_v47 }
0x124a   : > { %5117 = vmatmul.mubr.msk.f32.vlgmr.msra.gmra.mrb[58].mxu0 %vm2080_vm6, %v2894_v35 }
0x124b   : > { %5370 = vmatpush3.bf16.msra.mxu0 %v5367_v47 }
0x1255   : > { %v4016_v2 = vpop.trf.xlu0 }
0x1256   : > { %5139 = vmatprep.mubr.msk.f32.mxu0 %vm2939_vm9, %v4016_v2 }
0x1259   : > { %v4017_v55 = vpop.trf.xlu0 }
0x125a   : > { %5140 = vmatmul.mubr.msk.f32.vlgmr.msra.gmra.mrb[60].mxu0 %vm2939_vm9, %v4017_v55 }
0x131d   : > { %v5118_v3 = vpop.f32.mrb[58].mxu0 }
0x131e   : > { %v3846_v17 = vpop.f32.mrb[59].mxu0 }
0x131f   : > { %v5363_v24 = vpack.c.bf16 %v5118_v3, %v3846_v17 }
0x1321   : > { %5364 = vmatprep.subr.bf16.mxu1 %v5363_v24 }
0x1322   : > { %5366 = vmatpush3.bf16.msra.mxu1 %v5363_v24 }
0x132d   : > { %v5141_v13 = vpop.f32.mrb[60].mxu0 }
0x132e   : > { %v4114_v14 = vmul.f32 0.25, %v5141_v13  ;;  %v4104_v15 = vpop.f32.mrb[61].mxu0 }
0x132f   : > { %v4113_v9 = vmul.f32 0.25, %v4104_v15 }
0x1330   : > { %v4118_v39 = vsel %vm3026_vm2, %v4114_v14, -inf }
0x1331   : > { %4119 = vmax.xlane.f32.xlu0 %v4118_v39  ;;  %v4115_v18 = vsel %vm2080_vm6, %v4113_v9, -inf }
0x1332   : > { %4116 = vmax.xlane.f32.xlu1 %v4115_v18 }
0x1343   : > { %2642 = vperm.xlu1 %5515, %v2528_v19  }
0x1347   : > { %3859 = vrot.lane.b32.xlu0 %v6865_v54, %s5771_s22 }
0x134b   : > { %4226 = vrot.lane.b32.xlu0 %v6860_v52, %s5772_s16 }
0x134f   : > { %4230 = vrot.lane.b32.xlu0 %v6887_v60, %s5772_s16 }
0x1353   : > { %4234 = vrot.lane.b32.xlu0 %v6893_v31, %s5772_s16 }
0x1357   : > { %4238 = vrot.lane.b32.xlu0 %v6899_v53, %s5772_s16 }
0x135b   : > { %4384 = vperm.xlu0 %5514, %v4370_v20  }
0x135f   : > { %4394 = vperm.xlu0 %5514, %v4372_v8  }
0x1363   : > { %4404 = vperm.xlu0 %5514, %v4374_v21  }
0x1367   : > { %4414 = vperm.xlu0 %5514, %v4376_v22  }
0x13be   : > { %v4120_v1 = vpop.xlane.xlu0 %4119 }
0x13bf   : > { %v4122_v26 = vsub.f32 %v4114_v14, %v4120_v1  ;;  %v4117_v28 = vpop.xlane.xlu1 %4116 }
0x13c0   : > { %v4121_v29 = vsub.f32 %v4113_v9, %v4117_v28 }
0x13c1   : > { %v4125_v57 = vmul.f32 1.442695, %v4122_v26 }
0x13c2   : > { %v4123_v58 = vmul.f32 1.442695, %v4121_v29  ;;  %v3860_v40 = vpop.permute.xlu0 %3859 }
0x13c3   : > { %5704 = vpow2.f32 %v4125_v57  ;;  %v2643_v33 = vpop.permute.xlu1 %2642 }
0x13c4   : > { %v2899_v16 = vadd.f32 %v6940_v23, %v2643_v33  ;;  %5706 = vpow2.f32 %v4123_v58 }
0x13c6   : > { %5146 = vmatprep.mubr.msk.f32.mxu0 %vm2080_vm6, %v2899_v16  ;;  %v4227_v61 = vpop.permute.xlu0 %4226 }
0x13cd   : > { %v5705_v36 = vpop.eup %5704 }
0x13ce   : > { %v4130_v37 = vsel %vm3026_vm2, %v5705_v36, 0.0  ;;  %v5707_v38 = vpop.eup %5706 }
0x13cf   : > { %4131 = vadd.xlane.f32.xlu1 %v4130_v37  ;;  %v4127_v0 = vsel %vm2080_vm6, %v5707_v38, 0.0 }
0x13d3   : > { %4128 = vadd.xlane.f32.xlu1 %v4127_v0 }
0x13e4   : > { %2647 = vperm.xlu1 %5515, %v2529_v32  }
0x13e8   : > { %3855 = vrot.lane.b32.xlu1 %v6787_v11, %s5771_s22 }
0x13ec   : > { %3857 = vrot.lane.b32.xlu1 %v6860_v52, %s5771_s22  ;;  %v4369_v52 = vld [vmem:[%s7149_s12] sm:$0xff] }
0x13f0   : > { %3861 = vrot.lane.b32.xlu1 %v6887_v60, %s5771_s22  ;;  %v4371_v60 = vld [vmem:[%s7149_s12 + $0x10] sm:$0xff] }
0x13f4   : > { %3863 = vrot.lane.b32.xlu1 %v6875_v7, %s5771_s22 }
0x13f8   : > { %3865 = vrot.lane.b32.xlu1 %v6893_v31, %s5771_s22 }
0x13fc   : > { %3867 = vrot.lane.b32.xlu1 %v6881_v56, %s5771_s22 }
0x1400   : > { %3869 = vrot.lane.b32.xlu1 %v6899_v53, %s5771_s22 }
0x1404   : > { %4224 = vrot.lane.b32.xlu1 %v6787_v11, %s5772_s16  ;;  %v4373_v11 = vld [vmem:[%s7149_s12 + $0x20] sm:$0xff] }
0x1408   : > { %4228 = vrot.lane.b32.xlu1 %v6865_v54, %s5772_s16  ;;  %v4375_v54 = vld [vmem:[%s7149_s12 + $0x30] sm:$0xff] }
0x140c   : > { %4232 = vrot.lane.b32.xlu1 %v6875_v7, %s5772_s16 }
0x1410   : > { %4236 = vrot.lane.b32.xlu1 %v6881_v56, %s5772_s16  ;;  %s4664_s16 = sshll.u32 %s7226_s26, 6 }
0x1411   : > { %s7109_s29 = scalar_lea.vmem %s7150_s13, %s4664_s16 }
0x1414   : > { %4379 = vperm.xlu1 %5515, %v4369_v52  }
0x1418   : > { %4389 = vperm.xlu1 %5515, %v4371_v60  }
0x141c   : > { %4399 = vperm.xlu1 %5515, %v4373_v11  }
0x1420   : > { %4409 = vperm.xlu1 %5515, %v4375_v54  }
0x145c   : > { %v4132_v7 = vpop.xlane.xlu1 %4131 }
0x145d   : > { %5708 = vrcp.f32 %v4132_v7 }
0x1460   : > { %v4129_v56 = vpop.xlane.xlu1 %4128 }
0x1461   : > { %5710 = vrcp.f32 %v4129_v56 }
0x1464   : > { %v2648_v31 = vpop.permute.xlu1 %2647 }
0x1465   : > { %v2904_v47 = vadd.f32 %v6938_v41, %v2648_v31  ;;  %v4231_v41 = vpop.permute.xlu0 %4230 }
0x1467   : > { %v5709_v23 = vpop.eup %5708 }
0x1468   : > { %v3856_v53 = vpop.permute.xlu1 %3855  ;;  %v4136_v43 = vmul.f32 %v5709_v23, %v5705_v36 }
0x1469   : > { %5123 = vmatprep.mubr.msk.f32.mxu1 %vm2939_vm9, %v3856_v53  ;;  %v4235_v3 = vpop.permute.xlu0 %4234 }
0x146b   : > { %v5711_v12 = vpop.eup %5710 }
0x146c   : > { %v3858_v25 = vpop.permute.xlu1 %3857  ;;  %v4135_v42 = vmul.f32 %v5711_v12, %v5707_v38 }
0x146d   : > { %5124 = vmatmul.mubr.msk.f32.vlgmr.msra.gmra.mrb[26].mxu1 %vm2939_vm9, %v3858_v25  ;;  %v4239_v24 = vpop.permute.xlu0 %4238 }
0x146e   : > { %v5371_v44 = vpack.c.bf16 %v4136_v43, %v4135_v42  ;;  %5126 = vmatprep.mubr.msk.f32.mxu1 %vm2939_vm9, %v3860_v40 }
0x1470   : > { %5373 = vmatprep.subr.msk.bf16.mxu0 %vm6907_vm7, %v5371_v44  ;;  %v3862_v45 = vpop.permute.xlu1 %3861 }
0x1471   : > { %5376 = vmatpush3.bf16.xpose.msk.msra.mxu0 %vm6907_vm7, %v5371_v44  ;;  %5127 = vmatmul.mubr.msk.f32.gmra.mrb[28].mxu1 %vm2939_vm9, %v3862_v45  ;;  %v4385_v13 = vpop.permute.xlu0 %4384 }
0x1474   : > { %v3864_v46 = vpop.permute.xlu1 %3863 }
0x1475   : > { %5129 = vmatprep.mubr.msk.f32.mxu1 %vm2939_vm9, %v3864_v46  ;;  %v4395_v18 = vpop.permute.xlu0 %4394 }
0x1478   : > { %5147 = vmatmul.mubr.msk.f32.vlgmr.msra.gmra.mrb[62].mxu0 %vm2080_vm6, %v2904_v47  ;;  %v3866_v30 = vpop.permute.xlu1 %3865 }
0x1479   : > { %5130 = vmatmul.mubr.msk.f32.gmra.mrb[30].mxu1 %vm2939_vm9, %v3866_v30  ;;  %v4405_v29 = vpop.permute.xlu0 %4404 }
0x147c   : > { %v3868_v49 = vpop.permute.xlu1 %3867 }
0x147d   : > { %5132 = vmatprep.mubr.msk.f32.mxu1 %vm2939_vm9, %v3868_v49  ;;  %v4415_v32 = vpop.permute.xlu0 %4414 }
0x1480   : > { %v3870_v50 = vpop.permute.xlu1 %3869 }
0x1481   : > { %5133 = vmatmul.mubr.msk.f32.gmra.mrb[32].mxu1 %vm2939_vm9, %v3870_v50 }
0x1484   : > { %v4225_v63 = vpop.permute.xlu1 %4224 }
0x1485   : > { %5153 = vmatprep.mubr.msk.f32.mxu1 %vm2939_vm9, %v4225_v63 }
0x1488   : > { %v4229_v2 = vpop.permute.xlu1 %4228 }
0x148c   : > { %v4233_v55 = vpop.permute.xlu1 %4232 }
0x1490   : > { %v4237_v17 = vpop.permute.xlu1 %4236 }
0x1494   : > { %v4380_v14 = vpop.permute.xlu1 %4379 }
0x1498   : > { %v4390_v20 = vpop.permute.xlu1 %4389 }
0x149c   : > { %v4400_v58 = vpop.permute.xlu1 %4399 }
0x14a0   : > { %v4410_v52 = vpop.permute.xlu1 %4409 }
0x154b   : > { %v5148_v51 = vpop.f32.mrb[62].mxu0 }
0x154c   : > { %v4215_v34 = vpop.f32.mrb[63].mxu0 }
0x154d   : > { %v5377_v35 = vpack.c.bf16 %v5148_v51, %v4215_v34 }
0x154f   : > { %5378 = vmatprep.subr.bf16.mxu1 %v5377_v35 }
0x1550   : > { %5380 = vmatpush3.bf16.msra.mxu1 %v5377_v35 }
0x1553   : > { %5154 = vmatmul.mubr.msk.f32.vlgmr.msra.gmra.mrb[26].mxu1 %vm2939_vm9, %v4227_v61 }
0x1554   : > { %5156 = vmatprep.mubr.msk.f32.mxu1 %vm2939_vm9, %v4229_v2 }
0x1557   : > { %5157 = vmatmul.mubr.msk.f32.gmra.mrb[28].mxu1 %vm2939_vm9, %v4231_v41 }
0x1558   : > { %5159 = vmatprep.mubr.msk.f32.mxu1 %vm2939_vm9, %v4233_v55 }
0x155b   : > { %5160 = vmatmul.mubr.msk.f32.gmra.mrb[30].mxu1 %vm2939_vm9, %v4235_v3 }
0x155c   : > { %5162 = vmatprep.mubr.msk.f32.mxu1 %vm2939_vm9, %v4237_v17 }
0x155f   : > { %5163 = vmatmul.mubr.msk.f32.gmra.mrb[32].mxu1 %vm2939_vm9, %v4239_v24 }
0x1626   : > { %v5155_v15 = vpop.f32.mrb[26].mxu1 }
0x1627   : > { %v5381_v9 = vadd.f32 %v5155_v15, %v6965_v48  ;;  %v4322_v39 = vpop.f32.mrb[27].mxu1 }
0x1628   : > { %v5382_v19 = vadd.f32 %v4322_v39, %v6967_v59 }
0x1629   : > { %v4418_v8 = vadd.f32 %v5381_v9, %v4385_v13 }
0x162a   : > { %v4417_v21 = vadd.f32 %v5382_v19, %v4380_v14  ;;  %v5158_v22 = vpop.f32.mrb[28].mxu1 }
0x162b   : > { %4426 = vst.msk [vmem:[%s7109_s29 + $0x8] sm:$0xff] %vm2080_vm6, %v4418_v8  ;;  %v5383_v48 = vadd.f32 %v5158_v22, %v6969_v62  ;;  %v4332_v1 = vpop.f32.mrb[29].mxu1 }
0x162c   : > { %4425 = vst.msk [vmem:[%s7109_s29] sm:$0xff] %vm2080_vm6, %v4417_v21  ;;  %v5384_v26 = vadd.f32 %v4332_v1, %v6971_v4 }
0x162d   : > { %v4420_v28 = vadd.f32 %v5383_v48, %v4395_v18 }
0x162e   : > { %v4419_v57 = vadd.f32 %v5384_v26, %v4390_v20  ;;  %v5161_v59 = vpop.f32.mrb[30].mxu1 }
0x162f   : > { %4428 = vst.msk [vmem:[%s7109_s29 + $0x18] sm:$0xff] %vm2080_vm6, %v4420_v28  ;;  %v5385_v33 = vadd.f32 %v5161_v59, %v6973_v5  ;;  %v4342_v16 = vpop.f32.mrb[31].mxu1 }
0x1630   : > { %4427 = vst.msk [vmem:[%s7109_s29 + $0x10] sm:$0xff] %vm2080_vm6, %v4419_v57  ;;  %v5386_v62 = vadd.f32 %v4342_v16, %v6975_v6 }
0x1631   : > { %v4422_v36 = vadd.f32 %v5385_v33, %v4405_v29 }
0x1632   : > { %v4421_v37 = vadd.f32 %v5386_v62, %v4400_v58  ;;  %v5164_v4 = vpop.f32.mrb[32].mxu1 }
0x1633   : > { %4430 = vst.msk [vmem:[%s7109_s29 + $0x28] sm:$0xff] %vm2080_vm6, %v4422_v36  ;;  %v5387_v38 = vadd.f32 %v5164_v4, %v6977_v10  ;;  %v4352_v0 = vpop.f32.mrb[33].mxu1 }
0x1634   : > { %4429 = vst.msk [vmem:[%s7109_s29 + $0x20] sm:$0xff] %vm2080_vm6, %v4421_v37  ;;  %v5388_v5 = vadd.f32 %v4352_v0, %v6979_v27 }
0x1635   : > { %v4424_v60 = vadd.f32 %v5387_v38, %v4415_v32 }
0x1636   : > { %v4423_v11 = vadd.f32 %v5388_v5, %v4410_v52 }
0x1637   : > { %4432 = vst.msk [vmem:[%s7109_s29 + $0x38] sm:$0xff] %vm2080_vm6, %v4424_v60 }
0x1638   : > { %4431 = vst.msk [vmem:[%s7109_s29 + $0x30] sm:$0xff] %vm2080_vm6, %v4423_v11 }
0x1639 PF: > { %s24_s25 = sadd.s32 1, %s5741_s25  }
0x163a   : > { %p21_p1 = scmp.ge.s32.totalorder %s24_s25, 4  }
0x163c   :  { %23 = sbr.rel (!%p21_p1) target bundleno = 1 (0x1), region = 107 }
0x1643   :  { %4454 = vsyncpa [#allocation4], 1 }
0x1644   :  { %4456 = vsyncpa [#allocation4 + $0x1], 1 }

</bundles_post_ra>
